<compile_context>
chip_gen: v5e
topology: v5e:2x2
jax: 0.10.0
libtpu: 0.0.40
codegen_flags: <defaults>
</compile_context>

<pallas_src>
import functools

import jax
import jax.numpy as jnp
from jax.experimental import pallas as pl
from jax.experimental.pallas import tpu as pltpu


def _round_up(x, m):
    return (x + m - 1) // m * m


# ----------------------------------------------------------------------------
# Pallas kernels
# ----------------------------------------------------------------------------
def _matmul_kernel(a_ref, w_ref, b_ref, o_ref, sum_ref, sumsq_ref, acc_ref,
                   *, apply_lrelu: bool):
    """Tiled  o = [leaky_relu](a @ w + b)  with f32 accumulator and
    per-M-tile BatchNorm partial sums (sum / sum of squares) in the epilogue."""
    k = pl.program_id(1)

    @pl.when(k == 0)
    def _():
        acc_ref[...] = jnp.zeros_like(acc_ref)

    acc_ref[...] += jnp.dot(a_ref[...], w_ref[...],
                            preferred_element_type=jnp.float32)

    @pl.when(k == pl.num_programs(1) - 1)
    def _():
        y = acc_ref[...] + b_ref[...]          # (tile_m, C) + (1, C)
        if apply_lrelu:
            y = jnp.where(y > 0, y, 0.2 * y)
        o_ref[...] = y
        # BatchNorm partial statistics for this M tile (zero-padded rows add 0).
        s = jnp.sum(y, axis=0, keepdims=True)        # (1, C)
        ss = jnp.sum(y * y, axis=0, keepdims=True)   # (1, C)
        sum_ref[...] = jnp.broadcast_to(s[None], sum_ref.shape)      # (1, 8, C)
        sumsq_ref[...] = jnp.broadcast_to(ss[None], sumsq_ref.shape)


def _bn_lrelu_kernel(x_ref, scale_ref, shift_ref, o_ref):
    """o = leaky_relu(x * scale + shift)  (per-channel scale/shift)."""
    y = x_ref[...] * scale_ref[...] + shift_ref[...]
    o_ref[...] = jnp.where(y > 0, y, 0.2 * y)


# ----------------------------------------------------------------------------
# pallas_call wrappers
# ----------------------------------------------------------------------------
def _pallas_matmul_bias(patches, w2d, b2d, apply_lrelu, tile_m, tile_k):
    M_pad, K_pad = patches.shape
    _, C_pad = w2d.shape
    num_m = M_pad // tile_m
    num_k = K_pad // tile_k
    kernel = functools.partial(_matmul_kernel, apply_lrelu=apply_lrelu)
    return pl.pallas_call(
        kernel,
        out_shape=(
            jax.ShapeDtypeStruct((M_pad, C_pad), jnp.float32),
            jax.ShapeDtypeStruct((num_m, 8, C_pad), jnp.float32),   # per-tile sums
            jax.ShapeDtypeStruct((num_m, 8, C_pad), jnp.float32),   # per-tile sumsq
        ),
        grid_spec=pltpu.PrefetchScalarGridSpec(
            num_scalar_prefetch=0,
            grid=(num_m, num_k),
            in_specs=[
                pl.BlockSpec((tile_m, tile_k), lambda i, k: (i, k)),   # patches (bf16)
                pl.BlockSpec((tile_k, C_pad), lambda i, k: (k, 0)),    # weights (bf16)
                pl.BlockSpec((1, C_pad), lambda i, k: (0, 0)),         # bias (f32)
            ],
            out_specs=[
                pl.BlockSpec((tile_m, C_pad), lambda i, k: (i, 0)),
                pl.BlockSpec((1, 8, C_pad), lambda i, k: (i, 0, 0)),
                pl.BlockSpec((1, 8, C_pad), lambda i, k: (i, 0, 0)),
            ],
            scratch_shapes=[pltpu.VMEM((tile_m, C_pad), jnp.float32)],
        ),
        compiler_params=pltpu.CompilerParams(
            dimension_semantics=("parallel", "arbitrary")),
    )(patches, w2d, b2d)


def _pallas_bn_lrelu(x2d, scale2d, shift2d, tile_m):
    M_pad, C_pad = x2d.shape
    num_m = M_pad // tile_m
    return pl.pallas_call(
        _bn_lrelu_kernel,
        out_shape=jax.ShapeDtypeStruct((M_pad, C_pad), jnp.float32),
        grid_spec=pltpu.PrefetchScalarGridSpec(
            num_scalar_prefetch=0,
            grid=(num_m,),
            in_specs=[
                pl.BlockSpec((tile_m, C_pad), lambda i: (i, 0)),
                pl.BlockSpec((1, C_pad), lambda i: (0, 0)),
                pl.BlockSpec((1, C_pad), lambda i: (0, 0)),
            ],
            out_specs=pl.BlockSpec((tile_m, C_pad), lambda i: (i, 0)),
        ),
        compiler_params=pltpu.CompilerParams(dimension_semantics=("parallel",)),
    )(x2d, scale2d, shift2d)


# ----------------------------------------------------------------------------
# im2col glue (plain JAX) + conv / batchnorm wrappers
# ----------------------------------------------------------------------------
def _im2col(x_nhwc, kh, kw, stride, padding):
    n, h, w, c = x_nhwc.shape
    xp = jnp.pad(x_nhwc, ((0, 0), (padding, padding), (padding, padding), (0, 0)))
    ho = (h + 2 * padding - kh) // stride + 1
    wo = (w + 2 * padding - kw) // stride + 1
    cols = []
    for i in range(kh):
        for j in range(kw):
            cols.append(
                xp[:, i: i + stride * ho: stride, j: j + stride * wo: stride, :]
            )
    patches = jnp.concatenate(cols, axis=-1)        # (N, Ho, Wo, KH*KW*C)
    return patches.reshape(n * ho * wo, kh * kw * c), (n, ho, wo)


def _conv(x_nhwc, w_oihw, b, stride, padding, apply_lrelu):
    cout, cin, kh, kw = w_oihw.shape
    patches, (n, ho, wo) = _im2col(x_nhwc, kh, kw, stride, padding)
    M, K = patches.shape

    # Lane/MXU-friendly padding.
    C_pad = _round_up(cout, 128)
    K_pad = _round_up(K, 128)
    tile_m = 256 if M >= 256 else _round_up(M, 16)
    M_pad = _round_up(M, tile_m)
    if K_pad % 512 == 0:
        tile_k = 512
    elif K_pad % 256 == 0:
        tile_k = 256
    else:
        tile_k = 128

    patches = jnp.pad(patches, ((0, M_pad - M), (0, K_pad - K))).astype(jnp.bfloat16)
    # (Cout, Cin, KH, KW) -> (KH, KW, Cin, Cout) -> (KH*KW*Cin, Cout)  [matches tap order]
    w2d = jnp.transpose(w_oihw, (2, 3, 1, 0)).reshape(kh * kw * cin, cout)
    w2d = jnp.pad(w2d, ((0, K_pad - K), (0, C_pad - cout))).astype(jnp.bfloat16)
    if b is None:   # conv followed by batch-stat BatchNorm: bias is cancelled.
        b = jnp.zeros((cout,), jnp.float32)
    b2d = jnp.pad(b.astype(jnp.float32), (0, C_pad - cout)).reshape(1, C_pad)

    out_pad, s, ss = _pallas_matmul_bias(patches, w2d, b2d, apply_lrelu,
                                         tile_m, tile_k)
    return out_pad, s, ss, (n, ho, wo, cout, M, tile_m)


def _to_spatial(out_pad, meta):
    n, ho, wo, cout, M, _ = meta
    return out_pad[:M, :cout].reshape(n, ho, wo, cout)


def _batchnorm_lrelu(out_pad, s, ss, gamma, beta, meta, eps=1e-5):
    n, ho, wo, cout, M, tile_m = meta
    # Training-mode BatchNorm2d: stats over (N, H, W) == the M true rows.
    total = jnp.sum(s[:, 0, :], axis=0)[:cout]
    total_sq = jnp.sum(ss[:, 0, :], axis=0)[:cout]
    mean = total / M
    var = jnp.maximum(total_sq / M - mean * mean, 0.0)   # biased, like PyTorch
    scale = gamma / jnp.sqrt(var + eps)
    shift = beta - mean * scale
    C_pad = out_pad.shape[1]
    scale = jnp.pad(scale, (0, C_pad - cout)).reshape(1, C_pad)
    shift = jnp.pad(shift, (0, C_pad - cout)).reshape(1, C_pad)
    return _pallas_bn_lrelu(out_pad, scale, shift, tile_m)


# ----------------------------------------------------------------------------
# Discriminator forward
# ----------------------------------------------------------------------------
def init_params(key, in_channels=3):
    defs = [
        ("c1", in_channels, 64),
        ("c2", 64, 128),
        ("c3", 128, 256),
        ("c4a", 256, 512),
        ("c4b", 512, 1),
    ]
    params = {}
    for name, cin, cout in defs:
        key, kw_, kb_ = jax.random.split(key, 3)
        params[name + "_w"] = (
            jax.random.normal(kw_, (cout, cin, 4, 4), jnp.float32) * 0.05
        )
        params[name + "_b"] = jax.random.normal(kb_, (cout,), jnp.float32) * 0.05
    # BatchNorm affine params (PyTorch default init: weight=1, bias=0)
    for name, c in [("bn2", 128), ("bn3", 256), ("bn4", 512)]:
        params[name + "_g"] = jnp.ones((c,), jnp.float32)
        params[name + "_b"] = jnp.zeros((c,), jnp.float32)
    return params


@jax.jit
def discriminator_forward(x_nchw, params):
    x = jnp.transpose(x_nchw, (0, 2, 3, 1)).astype(jnp.float32)  # NCHW -> NHWC

    # conv1: Conv(3->64,k4,s2,p1) + LeakyReLU(0.2)   (bias + lrelu fused in epilogue)
    out_pad, _, _, meta = _conv(x, params["c1_w"], params["c1_b"], 2, 1, True)
    x = _to_spatial(out_pad, meta)

    # conv2: Conv(64->128,k4,s2,p1) + BN + LeakyReLU   (conv bias cancelled by BN)
    out_pad, s, ss, meta = _conv(x, params["c2_w"], None, 2, 1, False)
    out_pad = _batchnorm_lrelu(out_pad, s, ss, params["bn2_g"], params["bn2_b"], meta)
    x = _to_spatial(out_pad, meta)

    # conv3: Conv(128->256,k4,s2,p1) + BN + LeakyReLU
    out_pad, s, ss, meta = _conv(x, params["c3_w"], None, 2, 1, False)
    out_pad = _batchnorm_lrelu(out_pad, s, ss, params["bn3_g"], params["bn3_b"], meta)
    x = _to_spatial(out_pad, meta)

    # conv4: Conv(256->512,k4,s1,p1) + BN + LeakyReLU + Conv(512->1,k4,s1,p1)
    out_pad, s, ss, meta = _conv(x, params["c4a_w"], None, 1, 1, False)
    out_pad = _batchnorm_lrelu(out_pad, s, ss, params["bn4_g"], params["bn4_b"], meta)
    x = _to_spatial(out_pad, meta)

    out_pad, _, _, meta = _conv(x, params["c4b_w"], params["c4b_b"], 1, 1, False)
    x = _to_spatial(out_pad, meta)

    return jnp.transpose(x, (0, 3, 1, 2))  # NHWC -> NCHW (PyTorch output layout)


if __name__ == "__main__":
    key = jax.random.PRNGKey(0)
    kx, kp = jax.random.split(key)
    # Spatial size 32 so every conv (incl. the two stride-1 k4 convs) is valid:
    # 32 -> 16 -> 8 -> 4 -> 3 -> 2
    x = jax.random.normal(kx, (2, 3, 32, 32), jnp.float32)  # NCHW, like PyTorch
    params = init_params(kp, in_channels=3)

    out = discriminator_forward(x, params)
    jax.block_until_ready(out)
    assert out.shape == (2, 1, 2, 2), out.shape
    print("KERNEL_OK")
</pallas_src>

<mosaic_0001>
module attributes {stable_mosaic.version = 11 : i64} {
  func.func @_matmul_kernel(%arg0: i32, %arg1: i32, %arg2: memref<256x128xbf16, #tpu.memory_space<vmem>>, %arg3: memref<128x128xbf16, #tpu.memory_space<vmem>>, %arg4: memref<1x128xf32, #tpu.memory_space<vmem>>, %arg5: memref<256x128xf32, #tpu.memory_space<vmem>>, %arg6: memref<1x8x128xf32, #tpu.memory_space<vmem>>, %arg7: memref<1x8x128xf32, #tpu.memory_space<vmem>>, %arg8: memref<256x128xf32, #tpu.memory_space<vmem>>) attributes {dimension_semantics = [#tpu.dimension_semantics<parallel>, #tpu.dimension_semantics<arbitrary>], iteration_bounds = array<i64: 2, 1>, scalar_prefetch = 0 : i64, scratch_operands = 1 : i64, tpu.core_type = #tpu.core_type<tc>, window_params = [{transform_indices = @transform_0, window_bounds = array<i64: 256, 128>}, {transform_indices = @transform_1, window_bounds = array<i64: 128, 128>}, {pipeline_mode = #tpu.pipeline_mode<synchronous>, transform_indices = @transform_2, window_bounds = array<i64: 1, 128>}, {transform_indices = @transform_3, window_bounds = array<i64: 256, 128>}, {transform_indices = @transform_4, window_bounds = array<i64: 1, 8, 128>}, {transform_indices = @transform_5, window_bounds = array<i64: 1, 8, 128>}]} {
    %c0_i32 = arith.constant 0 : i32
    %0 = arith.cmpi eq, %arg1, %c0_i32 : i32
    %1 = arith.extui %0 : i1 to i32
    %c0_i32_0 = arith.constant 0 : i32
    %2 = arith.cmpi ne, %1, %c0_i32_0 : i32
    scf.if %2 {
      %cst_10 = arith.constant 0.000000e+00 : f32
      %12 = vector.broadcast %cst_10 : f32 to vector<256x128xf32>
      %c0_11 = arith.constant 0 : index
      %c0_12 = arith.constant 0 : index
      %13 = vector.load %arg8[%c0_11, %c0_12] : memref<256x128xf32, #tpu.memory_space<vmem>>, vector<256x128xf32>
      tpu.vector_store %arg8[%c0_11, %c0_12], %12 {strides = array<i32>} : memref<256x128xf32, #tpu.memory_space<vmem>>, vector<256x128xf32>,
    } else {
    }
    %c0 = arith.constant 0 : index
    %c0_1 = arith.constant 0 : index
    %3 = vector.load %arg8[%c0, %c0_1] : memref<256x128xf32, #tpu.memory_space<vmem>>, vector<256x128xf32>
    %c0_2 = arith.constant 0 : index
    %c0_3 = arith.constant 0 : index
    %4 = vector.load %arg2[%c0_2, %c0_3] : memref<256x128xbf16, #tpu.memory_space<vmem>>, vector<256x128xbf16>
    %c0_4 = arith.constant 0 : index
    %c0_5 = arith.constant 0 : index
    %5 = vector.load %arg3[%c0_4, %c0_5] : memref<128x128xbf16, #tpu.memory_space<vmem>>, vector<128x128xbf16>
    %cst = arith.constant dense<0.000000e+00> : vector<256x128xf32>
    %6 = tpu.matmul %4, %5, %cst {dimension_numbers = #tpu.dot_dimension_numbers<[1], [0], [0], [1], [0, 0, 1, 1], [], []>} : vector<256x128xbf16>, vector<128x128xbf16>, vector<256x128xf32> -> vector<256x128xf32>
    %7 = arith.addf %3, %6 : vector<256x128xf32>
    %c0_6 = arith.constant 0 : index
    %c0_7 = arith.constant 0 : index
    %8 = vector.load %arg8[%c0_6, %c0_7] : memref<256x128xf32, #tpu.memory_space<vmem>>, vector<256x128xf32>
    tpu.vector_store %arg8[%c0_6, %c0_7], %7 {strides = array<i32>} : memref<256x128xf32, #tpu.memory_space<vmem>>, vector<256x128xf32>,
    %c0_i32_8 = arith.constant 0 : i32
    %9 = arith.cmpi eq, %arg1, %c0_i32_8 : i32
    %10 = arith.extui %9 : i1 to i32
    %c0_i32_9 = arith.constant 0 : i32
    %11 = arith.cmpi ne, %10, %c0_i32_9 : i32
    scf.if %11 {
      %c0_10 = arith.constant 0 : index
      %c0_11 = arith.constant 0 : index
      %12 = vector.load %arg8[%c0_10, %c0_11] : memref<256x128xf32, #tpu.memory_space<vmem>>, vector<256x128xf32>
      %c0_12 = arith.constant 0 : index
      %c0_13 = arith.constant 0 : index
      %13 = vector.load %arg4[%c0_12, %c0_13] : memref<1x128xf32, #tpu.memory_space<vmem>>, vector<1x128xf32>
      %14 = vector.broadcast %13 : vector<1x128xf32> to vector<256x128xf32>
      %15 = arith.addf %12, %14 : vector<256x128xf32>
      %cst_14 = arith.constant 0.000000e+00 : f32
      %16 = vector.broadcast %cst_14 : f32 to vector<256x128xf32>
      %17 = arith.cmpf ogt, %15, %16 : vector<256x128xf32>
      %cst_15 = arith.constant 2.000000e-01 : f32
      %18 = vector.broadcast %cst_15 : f32 to vector<256x128xf32>
      %19 = arith.mulf %18, %15 : vector<256x128xf32>
      %20 = arith.select %17, %15, %19 : vector<256x128xi1>, vector<256x128xf32>
      %c0_16 = arith.constant 0 : index
      %c0_17 = arith.constant 0 : index
      %21 = vector.load %arg5[%c0_16, %c0_17] : memref<256x128xf32, #tpu.memory_space<vmem>>, vector<256x128xf32>
      tpu.vector_store %arg5[%c0_16, %c0_17], %20 {strides = array<i32>} : memref<256x128xf32, #tpu.memory_space<vmem>>, vector<256x128xf32>,
      %cst_18 = arith.constant dense<0.000000e+00> : vector<128xf32>
      %22 = vector.multi_reduction <add>, %20, %cst_18 [0] : vector<256x128xf32> to vector<128xf32>
      %23 = vector.shape_cast %22 : vector<128xf32> to vector<1x128xf32>
      %24 = arith.mulf %20, %20 : vector<256x128xf32>
      %cst_19 = arith.constant dense<0.000000e+00> : vector<128xf32>
      %25 = vector.multi_reduction <add>, %24, %cst_19 [0] : vector<256x128xf32> to vector<128xf32>
      %26 = vector.shape_cast %25 : vector<128xf32> to vector<1x128xf32>
      %27 = vector.shape_cast %23 : vector<1x128xf32> to vector<1x1x128xf32>
      %28 = vector.shape_cast %27 : vector<1x1x128xf32> to vector<1x1x128xf32>
      %29 = vector.broadcast %28 : vector<1x1x128xf32> to vector<1x8x128xf32>
      %c0_20 = arith.constant 0 : index
      %c0_21 = arith.constant 0 : index
      %c0_22 = arith.constant 0 : index
      %30 = vector.load %arg6[%c0_20, %c0_21, %c0_22] : memref<1x8x128xf32, #tpu.memory_space<vmem>>, vector<1x8x128xf32>
      tpu.vector_store %arg6[%c0_20, %c0_21, %c0_22], %29 {strides = array<i32>} : memref<1x8x128xf32, #tpu.memory_space<vmem>>, vector<1x8x128xf32>,
      %31 = vector.shape_cast %26 : vector<1x128xf32> to vector<1x1x128xf32>
      %32 = vector.shape_cast %31 : vector<1x1x128xf32> to vector<1x1x128xf32>
      %33 = vector.broadcast %32 : vector<1x1x128xf32> to vector<1x8x128xf32>
      %c0_23 = arith.constant 0 : index
      %c0_24 = arith.constant 0 : index
      %c0_25 = arith.constant 0 : index
      %34 = vector.load %arg7[%c0_23, %c0_24, %c0_25] : memref<1x8x128xf32, #tpu.memory_space<vmem>>, vector<1x8x128xf32>
      tpu.vector_store %arg7[%c0_23, %c0_24, %c0_25], %33 {strides = array<i32>} : memref<1x8x128xf32, #tpu.memory_space<vmem>>, vector<1x8x128xf32>,
    } else {
    }
    return
  }
  func.func @transform_0(%arg0: i32, %arg1: i32) -> (i32, i32) {
    %c0_i32 = arith.constant 0 : i32
    return %arg0, %arg1 : i32, i32
  }
  func.func @transform_1(%arg0: i32, %arg1: i32) -> (i32, i32) {
    %c0_i32 = arith.constant 0 : i32
    %c0_i32_0 = arith.constant 0 : i32
    return %arg1, %c0_i32 : i32, i32
  }
  func.func @transform_2(%arg0: i32, %arg1: i32) -> (i32, i32) {
    %c0_i32 = arith.constant 0 : i32
    %c0_i32_0 = arith.constant 0 : i32
    %c0_i32_1 = arith.constant 0 : i32
    return %c0_i32, %c0_i32_0 : i32, i32
  }
  func.func @transform_3(%arg0: i32, %arg1: i32) -> (i32, i32) {
    %c0_i32 = arith.constant 0 : i32
    %c0_i32_0 = arith.constant 0 : i32
    return %arg0, %c0_i32 : i32, i32
  }
  func.func @transform_4(%arg0: i32, %arg1: i32) -> (i32, i32, i32) {
    %c0_i32 = arith.constant 0 : i32
    %c0_i32_0 = arith.constant 0 : i32
    %c0_i32_1 = arith.constant 0 : i32
    return %arg0, %c0_i32, %c0_i32_0 : i32, i32, i32
  }
  func.func @transform_5(%arg0: i32, %arg1: i32) -> (i32, i32, i32) {
    %c0_i32 = arith.constant 0 : i32
    %c0_i32_0 = arith.constant 0 : i32
    %c0_i32_1 = arith.constant 0 : i32
    return %arg0, %c0_i32, %c0_i32_0 : i32, i32, i32
  }
}

module attributes {stable_mosaic.version = 11 : i64} {
  func.func @_bn_lrelu_kernel(%arg0: i32, %arg1: memref<128x128xf32, #tpu.memory_space<vmem>>, %arg2: memref<1x128xf32, #tpu.memory_space<vmem>>, %arg3: memref<1x128xf32, #tpu.memory_space<vmem>>, %arg4: memref<128x128xf32, #tpu.memory_space<vmem>>) attributes {dimension_semantics = [#tpu.dimension_semantics<parallel>], iteration_bounds = array<i64: 1>, scalar_prefetch = 0 : i64, scratch_operands = 0 : i64, tpu.core_type = #tpu.core_type<tc>, window_params = [{transform_indices = @transform_0, window_bounds = array<i64: 128, 128>}, {pipeline_mode = #tpu.pipeline_mode<synchronous>, transform_indices = @transform_1, window_bounds = array<i64: 1, 128>}, {pipeline_mode = #tpu.pipeline_mode<synchronous>, transform_indices = @transform_2, window_bounds = array<i64: 1, 128>}, {transform_indices = @transform_3, window_bounds = array<i64: 128, 128>}]} {
    %c0 = arith.constant 0 : index
    %c0_0 = arith.constant 0 : index
    %0 = vector.load %arg1[%c0, %c0_0] : memref<128x128xf32, #tpu.memory_space<vmem>>, vector<128x128xf32>
    %c0_1 = arith.constant 0 : index
    %c0_2 = arith.constant 0 : index
    %1 = vector.load %arg2[%c0_1, %c0_2] : memref<1x128xf32, #tpu.memory_space<vmem>>, vector<1x128xf32>
    %2 = vector.broadcast %1 : vector<1x128xf32> to vector<128x128xf32>
    %3 = arith.mulf %0, %2 : vector<128x128xf32>
    %c0_3 = arith.constant 0 : index
    %c0_4 = arith.constant 0 : index
    %4 = vector.load %arg3[%c0_3, %c0_4] : memref<1x128xf32, #tpu.memory_space<vmem>>, vector<1x128xf32>
    %5 = vector.broadcast %4 : vector<1x128xf32> to vector<128x128xf32>
    %6 = arith.addf %3, %5 : vector<128x128xf32>
    %cst = arith.constant 0.000000e+00 : f32
    %7 = vector.broadcast %cst : f32 to vector<128x128xf32>
    %8 = arith.cmpf ogt, %6, %7 : vector<128x128xf32>
    %cst_5 = arith.constant 2.000000e-01 : f32
    %9 = vector.broadcast %cst_5 : f32 to vector<128x128xf32>
    %10 = arith.mulf %9, %6 : vector<128x128xf32>
    %11 = arith.select %8, %6, %10 : vector<128x128xi1>, vector<128x128xf32>
    %c0_6 = arith.constant 0 : index
    %c0_7 = arith.constant 0 : index
    %12 = vector.load %arg4[%c0_6, %c0_7] : memref<128x128xf32, #tpu.memory_space<vmem>>, vector<128x128xf32>
    tpu.vector_store %arg4[%c0_6, %c0_7], %11 {strides = array<i32>} : memref<128x128xf32, #tpu.memory_space<vmem>>, vector<128x128xf32>,
    return
  }
  func.func @transform_0(%arg0: i32) -> (i32, i32) {
    %c0_i32 = arith.constant 0 : i32
    %c0_i32_0 = arith.constant 0 : i32
    return %arg0, %c0_i32 : i32, i32
  }
  func.func @transform_1(%arg0: i32) -> (i32, i32) {
    %c0_i32 = arith.constant 0 : i32
    %c0_i32_0 = arith.constant 0 : i32
    %c0_i32_1 = arith.constant 0 : i32
    return %c0_i32, %c0_i32_0 : i32, i32
  }
  func.func @transform_2(%arg0: i32) -> (i32, i32) {
    %c0_i32 = arith.constant 0 : i32
    %c0_i32_0 = arith.constant 0 : i32
    %c0_i32_1 = arith.constant 0 : i32
    return %c0_i32, %c0_i32_0 : i32, i32
  }
  func.func @transform_3(%arg0: i32) -> (i32, i32) {
    %c0_i32 = arith.constant 0 : i32
    %c0_i32_0 = arith.constant 0 : i32
    return %arg0, %c0_i32 : i32, i32
  }
}

module attributes {stable_mosaic.version = 11 : i64} {
  func.func @_matmul_kernel(%arg0: i32, %arg1: i32, %arg2: memref<128x512xbf16, #tpu.memory_space<vmem>>, %arg3: memref<512x128xbf16, #tpu.memory_space<vmem>>, %arg4: memref<1x128xf32, #tpu.memory_space<vmem>>, %arg5: memref<128x128xf32, #tpu.memory_space<vmem>>, %arg6: memref<1x8x128xf32, #tpu.memory_space<vmem>>, %arg7: memref<1x8x128xf32, #tpu.memory_space<vmem>>, %arg8: memref<128x128xf32, #tpu.memory_space<vmem>>) attributes {dimension_semantics = [#tpu.dimension_semantics<parallel>, #tpu.dimension_semantics<arbitrary>], iteration_bounds = array<i64: 1, 2>, scalar_prefetch = 0 : i64, scratch_operands = 1 : i64, tpu.core_type = #tpu.core_type<tc>, window_params = [{transform_indices = @transform_0, window_bounds = array<i64: 128, 512>}, {transform_indices = @transform_1, window_bounds = array<i64: 512, 128>}, {pipeline_mode = #tpu.pipeline_mode<synchronous>, transform_indices = @transform_2, window_bounds = array<i64: 1, 128>}, {transform_indices = @transform_3, window_bounds = array<i64: 128, 128>}, {transform_indices = @transform_4, window_bounds = array<i64: 1, 8, 128>}, {transform_indices = @transform_5, window_bounds = array<i64: 1, 8, 128>}]} {
    %c0_i32 = arith.constant 0 : i32
    %0 = arith.cmpi eq, %arg1, %c0_i32 : i32
    %1 = arith.extui %0 : i1 to i32
    %c0_i32_0 = arith.constant 0 : i32
    %2 = arith.cmpi ne, %1, %c0_i32_0 : i32
    scf.if %2 {
      %cst_9 = arith.constant 0.000000e+00 : f32
      %12 = vector.broadcast %cst_9 : f32 to vector<128x128xf32>
      %c0_10 = arith.constant 0 : index
      %c0_11 = arith.constant 0 : index
      %13 = vector.load %arg8[%c0_10, %c0_11] : memref<128x128xf32, #tpu.memory_space<vmem>>, vector<128x128xf32>
      tpu.vector_store %arg8[%c0_10, %c0_11], %12 {strides = array<i32>} : memref<128x128xf32, #tpu.memory_space<vmem>>, vector<128x128xf32>,
    } else {
    }
    %c0 = arith.constant 0 : index
    %c0_1 = arith.constant 0 : index
    %3 = vector.load %arg8[%c0, %c0_1] : memref<128x128xf32, #tpu.memory_space<vmem>>, vector<128x128xf32>
    %c0_2 = arith.constant 0 : index
    %c0_3 = arith.constant 0 : index
    %4 = vector.load %arg2[%c0_2, %c0_3] : memref<128x512xbf16, #tpu.memory_space<vmem>>, vector<128x512xbf16>
    %c0_4 = arith.constant 0 : index
    %c0_5 = arith.constant 0 : index
    %5 = vector.load %arg3[%c0_4, %c0_5] : memref<512x128xbf16, #tpu.memory_space<vmem>>, vector<512x128xbf16>
    %cst = arith.constant dense<0.000000e+00> : vector<128x128xf32>
    %6 = tpu.matmul %4, %5, %cst {dimension_numbers = #tpu.dot_dimension_numbers<[1], [0], [0], [1], [0, 0, 1, 1], [], []>} : vector<128x512xbf16>, vector<512x128xbf16>, vector<128x128xf32> -> vector<128x128xf32>
    %7 = arith.addf %3, %6 : vector<128x128xf32>
    %c0_6 = arith.constant 0 : index
    %c0_7 = arith.constant 0 : index
    %8 = vector.load %arg8[%c0_6, %c0_7] : memref<128x128xf32, #tpu.memory_space<vmem>>, vector<128x128xf32>
    tpu.vector_store %arg8[%c0_6, %c0_7], %7 {strides = array<i32>} : memref<128x128xf32, #tpu.memory_space<vmem>>, vector<128x128xf32>,
    %c1_i32 = arith.constant 1 : i32
    %9 = arith.cmpi eq, %arg1, %c1_i32 : i32
    %10 = arith.extui %9 : i1 to i32
    %c0_i32_8 = arith.constant 0 : i32
    %11 = arith.cmpi ne, %10, %c0_i32_8 : i32
    scf.if %11 {
      %c0_9 = arith.constant 0 : index
      %c0_10 = arith.constant 0 : index
      %12 = vector.load %arg8[%c0_9, %c0_10] : memref<128x128xf32, #tpu.memory_space<vmem>>, vector<128x128xf32>
      %c0_11 = arith.constant 0 : index
      %c0_12 = arith.constant 0 : index
      %13 = vector.load %arg4[%c0_11, %c0_12] : memref<1x128xf32, #tpu.memory_space<vmem>>, vector<1x128xf32>
      %14 = vector.broadcast %13 : vector<1x128xf32> to vector<128x128xf32>
      %15 = arith.addf %12, %14 : vector<128x128xf32>
      %c0_13 = arith.constant 0 : index
      %c0_14 = arith.constant 0 : index
      %16 = vector.load %arg5[%c0_13, %c0_14] : memref<128x128xf32, #tpu.memory_space<vmem>>, vector<128x128xf32>
      tpu.vector_store %arg5[%c0_13, %c0_14], %15 {strides = array<i32>} : memref<128x128xf32, #tpu.memory_space<vmem>>, vector<128x128xf32>,
      %cst_15 = arith.constant dense<0.000000e+00> : vector<128xf32>
      %17 = vector.multi_reduction <add>, %15, %cst_15 [0] : vector<128x128xf32> to vector<128xf32>
      %18 = vector.shape_cast %17 : vector<128xf32> to vector<1x128xf32>
      %19 = arith.mulf %15, %15 : vector<128x128xf32>
      %cst_16 = arith.constant dense<0.000000e+00> : vector<128xf32>
      %20 = vector.multi_reduction <add>, %19, %cst_16 [0] : vector<128x128xf32> to vector<128xf32>
      %21 = vector.shape_cast %20 : vector<128xf32> to vector<1x128xf32>
      %22 = vector.shape_cast %18 : vector<1x128xf32> to vector<1x1x128xf32>
      %23 = vector.shape_cast %22 : vector<1x1x128xf32> to vector<1x1x128xf32>
      %24 = vector.broadcast %23 : vector<1x1x128xf32> to vector<1x8x128xf32>
      %c0_17 = arith.constant 0 : index
      %c0_18 = arith.constant 0 : index
      %c0_19 = arith.constant 0 : index
      %25 = vector.load %arg6[%c0_17, %c0_18, %c0_19] : memref<1x8x128xf32, #tpu.memory_space<vmem>>, vector<1x8x128xf32>
      tpu.vector_store %arg6[%c0_17, %c0_18, %c0_19], %24 {strides = array<i32>} : memref<1x8x128xf32, #tpu.memory_space<vmem>>, vector<1x8x128xf32>,
      %26 = vector.shape_cast %21 : vector<1x128xf32> to vector<1x1x128xf32>
      %27 = vector.shape_cast %26 : vector<1x1x128xf32> to vector<1x1x128xf32>
      %28 = vector.broadcast %27 : vector<1x1x128xf32> to vector<1x8x128xf32>
      %c0_20 = arith.constant 0 : index
      %c0_21 = arith.constant 0 : index
      %c0_22 = arith.constant 0 : index
      %29 = vector.load %arg7[%c0_20, %c0_21, %c0_22] : memref<1x8x128xf32, #tpu.memory_space<vmem>>, vector<1x8x128xf32>
      tpu.vector_store %arg7[%c0_20, %c0_21, %c0_22], %28 {strides = array<i32>} : memref<1x8x128xf32, #tpu.memory_space<vmem>>, vector<1x8x128xf32>,
    } else {
    }
    return
  }
  func.func @transform_0(%arg0: i32, %arg1: i32) -> (i32, i32) {
    %c0_i32 = arith.constant 0 : i32
    return %arg0, %arg1 : i32, i32
  }
  func.func @transform_1(%arg0: i32, %arg1: i32) -> (i32, i32) {
    %c0_i32 = arith.constant 0 : i32
    %c0_i32_0 = arith.constant 0 : i32
    return %arg1, %c0_i32 : i32, i32
  }
  func.func @transform_2(%arg0: i32, %arg1: i32) -> (i32, i32) {
    %c0_i32 = arith.constant 0 : i32
    %c0_i32_0 = arith.constant 0 : i32
    %c0_i32_1 = arith.constant 0 : i32
    return %c0_i32, %c0_i32_0 : i32, i32
  }
  func.func @transform_3(%arg0: i32, %arg1: i32) -> (i32, i32) {
    %c0_i32 = arith.constant 0 : i32
    %c0_i32_0 = arith.constant 0 : i32
    return %arg0, %c0_i32 : i32, i32
  }
  func.func @transform_4(%arg0: i32, %arg1: i32) -> (i32, i32, i32) {
    %c0_i32 = arith.constant 0 : i32
    %c0_i32_0 = arith.constant 0 : i32
    %c0_i32_1 = arith.constant 0 : i32
    return %arg0, %c0_i32, %c0_i32_0 : i32, i32, i32
  }
  func.func @transform_5(%arg0: i32, %arg1: i32) -> (i32, i32, i32) {
    %c0_i32 = arith.constant 0 : i32
    %c0_i32_0 = arith.constant 0 : i32
    %c0_i32_1 = arith.constant 0 : i32
    return %arg0, %c0_i32, %c0_i32_0 : i32, i32, i32
  }
}

module attributes {stable_mosaic.version = 11 : i64} {
  func.func @_matmul_kernel(%arg0: i32, %arg1: i32, %arg2: memref<32x512xbf16, #tpu.memory_space<vmem>>, %arg3: memref<512x256xbf16, #tpu.memory_space<vmem>>, %arg4: memref<1x256xf32, #tpu.memory_space<vmem>>, %arg5: memref<32x256xf32, #tpu.memory_space<vmem>>, %arg6: memref<1x8x256xf32, #tpu.memory_space<vmem>>, %arg7: memref<1x8x256xf32, #tpu.memory_space<vmem>>, %arg8: memref<32x256xf32, #tpu.memory_space<vmem>>) attributes {dimension_semantics = [#tpu.dimension_semantics<parallel>, #tpu.dimension_semantics<arbitrary>], iteration_bounds = array<i64: 1, 4>, scalar_prefetch = 0 : i64, scratch_operands = 1 : i64, tpu.core_type = #tpu.core_type<tc>, window_params = [{transform_indices = @transform_0, window_bounds = array<i64: 32, 512>}, {transform_indices = @transform_1, window_bounds = array<i64: 512, 256>}, {pipeline_mode = #tpu.pipeline_mode<synchronous>, transform_indices = @transform_2, window_bounds = array<i64: 1, 256>}, {transform_indices = @transform_3, window_bounds = array<i64: 32, 256>}, {transform_indices = @transform_4, window_bounds = array<i64: 1, 8, 256>}, {transform_indices = @transform_5, window_bounds = array<i64: 1, 8, 256>}]} {
    %c0_i32 = arith.constant 0 : i32
    %0 = arith.cmpi eq, %arg1, %c0_i32 : i32
    %1 = arith.extui %0 : i1 to i32
    %c0_i32_0 = arith.constant 0 : i32
    %2 = arith.cmpi ne, %1, %c0_i32_0 : i32
    scf.if %2 {
      %cst_9 = arith.constant 0.000000e+00 : f32
      %12 = vector.broadcast %cst_9 : f32 to vector<32x256xf32>
      %c0_10 = arith.constant 0 : index
      %c0_11 = arith.constant 0 : index
      %13 = vector.load %arg8[%c0_10, %c0_11] : memref<32x256xf32, #tpu.memory_space<vmem>>, vector<32x256xf32>
      tpu.vector_store %arg8[%c0_10, %c0_11], %12 {strides = array<i32>} : memref<32x256xf32, #tpu.memory_space<vmem>>, vector<32x256xf32>,
    } else {
    }
    %c0 = arith.constant 0 : index
    %c0_1 = arith.constant 0 : index
    %3 = vector.load %arg8[%c0, %c0_1] : memref<32x256xf32, #tpu.memory_space<vmem>>, vector<32x256xf32>
    %c0_2 = arith.constant 0 : index
    %c0_3 = arith.constant 0 : index
    %4 = vector.load %arg2[%c0_2, %c0_3] : memref<32x512xbf16, #tpu.memory_space<vmem>>, vector<32x512xbf16>
    %c0_4 = arith.constant 0 : index
    %c0_5 = arith.constant 0 : index
    %5 = vector.load %arg3[%c0_4, %c0_5] : memref<512x256xbf16, #tpu.memory_space<vmem>>, vector<512x256xbf16>
    %cst = arith.constant dense<0.000000e+00> : vector<32x256xf32>
    %6 = tpu.matmul %4, %5, %cst {dimension_numbers = #tpu.dot_dimension_numbers<[1], [0], [0], [1], [0, 0, 1, 1], [], []>} : vector<32x512xbf16>, vector<512x256xbf16>, vector<32x256xf32> -> vector<32x256xf32>
    %7 = arith.addf %3, %6 : vector<32x256xf32>
    %c0_6 = arith.constant 0 : index
    %c0_7 = arith.constant 0 : index
    %8 = vector.load %arg8[%c0_6, %c0_7] : memref<32x256xf32, #tpu.memory_space<vmem>>, vector<32x256xf32>
    tpu.vector_store %arg8[%c0_6, %c0_7], %7 {strides = array<i32>} : memref<32x256xf32, #tpu.memory_space<vmem>>, vector<32x256xf32>,
    %c3_i32 = arith.constant 3 : i32
    %9 = arith.cmpi eq, %arg1, %c3_i32 : i32
    %10 = arith.extui %9 : i1 to i32
    %c0_i32_8 = arith.constant 0 : i32
    %11 = arith.cmpi ne, %10, %c0_i32_8 : i32
    scf.if %11 {
      %c0_9 = arith.constant 0 : index
      %c0_10 = arith.constant 0 : index
      %12 = vector.load %arg8[%c0_9, %c0_10] : memref<32x256xf32, #tpu.memory_space<vmem>>, vector<32x256xf32>
      %c0_11 = arith.constant 0 : index
      %c0_12 = arith.constant 0 : index
      %13 = vector.load %arg4[%c0_11, %c0_12] : memref<1x256xf32, #tpu.memory_space<vmem>>, vector<1x256xf32>
      %14 = vector.broadcast %13 : vector<1x256xf32> to vector<32x256xf32>
      %15 = arith.addf %12, %14 : vector<32x256xf32>
      %c0_13 = arith.constant 0 : index
      %c0_14 = arith.constant 0 : index
      %16 = vector.load %arg5[%c0_13, %c0_14] : memref<32x256xf32, #tpu.memory_space<vmem>>, vector<32x256xf32>
      tpu.vector_store %arg5[%c0_13, %c0_14], %15 {strides = array<i32>} : memref<32x256xf32, #tpu.memory_space<vmem>>, vector<32x256xf32>,
      %cst_15 = arith.constant dense<0.000000e+00> : vector<256xf32>
      %17 = vector.multi_reduction <add>, %15, %cst_15 [0] : vector<32x256xf32> to vector<256xf32>
      %18 = vector.shape_cast %17 : vector<256xf32> to vector<1x256xf32>
      %19 = arith.mulf %15, %15 : vector<32x256xf32>
      %cst_16 = arith.constant dense<0.000000e+00> : vector<256xf32>
      %20 = vector.multi_reduction <add>, %19, %cst_16 [0] : vector<32x256xf32> to vector<256xf32>
      %21 = vector.shape_cast %20 : vector<256xf32> to vector<1x256xf32>
      %22 = vector.shape_cast %18 : vector<1x256xf32> to vector<1x1x256xf32>
      %23 = vector.shape_cast %22 : vector<1x1x256xf32> to vector<1x1x256xf32>
      %24 = vector.broadcast %23 : vector<1x1x256xf32> to vector<1x8x256xf32>
      %c0_17 = arith.constant 0 : index
      %c0_18 = arith.constant 0 : index
      %c0_19 = arith.constant 0 : index
      %25 = vector.load %arg6[%c0_17, %c0_18, %c0_19] : memref<1x8x256xf32, #tpu.memory_space<vmem>>, vector<1x8x256xf32>
      tpu.vector_store %arg6[%c0_17, %c0_18, %c0_19], %24 {strides = array<i32>} : memref<1x8x256xf32, #tpu.memory_space<vmem>>, vector<1x8x256xf32>,
      %26 = vector.shape_cast %21 : vector<1x256xf32> to vector<1x1x256xf32>
      %27 = vector.shape_cast %26 : vector<1x1x256xf32> to vector<1x1x256xf32>
      %28 = vector.broadcast %27 : vector<1x1x256xf32> to vector<1x8x256xf32>
      %c0_20 = arith.constant 0 : index
      %c0_21 = arith.constant 0 : index
      %c0_22 = arith.constant 0 : index
      %29 = vector.load %arg7[%c0_20, %c0_21, %c0_22] : memref<1x8x256xf32, #tpu.memory_space<vmem>>, vector<1x8x256xf32>
      tpu.vector_store %arg7[%c0_20, %c0_21, %c0_22], %28 {strides = array<i32>} : memref<1x8x256xf32, #tpu.memory_space<vmem>>, vector<1x8x256xf32>,
    } else {
    }
    return
  }
  func.func @transform_0(%arg0: i32, %arg1: i32) -> (i32, i32) {
    %c0_i32 = arith.constant 0 : i32
    return %arg0, %arg1 : i32, i32
  }
  func.func @transform_1(%arg0: i32, %arg1: i32) -> (i32, i32) {
    %c0_i32 = arith.constant 0 : i32
    %c0_i32_0 = arith.constant 0 : i32
    return %arg1, %c0_i32 : i32, i32
  }
  func.func @transform_2(%arg0: i32, %arg1: i32) -> (i32, i32) {
    %c0_i32 = arith.constant 0 : i32
    %c0_i32_0 = arith.constant 0 : i32
    %c0_i32_1 = arith.constant 0 : i32
    return %c0_i32, %c0_i32_0 : i32, i32
  }
  func.func @transform_3(%arg0: i32, %arg1: i32) -> (i32, i32) {
    %c0_i32 = arith.constant 0 : i32
    %c0_i32_0 = arith.constant 0 : i32
    return %arg0, %c0_i32 : i32, i32
  }
  func.func @transform_4(%arg0: i32, %arg1: i32) -> (i32, i32, i32) {
    %c0_i32 = arith.constant 0 : i32
    %c0_i32_0 = arith.constant 0 : i32
    %c0_i32_1 = arith.constant 0 : i32
    return %arg0, %c0_i32, %c0_i32_0 : i32, i32, i32
  }
  func.func @transform_5(%arg0: i32, %arg1: i32) -> (i32, i32, i32) {
    %c0_i32 = arith.constant 0 : i32
    %c0_i32_0 = arith.constant 0 : i32
    %c0_i32_1 = arith.constant 0 : i32
    return %arg0, %c0_i32, %c0_i32_0 : i32, i32, i32
  }
}

module attributes {stable_mosaic.version = 11 : i64} {
  func.func @_bn_lrelu_kernel(%arg0: i32, %arg1: memref<32x256xf32, #tpu.memory_space<vmem>>, %arg2: memref<1x256xf32, #tpu.memory_space<vmem>>, %arg3: memref<1x256xf32, #tpu.memory_space<vmem>>, %arg4: memref<32x256xf32, #tpu.memory_space<vmem>>) attributes {dimension_semantics = [#tpu.dimension_semantics<parallel>], iteration_bounds = array<i64: 1>, scalar_prefetch = 0 : i64, scratch_operands = 0 : i64, tpu.core_type = #tpu.core_type<tc>, window_params = [{transform_indices = @transform_0, window_bounds = array<i64: 32, 256>}, {pipeline_mode = #tpu.pipeline_mode<synchronous>, transform_indices = @transform_1, window_bounds = array<i64: 1, 256>}, {pipeline_mode = #tpu.pipeline_mode<synchronous>, transform_indices = @transform_2, window_bounds = array<i64: 1, 256>}, {transform_indices = @transform_3, window_bounds = array<i64: 32, 256>}]} {
    %c0 = arith.constant 0 : index
    %c0_0 = arith.constant 0 : index
    %0 = vector.load %arg1[%c0, %c0_0] : memref<32x256xf32, #tpu.memory_space<vmem>>, vector<32x256xf32>
    %c0_1 = arith.constant 0 : index
    %c0_2 = arith.constant 0 : index
    %1 = vector.load %arg2[%c0_1, %c0_2] : memref<1x256xf32, #tpu.memory_space<vmem>>, vector<1x256xf32>
    %2 = vector.broadcast %1 : vector<1x256xf32> to vector<32x256xf32>
    %3 = arith.mulf %0, %2 : vector<32x256xf32>
    %c0_3 = arith.constant 0 : index
    %c0_4 = arith.constant 0 : index
    %4 = vector.load %arg3[%c0_3, %c0_4] : memref<1x256xf32, #tpu.memory_space<vmem>>, vector<1x256xf32>
    %5 = vector.broadcast %4 : vector<1x256xf32> to vector<32x256xf32>
    %6 = arith.addf %3, %5 : vector<32x256xf32>
    %cst = arith.constant 0.000000e+00 : f32
    %7 = vector.broadcast %cst : f32 to vector<32x256xf32>
    %8 = arith.cmpf ogt, %6, %7 : vector<32x256xf32>
    %cst_5 = arith.constant 2.000000e-01 : f32
    %9 = vector.broadcast %cst_5 : f32 to vector<32x256xf32>
    %10 = arith.mulf %9, %6 : vector<32x256xf32>
    %11 = arith.select %8, %6, %10 : vector<32x256xi1>, vector<32x256xf32>
    %c0_6 = arith.constant 0 : index
    %c0_7 = arith.constant 0 : index
    %12 = vector.load %arg4[%c0_6, %c0_7] : memref<32x256xf32, #tpu.memory_space<vmem>>, vector<32x256xf32>
    tpu.vector_store %arg4[%c0_6, %c0_7], %11 {strides = array<i32>} : memref<32x256xf32, #tpu.memory_space<vmem>>, vector<32x256xf32>,
    return
  }
  func.func @transform_0(%arg0: i32) -> (i32, i32) {
    %c0_i32 = arith.constant 0 : i32
    %c0_i32_0 = arith.constant 0 : i32
    return %arg0, %c0_i32 : i32, i32
  }
  func.func @transform_1(%arg0: i32) -> (i32, i32) {
    %c0_i32 = arith.constant 0 : i32
    %c0_i32_0 = arith.constant 0 : i32
    %c0_i32_1 = arith.constant 0 : i32
    return %c0_i32, %c0_i32_0 : i32, i32
  }
  func.func @transform_2(%arg0: i32) -> (i32, i32) {
    %c0_i32 = arith.constant 0 : i32
    %c0_i32_0 = arith.constant 0 : i32
    %c0_i32_1 = arith.constant 0 : i32
    return %c0_i32, %c0_i32_0 : i32, i32
  }
  func.func @transform_3(%arg0: i32) -> (i32, i32) {
    %c0_i32 = arith.constant 0 : i32
    %c0_i32_0 = arith.constant 0 : i32
    return %arg0, %c0_i32 : i32, i32
  }
}

module attributes {stable_mosaic.version = 11 : i64} {
  func.func @_matmul_kernel(%arg0: i32, %arg1: i32, %arg2: memref<32x512xbf16, #tpu.memory_space<vmem>>, %arg3: memref<512x512xbf16, #tpu.memory_space<vmem>>, %arg4: memref<1x512xf32, #tpu.memory_space<vmem>>, %arg5: memref<32x512xf32, #tpu.memory_space<vmem>>, %arg6: memref<1x8x512xf32, #tpu.memory_space<vmem>>, %arg7: memref<1x8x512xf32, #tpu.memory_space<vmem>>, %arg8: memref<32x512xf32, #tpu.memory_space<vmem>>) attributes {dimension_semantics = [#tpu.dimension_semantics<parallel>, #tpu.dimension_semantics<arbitrary>], iteration_bounds = array<i64: 1, 8>, scalar_prefetch = 0 : i64, scratch_operands = 1 : i64, tpu.core_type = #tpu.core_type<tc>, window_params = [{transform_indices = @transform_0, window_bounds = array<i64: 32, 512>}, {transform_indices = @transform_1, window_bounds = array<i64: 512, 512>}, {pipeline_mode = #tpu.pipeline_mode<synchronous>, transform_indices = @transform_2, window_bounds = array<i64: 1, 512>}, {transform_indices = @transform_3, window_bounds = array<i64: 32, 512>}, {transform_indices = @transform_4, window_bounds = array<i64: 1, 8, 512>}, {transform_indices = @transform_5, window_bounds = array<i64: 1, 8, 512>}]} {
    %c0_i32 = arith.constant 0 : i32
    %0 = arith.cmpi eq, %arg1, %c0_i32 : i32
    %1 = arith.extui %0 : i1 to i32
    %c0_i32_0 = arith.constant 0 : i32
    %2 = arith.cmpi ne, %1, %c0_i32_0 : i32
    scf.if %2 {
      %cst_9 = arith.constant 0.000000e+00 : f32
      %12 = vector.broadcast %cst_9 : f32 to vector<32x512xf32>
      %c0_10 = arith.constant 0 : index
      %c0_11 = arith.constant 0 : index
      %13 = vector.load %arg8[%c0_10, %c0_11] : memref<32x512xf32, #tpu.memory_space<vmem>>, vector<32x512xf32>
      tpu.vector_store %arg8[%c0_10, %c0_11], %12 {strides = array<i32>} : memref<32x512xf32, #tpu.memory_space<vmem>>, vector<32x512xf32>,
    } else {
    }
    %c0 = arith.constant 0 : index
    %c0_1 = arith.constant 0 : index
    %3 = vector.load %arg8[%c0, %c0_1] : memref<32x512xf32, #tpu.memory_space<vmem>>, vector<32x512xf32>
    %c0_2 = arith.constant 0 : index
    %c0_3 = arith.constant 0 : index
    %4 = vector.load %arg2[%c0_2, %c0_3] : memref<32x512xbf16, #tpu.memory_space<vmem>>, vector<32x512xbf16>
    %c0_4 = arith.constant 0 : index
    %c0_5 = arith.constant 0 : index
    %5 = vector.load %arg3[%c0_4, %c0_5] : memref<512x512xbf16, #tpu.memory_space<vmem>>, vector<512x512xbf16>
    %cst = arith.constant dense<0.000000e+00> : vector<32x512xf32>
    %6 = tpu.matmul %4, %5, %cst {dimension_numbers = #tpu.dot_dimension_numbers<[1], [0], [0], [1], [0, 0, 1, 1], [], []>} : vector<32x512xbf16>, vector<512x512xbf16>, vector<32x512xf32> -> vector<32x512xf32>
    %7 = arith.addf %3, %6 : vector<32x512xf32>
    %c0_6 = arith.constant 0 : index
    %c0_7 = arith.constant 0 : index
    %8 = vector.load %arg8[%c0_6, %c0_7] : memref<32x512xf32, #tpu.memory_space<vmem>>, vector<32x512xf32>
    tpu.vector_store %arg8[%c0_6, %c0_7], %7 {strides = array<i32>} : memref<32x512xf32, #tpu.memory_space<vmem>>, vector<32x512xf32>,
    %c7_i32 = arith.constant 7 : i32
    %9 = arith.cmpi eq, %arg1, %c7_i32 : i32
    %10 = arith.extui %9 : i1 to i32
    %c0_i32_8 = arith.constant 0 : i32
    %11 = arith.cmpi ne, %10, %c0_i32_8 : i32
    scf.if %11 {
      %c0_9 = arith.constant 0 : index
      %c0_10 = arith.constant 0 : index
      %12 = vector.load %arg8[%c0_9, %c0_10] : memref<32x512xf32, #tpu.memory_space<vmem>>, vector<32x512xf32>
      %c0_11 = arith.constant 0 : index
      %c0_12 = arith.constant 0 : index
      %13 = vector.load %arg4[%c0_11, %c0_12] : memref<1x512xf32, #tpu.memory_space<vmem>>, vector<1x512xf32>
      %14 = vector.broadcast %13 : vector<1x512xf32> to vector<32x512xf32>
      %15 = arith.addf %12, %14 : vector<32x512xf32>
      %c0_13 = arith.constant 0 : index
      %c0_14 = arith.constant 0 : index
      %16 = vector.load %arg5[%c0_13, %c0_14] : memref<32x512xf32, #tpu.memory_space<vmem>>, vector<32x512xf32>
      tpu.vector_store %arg5[%c0_13, %c0_14], %15 {strides = array<i32>} : memref<32x512xf32, #tpu.memory_space<vmem>>, vector<32x512xf32>,
      %cst_15 = arith.constant dense<0.000000e+00> : vector<512xf32>
      %17 = vector.multi_reduction <add>, %15, %cst_15 [0] : vector<32x512xf32> to vector<512xf32>
      %18 = vector.shape_cast %17 : vector<512xf32> to vector<1x512xf32>
      %19 = arith.mulf %15, %15 : vector<32x512xf32>
      %cst_16 = arith.constant dense<0.000000e+00> : vector<512xf32>
      %20 = vector.multi_reduction <add>, %19, %cst_16 [0] : vector<32x512xf32> to vector<512xf32>
      %21 = vector.shape_cast %20 : vector<512xf32> to vector<1x512xf32>
      %22 = vector.shape_cast %18 : vector<1x512xf32> to vector<1x1x512xf32>
      %23 = vector.shape_cast %22 : vector<1x1x512xf32> to vector<1x1x512xf32>
      %24 = vector.broadcast %23 : vector<1x1x512xf32> to vector<1x8x512xf32>
      %c0_17 = arith.constant 0 : index
      %c0_18 = arith.constant 0 : index
      %c0_19 = arith.constant 0 : index
      %25 = vector.load %arg6[%c0_17, %c0_18, %c0_19] : memref<1x8x512xf32, #tpu.memory_space<vmem>>, vector<1x8x512xf32>
      tpu.vector_store %arg6[%c0_17, %c0_18, %c0_19], %24 {strides = array<i32>} : memref<1x8x512xf32, #tpu.memory_space<vmem>>, vector<1x8x512xf32>,
      %26 = vector.shape_cast %21 : vector<1x512xf32> to vector<1x1x512xf32>
      %27 = vector.shape_cast %26 : vector<1x1x512xf32> to vector<1x1x512xf32>
      %28 = vector.broadcast %27 : vector<1x1x512xf32> to vector<1x8x512xf32>
      %c0_20 = arith.constant 0 : index
      %c0_21 = arith.constant 0 : index
      %c0_22 = arith.constant 0 : index
      %29 = vector.load %arg7[%c0_20, %c0_21, %c0_22] : memref<1x8x512xf32, #tpu.memory_space<vmem>>, vector<1x8x512xf32>
      tpu.vector_store %arg7[%c0_20, %c0_21, %c0_22], %28 {strides = array<i32>} : memref<1x8x512xf32, #tpu.memory_space<vmem>>, vector<1x8x512xf32>,
    } else {
    }
    return
  }
  func.func @transform_0(%arg0: i32, %arg1: i32) -> (i32, i32) {
    %c0_i32 = arith.constant 0 : i32
    return %arg0, %arg1 : i32, i32
  }
  func.func @transform_1(%arg0: i32, %arg1: i32) -> (i32, i32) {
    %c0_i32 = arith.constant 0 : i32
    %c0_i32_0 = arith.constant 0 : i32
    return %arg1, %c0_i32 : i32, i32
  }
  func.func @transform_2(%arg0: i32, %arg1: i32) -> (i32, i32) {
    %c0_i32 = arith.constant 0 : i32
    %c0_i32_0 = arith.constant 0 : i32
    %c0_i32_1 = arith.constant 0 : i32
    return %c0_i32, %c0_i32_0 : i32, i32
  }
  func.func @transform_3(%arg0: i32, %arg1: i32) -> (i32, i32) {
    %c0_i32 = arith.constant 0 : i32
    %c0_i32_0 = arith.constant 0 : i32
    return %arg0, %c0_i32 : i32, i32
  }
  func.func @transform_4(%arg0: i32, %arg1: i32) -> (i32, i32, i32) {
    %c0_i32 = arith.constant 0 : i32
    %c0_i32_0 = arith.constant 0 : i32
    %c0_i32_1 = arith.constant 0 : i32
    return %arg0, %c0_i32, %c0_i32_0 : i32, i32, i32
  }
  func.func @transform_5(%arg0: i32, %arg1: i32) -> (i32, i32, i32) {
    %c0_i32 = arith.constant 0 : i32
    %c0_i32_0 = arith.constant 0 : i32
    %c0_i32_1 = arith.constant 0 : i32
    return %arg0, %c0_i32, %c0_i32_0 : i32, i32, i32
  }
}

module attributes {stable_mosaic.version = 11 : i64} {
  func.func @_bn_lrelu_kernel(%arg0: i32, %arg1: memref<32x512xf32, #tpu.memory_space<vmem>>, %arg2: memref<1x512xf32, #tpu.memory_space<vmem>>, %arg3: memref<1x512xf32, #tpu.memory_space<vmem>>, %arg4: memref<32x512xf32, #tpu.memory_space<vmem>>) attributes {dimension_semantics = [#tpu.dimension_semantics<parallel>], iteration_bounds = array<i64: 1>, scalar_prefetch = 0 : i64, scratch_operands = 0 : i64, tpu.core_type = #tpu.core_type<tc>, window_params = [{transform_indices = @transform_0, window_bounds = array<i64: 32, 512>}, {pipeline_mode = #tpu.pipeline_mode<synchronous>, transform_indices = @transform_1, window_bounds = array<i64: 1, 512>}, {pipeline_mode = #tpu.pipeline_mode<synchronous>, transform_indices = @transform_2, window_bounds = array<i64: 1, 512>}, {transform_indices = @transform_3, window_bounds = array<i64: 32, 512>}]} {
    %c0 = arith.constant 0 : index
    %c0_0 = arith.constant 0 : index
    %0 = vector.load %arg1[%c0, %c0_0] : memref<32x512xf32, #tpu.memory_space<vmem>>, vector<32x512xf32>
    %c0_1 = arith.constant 0 : index
    %c0_2 = arith.constant 0 : index
    %1 = vector.load %arg2[%c0_1, %c0_2] : memref<1x512xf32, #tpu.memory_space<vmem>>, vector<1x512xf32>
    %2 = vector.broadcast %1 : vector<1x512xf32> to vector<32x512xf32>
    %3 = arith.mulf %0, %2 : vector<32x512xf32>
    %c0_3 = arith.constant 0 : index
    %c0_4 = arith.constant 0 : index
    %4 = vector.load %arg3[%c0_3, %c0_4] : memref<1x512xf32, #tpu.memory_space<vmem>>, vector<1x512xf32>
    %5 = vector.broadcast %4 : vector<1x512xf32> to vector<32x512xf32>
    %6 = arith.addf %3, %5 : vector<32x512xf32>
    %cst = arith.constant 0.000000e+00 : f32
    %7 = vector.broadcast %cst : f32 to vector<32x512xf32>
    %8 = arith.cmpf ogt, %6, %7 : vector<32x512xf32>
    %cst_5 = arith.constant 2.000000e-01 : f32
    %9 = vector.broadcast %cst_5 : f32 to vector<32x512xf32>
    %10 = arith.mulf %9, %6 : vector<32x512xf32>
    %11 = arith.select %8, %6, %10 : vector<32x512xi1>, vector<32x512xf32>
    %c0_6 = arith.constant 0 : index
    %c0_7 = arith.constant 0 : index
    %12 = vector.load %arg4[%c0_6, %c0_7] : memref<32x512xf32, #tpu.memory_space<vmem>>, vector<32x512xf32>
    tpu.vector_store %arg4[%c0_6, %c0_7], %11 {strides = array<i32>} : memref<32x512xf32, #tpu.memory_space<vmem>>, vector<32x512xf32>,
    return
  }
  func.func @transform_0(%arg0: i32) -> (i32, i32) {
    %c0_i32 = arith.constant 0 : i32
    %c0_i32_0 = arith.constant 0 : i32
    return %arg0, %c0_i32 : i32, i32
  }
  func.func @transform_1(%arg0: i32) -> (i32, i32) {
    %c0_i32 = arith.constant 0 : i32
    %c0_i32_0 = arith.constant 0 : i32
    %c0_i32_1 = arith.constant 0 : i32
    return %c0_i32, %c0_i32_0 : i32, i32
  }
  func.func @transform_2(%arg0: i32) -> (i32, i32) {
    %c0_i32 = arith.constant 0 : i32
    %c0_i32_0 = arith.constant 0 : i32
    %c0_i32_1 = arith.constant 0 : i32
    return %c0_i32, %c0_i32_0 : i32, i32
  }
  func.func @transform_3(%arg0: i32) -> (i32, i32) {
    %c0_i32 = arith.constant 0 : i32
    %c0_i32_0 = arith.constant 0 : i32
    return %arg0, %c0_i32 : i32, i32
  }
}

module attributes {stable_mosaic.version = 11 : i64} {
  func.func @_matmul_kernel(%arg0: i32, %arg1: i32, %arg2: memref<16x512xbf16, #tpu.memory_space<vmem>>, %arg3: memref<512x128xbf16, #tpu.memory_space<vmem>>, %arg4: memref<1x128xf32, #tpu.memory_space<vmem>>, %arg5: memref<16x128xf32, #tpu.memory_space<vmem>>, %arg6: memref<1x8x128xf32, #tpu.memory_space<vmem>>, %arg7: memref<1x8x128xf32, #tpu.memory_space<vmem>>, %arg8: memref<16x128xf32, #tpu.memory_space<vmem>>) attributes {dimension_semantics = [#tpu.dimension_semantics<parallel>, #tpu.dimension_semantics<arbitrary>], iteration_bounds = array<i64: 1, 16>, scalar_prefetch = 0 : i64, scratch_operands = 1 : i64, tpu.core_type = #tpu.core_type<tc>, window_params = [{transform_indices = @transform_0, window_bounds = array<i64: 16, 512>}, {transform_indices = @transform_1, window_bounds = array<i64: 512, 128>}, {pipeline_mode = #tpu.pipeline_mode<synchronous>, transform_indices = @transform_2, window_bounds = array<i64: 1, 128>}, {transform_indices = @transform_3, window_bounds = array<i64: 16, 128>}, {transform_indices = @transform_4, window_bounds = array<i64: 1, 8, 128>}, {transform_indices = @transform_5, window_bounds = array<i64: 1, 8, 128>}]} {
    %c0_i32 = arith.constant 0 : i32
    %0 = arith.cmpi eq, %arg1, %c0_i32 : i32
    %1 = arith.extui %0 : i1 to i32
    %c0_i32_0 = arith.constant 0 : i32
    %2 = arith.cmpi ne, %1, %c0_i32_0 : i32
    scf.if %2 {
      %cst_9 = arith.constant 0.000000e+00 : f32
      %12 = vector.broadcast %cst_9 : f32 to vector<16x128xf32>
      %c0_10 = arith.constant 0 : index
      %c0_11 = arith.constant 0 : index
      %13 = vector.load %arg8[%c0_10, %c0_11] : memref<16x128xf32, #tpu.memory_space<vmem>>, vector<16x128xf32>
      tpu.vector_store %arg8[%c0_10, %c0_11], %12 {strides = array<i32>} : memref<16x128xf32, #tpu.memory_space<vmem>>, vector<16x128xf32>,
    } else {
    }
    %c0 = arith.constant 0 : index
    %c0_1 = arith.constant 0 : index
    %3 = vector.load %arg8[%c0, %c0_1] : memref<16x128xf32, #tpu.memory_space<vmem>>, vector<16x128xf32>
    %c0_2 = arith.constant 0 : index
    %c0_3 = arith.constant 0 : index
    %4 = vector.load %arg2[%c0_2, %c0_3] : memref<16x512xbf16, #tpu.memory_space<vmem>>, vector<16x512xbf16>
    %c0_4 = arith.constant 0 : index
    %c0_5 = arith.constant 0 : index
    %5 = vector.load %arg3[%c0_4, %c0_5] : memref<512x128xbf16, #tpu.memory_space<vmem>>, vector<512x128xbf16>
    %cst = arith.constant dense<0.000000e+00> : vector<16x128xf32>
    %6 = tpu.matmul %4, %5, %cst {dimension_numbers = #tpu.dot_dimension_numbers<[1], [0], [0], [1], [0, 0, 1, 1], [], []>} : vector<16x512xbf16>, vector<512x128xbf16>, vector<16x128xf32> -> vector<16x128xf32>
    %7 = arith.addf %3, %6 : vector<16x128xf32>
    %c0_6 = arith.constant 0 : index
    %c0_7 = arith.constant 0 : index
    %8 = vector.load %arg8[%c0_6, %c0_7] : memref<16x128xf32, #tpu.memory_space<vmem>>, vector<16x128xf32>
    tpu.vector_store %arg8[%c0_6, %c0_7], %7 {strides = array<i32>} : memref<16x128xf32, #tpu.memory_space<vmem>>, vector<16x128xf32>,
    %c15_i32 = arith.constant 15 : i32
    %9 = arith.cmpi eq, %arg1, %c15_i32 : i32
    %10 = arith.extui %9 : i1 to i32
    %c0_i32_8 = arith.constant 0 : i32
    %11 = arith.cmpi ne, %10, %c0_i32_8 : i32
    scf.if %11 {
      %c0_9 = arith.constant 0 : index
      %c0_10 = arith.constant 0 : index
      %12 = vector.load %arg8[%c0_9, %c0_10] : memref<16x128xf32, #tpu.memory_space<vmem>>, vector<16x128xf32>
      %c0_11 = arith.constant 0 : index
      %c0_12 = arith.constant 0 : index
      %13 = vector.load %arg4[%c0_11, %c0_12] : memref<1x128xf32, #tpu.memory_space<vmem>>, vector<1x128xf32>
      %14 = vector.broadcast %13 : vector<1x128xf32> to vector<16x128xf32>
      %15 = arith.addf %12, %14 : vector<16x128xf32>
      %c0_13 = arith.constant 0 : index
      %c0_14 = arith.constant 0 : index
      %16 = vector.load %arg5[%c0_13, %c0_14] : memref<16x128xf32, #tpu.memory_space<vmem>>, vector<16x128xf32>
      tpu.vector_store %arg5[%c0_13, %c0_14], %15 {strides = array<i32>} : memref<16x128xf32, #tpu.memory_space<vmem>>, vector<16x128xf32>,
      %cst_15 = arith.constant dense<0.000000e+00> : vector<128xf32>
      %17 = vector.multi_reduction <add>, %15, %cst_15 [0] : vector<16x128xf32> to vector<128xf32>
      %18 = vector.shape_cast %17 : vector<128xf32> to vector<1x128xf32>
      %19 = arith.mulf %15, %15 : vector<16x128xf32>
      %cst_16 = arith.constant dense<0.000000e+00> : vector<128xf32>
      %20 = vector.multi_reduction <add>, %19, %cst_16 [0] : vector<16x128xf32> to vector<128xf32>
      %21 = vector.shape_cast %20 : vector<128xf32> to vector<1x128xf32>
      %22 = vector.shape_cast %18 : vector<1x128xf32> to vector<1x1x128xf32>
      %23 = vector.shape_cast %22 : vector<1x1x128xf32> to vector<1x1x128xf32>
      %24 = vector.broadcast %23 : vector<1x1x128xf32> to vector<1x8x128xf32>
      %c0_17 = arith.constant 0 : index
      %c0_18 = arith.constant 0 : index
      %c0_19 = arith.constant 0 : index
      %25 = vector.load %arg6[%c0_17, %c0_18, %c0_19] : memref<1x8x128xf32, #tpu.memory_space<vmem>>, vector<1x8x128xf32>
      tpu.vector_store %arg6[%c0_17, %c0_18, %c0_19], %24 {strides = array<i32>} : memref<1x8x128xf32, #tpu.memory_space<vmem>>, vector<1x8x128xf32>,
      %26 = vector.shape_cast %21 : vector<1x128xf32> to vector<1x1x128xf32>
      %27 = vector.shape_cast %26 : vector<1x1x128xf32> to vector<1x1x128xf32>
      %28 = vector.broadcast %27 : vector<1x1x128xf32> to vector<1x8x128xf32>
      %c0_20 = arith.constant 0 : index
      %c0_21 = arith.constant 0 : index
      %c0_22 = arith.constant 0 : index
      %29 = vector.load %arg7[%c0_20, %c0_21, %c0_22] : memref<1x8x128xf32, #tpu.memory_space<vmem>>, vector<1x8x128xf32>
      tpu.vector_store %arg7[%c0_20, %c0_21, %c0_22], %28 {strides = array<i32>} : memref<1x8x128xf32, #tpu.memory_space<vmem>>, vector<1x8x128xf32>,
    } else {
    }
    return
  }
  func.func @transform_0(%arg0: i32, %arg1: i32) -> (i32, i32) {
    %c0_i32 = arith.constant 0 : i32
    return %arg0, %arg1 : i32, i32
  }
  func.func @transform_1(%arg0: i32, %arg1: i32) -> (i32, i32) {
    %c0_i32 = arith.constant 0 : i32
    %c0_i32_0 = arith.constant 0 : i32
    return %arg1, %c0_i32 : i32, i32
  }
  func.func @transform_2(%arg0: i32, %arg1: i32) -> (i32, i32) {
    %c0_i32 = arith.constant 0 : i32
    %c0_i32_0 = arith.constant 0 : i32
    %c0_i32_1 = arith.constant 0 : i32
    return %c0_i32, %c0_i32_0 : i32, i32
  }
  func.func @transform_3(%arg0: i32, %arg1: i32) -> (i32, i32) {
    %c0_i32 = arith.constant 0 : i32
    %c0_i32_0 = arith.constant 0 : i32
    return %arg0, %c0_i32 : i32, i32
  }
  func.func @transform_4(%arg0: i32, %arg1: i32) -> (i32, i32, i32) {
    %c0_i32 = arith.constant 0 : i32
    %c0_i32_0 = arith.constant 0 : i32
    %c0_i32_1 = arith.constant 0 : i32
    return %arg0, %c0_i32, %c0_i32_0 : i32, i32, i32
  }
  func.func @transform_5(%arg0: i32, %arg1: i32) -> (i32, i32, i32) {
    %c0_i32 = arith.constant 0 : i32
    %c0_i32_0 = arith.constant 0 : i32
    %c0_i32_1 = arith.constant 0 : i32
    return %arg0, %c0_i32, %c0_i32_0 : i32, i32, i32
  }
}

</mosaic_0001>

<bundles_post_ra>
// kernel: discriminator_forward.8
= control target key start
LH: loop header
LB: loop body
LE: loop exit
PB: predicated region body
PF: predicated region fallthrough
CT: control target
= control target key end

     0   :  { %11 = vsyncpa [#allocation4], 0  ;;  %s1970_s0 = inlined_call_operand.vmem [shape: bf16[512,128], index: 0, kind: input, shape index: {}]   ;;  %s1971_s1 = inlined_call_operand.vmem [shape: bf16[128,128], index: 1, kind: input, shape index: {}]   ;;  %s1972_s2 = inlined_call_operand.vmem [shape: f32[1,128], index: 2, kind: input, shape index: {}]   ;;  %s1973_s3 = inlined_call_operand.vmem [shape: f32[512,128], index: 3, kind: output, shape index: {0}]   ;;  %s1974_s4 = inlined_call_operand.hbm [shape: f32[2,8,128], index: 4, kind: output, shape index: {1}]   ;;  %s1975_s5 = inlined_call_operand.hbm [shape: f32[2,8,128], index: 5, kind: output, shape index: {2}]  }
   0x1   :  { %13 = vsyncpa [#allocation4 + $0x1], 0 }
   0x2   :  { %14 = vsyncpa [#allocation6], 0 }
   0x3   :  { %16 = vsyncpa [#allocation6 + $0x1], 0  ;;  %s1566_s18 = smov 0   ;;  %s1568_s19 = smov 0  }
   0x4   :  { %s1570_s20 = smov 0   ;;  %s1572_s21 = smov 0  }
   0x5   :  { %s1574_s22 = smov 0   ;;  %s1576_s23 = smov 0  }
   0x6 LB: > { %s1201_s24 = sadd.s32 4294967295, %s1534_s23   ;;  %s1202_s25 = sadd.s32 4294967294, %s1534_s23   ;;  %s1534_s23 = sphi %s1576_s23, %s22_s23   ;;  %s1530_s22 = sphi %s1574_s22, %s1982_s22   ;;  %s1526_s21 = sphi %s1572_s21, %s1981_s21   ;;  %s1522_s20 = sphi %s1570_s20, %s1980_s20   ;;  %s1518_s19 = sphi %s1568_s19, %s1979_s19   ;;  %s1514_s18 = sphi %s1566_s18, %s1978_s18  }
   0x7   : > { %s34_s26 = sadd.s32 1, %s1530_s22  ;;  %s142_s27 = sadd.s32 1, %s1522_s20 }
   0x8   : > { %p36_p0 = scmp.ge.s32.totalorder %s34_s26, 2  ;;  %p152_p1 = scmp.ne.s32.totalorder %s1522_s20, %s1518_s19 }
   0x9   : > { %p153_p2 = scmp.eq.s32.totalorder %s1201_s24, 1  ;;  %p158_p3 = scmp.ne.s32.totalorder %s1518_s19, %s1514_s18 }
   0xa   : > { %s1984_s26 = smov (%p36_p0, %s34_s26), 0  ;;  %p159_p5 = scmp.eq.s32.totalorder %s1202_s25, 1 }
   0xb   : > { %p1606_p4 = por %p153_p2, %p152_p1  ;;  %s139_s29 = ssub.s32 %s1530_s22, %s1984_s26 }
   0xc   : > { %p1206_p6 = scmp.ge.s32.totalorder %s1534_s23, 1  ;;  %p140_p7 = scmp.eq.s32.totalorder %s139_s29, 0 }
   0xd   : > { %p1613_p8 = por %p159_p5, %p158_p3  ;;  %p227_p9 = scmp.lt.s32.totalorder %s1534_s23, 3 }
   0xe   : > { %s1619_s6 = scalar_select %p140_p7, %s1522_s20, %s142_s27  }
   0xf   : > { %p228_p10 = pnand %p1206_p6, %p227_p9 }
  0x10   : > { %s1209_s15 = sshll.u32 (!%p228_p10), %s1526_s21, 5  ;;  %s1311_s29 = sshll.u32 (!%p228_p10), %s1526_s21, 3 }
  0x11   : > { %231 = sbr.rel (%p228_p10) target bundleno = 318 (0x13e), region = 32  ;;  %p274_p11 = scmp.lt.s32.totalorder (!%p228_p10), %s1209_s15, 63 }
  0x12   : > { %s1039_s9 = scalar_lea.hbm (!%p228_p10), %s1974_s4, %s1311_s29 }
  0x16   : > { %v1338_v0 = vld [vmem:[%s1971_s1 + $0x38] sm:$0xff]  ;;  %v1337_v1 = vld [vmem:[%s1971_s1 + $0x30] sm:$0xff]  ;;  %v1336_v2 = vld [vmem:[%s1971_s1 + $0x28] sm:$0xff]  ;;  %s1986_s15 = smov (!%p274_p11, %s1209_s15), 63 }
  0x17   : > { %554 = vmatpush.bf16.msra.mxu0 %v1338_v0  ;;  %1339 = vmatpush.bf16.msra.mxu1 %v1338_v0  ;;  %v1335_v3 = vld [vmem:[%s1971_s1 + $0x20] sm:$0xff]  ;;  %v1334_v4 = vld [vmem:[%s1971_s1 + $0x18] sm:$0xff]  ;;  %v1333_v5 = vld [vmem:[%s1971_s1 + $0x10] sm:$0xff]  ;;  %s1210_s7 = sshll.u32 %s1986_s15, 2  ;;  %s1212_s16 = sshll.u32 %s1986_s15, 3 }
  0x18   : > { %1340 = vmatpush.bf16.msra.mxu2 %v1338_v0  ;;  %1341 = vmatpush.bf16.msra.mxu3 %v1338_v0  ;;  %v1332_v6 = vld [vmem:[%s1971_s1 + $0x8] sm:$0xff]  ;;  %v1331_v7 = vld [vmem:[%s1971_s1] sm:$0xff]  ;;  %s1652_s12 = scalar_lea.vmem %s1970_s0, %s1210_s7  ;;  %s1681_s25 = scalar_lea.vmem %s1973_s3, %s1212_s16 }
  0x19   : > { %v1315_v8 = vld [vmem:[%s1652_s12] sm:$0xff]  ;;  %v1316_v12 = vld [vmem:[%s1652_s12 + $0x8] sm:$0xff]  ;;  %v1317_v16 = vld [vmem:[%s1652_s12 + $0x10] sm:$0xff]  ;;  %s1909_s15 = sand.u32 1, %s1518_s19   ;;  %s1043_s16 = sshll.u32 %s1039_s9, 4  ;;  %s1044_s16 = int_to_ptr.hbm [resolvable:$true] %s1043_s16 }
  0x1a   : > { %v1319_v9 = vld [vmem:[%s1652_s12 + $0x20] sm:$0xff]  ;;  %v1320_v13 = vld [vmem:[%s1652_s12 + $0x28] sm:$0xff]  ;;  %v1321_v17 = vld [vmem:[%s1652_s12 + $0x30] sm:$0xff]  ;;  %s1207_s27 = sshll.u32 %s1909_s15, 3  ;;  %s1444_s9 = scalar_lea.hbm %s1974_s4, 16 }
  0x1b   : > { %555 = vmatpush.bf16.msra.mxu0 %v1337_v1  ;;  %1342 = vmatpush.bf16.msra.mxu1 %v1337_v1  ;;  %v1323_v10 = vld [vmem:[%s1652_s12 + $0x40] sm:$0xff]  ;;  %v1324_v14 = vld [vmem:[%s1652_s12 + $0x48] sm:$0xff]  ;;  %v1325_v18 = vld [vmem:[%s1652_s12 + $0x50] sm:$0xff]  ;;  %s265_s13 = scalar_lea.vmem [#allocation3], %s1207_s27  ;;  %s272_s21 = scalar_lea.vmem [#allocation5], %s1207_s27 }
  0x1c   : > { %1343 = vmatpush.bf16.msra.mxu2 %v1337_v1  ;;  %1344 = vmatpush.bf16.msra.mxu3 %v1337_v1  ;;  %v1327_v11 = vld [vmem:[%s1652_s12 + $0x60] sm:$0xff]  ;;  %v1328_v15 = vld [vmem:[%s1652_s12 + $0x68] sm:$0xff]  ;;  %v1329_v19 = vld [vmem:[%s1652_s12 + $0x70] sm:$0xff]  ;;  %s1041_s14 = sshll.u32 %s265_s13, 4  ;;  %s1055_s17 = sshll.u32 %s272_s21, 4  ;;  %s1042_s14 = int_to_ptr.vmem [resolvable:$true] %s1041_s14  ;;  %s1919_s17 = int_to_ptr.vmem [resolvable:$true] %s1055_s17 }
  0x1d   : > { %v1318_v20 = vld [vmem:[%s1652_s12 + $0x18] sm:$0xff]  ;;  %v1673_v24 = vld [vmem:[%s1972_s2] ss:$0 sm:$0xff] }
  0x1e   : > { %v1322_v21 = vld [vmem:[%s1652_s12 + $0x38] sm:$0xff] }
  0x1f   : > { %556 = vmatpush.bf16.msra.mxu0 %v1336_v2  ;;  %1345 = vmatpush.bf16.msra.mxu1 %v1336_v2  ;;  %v1326_v22 = vld [vmem:[%s1652_s12 + $0x58] sm:$0xff] }
  0x20   : > { %1346 = vmatpush.bf16.msra.mxu2 %v1336_v2  ;;  %1347 = vmatpush.bf16.msra.mxu3 %v1336_v2  ;;  %v1330_v23 = vld [vmem:[%s1652_s12 + $0x78] sm:$0xff]  ;;  %s1053_s12 = scalar_lea.hbm %s1975_s5, %s1311_s29  ;;  %s1438_s29 = sshra.s32 %s1044_s16, 4  ;;  %s1439_s29 = int_to_ptr.hbm [resolvable:$true] %s1438_s29 }
  0x21   : > { %s1057_s24 = sshll.u32 %s1053_s12, 4  ;;  %s1440_s7 = scalar_lea.hbm %s1439_s29, 8  ;;  %s1921_s24 = int_to_ptr.hbm [resolvable:$true] %s1057_s24 }
  0x22   : > { %p1441_p12 = scmp.ne.s32.totalorder %s1439_s29, %s1440_s7  ;;  %p1445_p1 = scmp.lt.s32.totalorder %s1439_s29, %s1974_s4 }
  0x23   : > { %557 = vmatpush.bf16.msra.mxu0 %v1335_v3  ;;  %1348 = vmatpush.bf16.msra.mxu1 %v1335_v3  ;;  %p1446_p2 = scmp.lt.s32.totalorder %s1444_s9, %s1440_s7 }
  0x24   : > { %1349 = vmatpush.bf16.msra.mxu2 %v1335_v3  ;;  %1350 = vmatpush.bf16.msra.mxu3 %v1335_v3  ;;  %p1442_p13 = pnand %p1441_p12, %p1606_p4 }
  0x25   : > { %p1447_p3 = por %p1446_p2, %p1445_p1 }
  0x26   : > { %p1443_p0 = pneg %p1442_p13 }
  0x27   : > { %558 = vmatpush.bf16.msra.mxu0 %v1334_v4  ;;  %1351 = vmatpush.bf16.msra.mxu1 %v1334_v4 }
  0x28   : > { %1352 = vmatpush.bf16.msra.mxu2 %v1334_v4  ;;  %1353 = vmatpush.bf16.msra.mxu3 %v1334_v4  ;;  %p1448_p5 = pnand %p1447_p3, %p1443_p0 }
  0x2b   : > { %559 = vmatpush.bf16.msra.mxu0 %v1333_v5  ;;  %1354 = vmatpush.bf16.msra.mxu1 %v1333_v5 }
  0x2c   : > { %1355 = vmatpush.bf16.msra.mxu2 %v1333_v5  ;;  %1356 = vmatpush.bf16.msra.mxu3 %v1333_v5 }
  0x2f   : > { %560 = vmatpush.bf16.msra.mxu0 %v1332_v6  ;;  %1357 = vmatpush.bf16.msra.mxu1 %v1332_v6 }
  0x30   : > { %1358 = vmatpush.bf16.msra.mxu2 %v1332_v6  ;;  %1359 = vmatpush.bf16.msra.mxu3 %v1332_v6 }
  0x33   : > { %561 = vmatpush.bf16.msra.mxu0 %v1331_v7  ;;  %1360 = vmatpush.bf16.msra.mxu1 %v1331_v7 }
  0x34   : > { %1361 = vmatpush.bf16.msra.mxu2 %v1331_v7  ;;  %1362 = vmatpush.bf16.msra.mxu3 %v1331_v7 }
  0x36   : > { %562 = vmatmul.bf16.vlgmr.msra.gmra.mxu0 %v1315_v8  ;;  %582 = vmatmul.bf16.vlgmr.msra.gmra.mxu1 %v1319_v9 }
  0x37   : > { %602 = vmatmul.bf16.vlgmr.msra.gmra.mxu2 %v1323_v10  ;;  %622 = vmatmul.bf16.vlgmr.msra.gmra.mxu3 %v1327_v11 }
  0x46   : > { %567 = vmatmul.bf16.gmra.mxu0 %v1316_v12  ;;  %587 = vmatmul.bf16.gmra.mxu1 %v1320_v13 }
  0x47   : > { %607 = vmatmul.bf16.gmra.mxu2 %v1324_v14  ;;  %627 = vmatmul.bf16.gmra.mxu3 %v1328_v15 }
  0x56   : > { %572 = vmatmul.bf16.gmra.mxu0 %v1317_v16  ;;  %592 = vmatmul.bf16.gmra.mxu1 %v1321_v17 }
  0x57   : > { %612 = vmatmul.bf16.gmra.mxu2 %v1325_v18  ;;  %632 = vmatmul.bf16.gmra.mxu3 %v1329_v19 }
  0x66   : > { %577 = vmatmul.bf16.gmra.mxu0 %v1318_v20  ;;  %597 = vmatmul.bf16.gmra.mxu1 %v1322_v21 }
  0x67   : > { %617 = vmatmul.bf16.gmra.mxu2 %v1326_v22  ;;  %637 = vmatmul.bf16.gmra.mxu3 %v1330_v23 }
  0xb3   : > { %v563_v25 = vpop.f32.mrf.mxu0  ;;  %v583_v26 = vpop.f32.mrf.mxu1 }
  0xb4   : > { %v746_v27 = vadd.f32 %v1673_v24, %v563_v25  ;;  %v754_v28 = vadd.f32 %v1673_v24, %v583_v26 }
  0xb6   : > { %vm778_vm0 = vcmp.gt.f32.partialorder %v746_v27, 0.0  ;;  %v810_v29 = vmul.f32 0.2, %v746_v27  ;;  %vm786_vm1 = vcmp.gt.f32.partialorder %v754_v28, 0.0  ;;  %v818_v30 = vmul.f32 0.2, %v754_v28 }
  0xb8   : > { %v1683_v31 = vsel %vm778_vm0, %v746_v27, %v810_v29  ;;  %v1685_v32 = vsel %vm786_vm1, %v754_v28, %v818_v30 }
  0xb9   : > { %874 = vst [vmem:[%s1681_s25] sm:$0xff] %v1683_v31 }
  0xba   : > { %882 = vst [vmem:[%s1681_s25 + $0x40] sm:$0xff] %v1685_v32  ;;  %v603_v33 = vpop.f32.mrf.mxu2  ;;  %v623_v34 = vpop.f32.mrf.mxu3 }
  0xbb   : > { %v565_v35 = vpop.f32.mrf.mxu0  ;;  %v585_v36 = vpop.f32.mrf.mxu1  ;;  %v762_v37 = vadd.f32 %v1673_v24, %v603_v33  ;;  %v770_v38 = vadd.f32 %v1673_v24, %v623_v34 }
  0xbc   : > { %v747_v39 = vadd.f32 %v1673_v24, %v565_v35  ;;  %v755_v40 = vadd.f32 %v1673_v24, %v585_v36 }
  0xbd   : > { %vm794_vm2 = vcmp.gt.f32.partialorder %v762_v37, 0.0  ;;  %v826_v41 = vmul.f32 0.2, %v762_v37  ;;  %vm802_vm3 = vcmp.gt.f32.partialorder %v770_v38, 0.0  ;;  %v834_v42 = vmul.f32 0.2, %v770_v38 }
  0xbe   : > { %vm779_vm4 = vcmp.gt.f32.partialorder %v747_v39, 0.0  ;;  %v811_v43 = vmul.f32 0.2, %v747_v39  ;;  %vm787_vm5 = vcmp.gt.f32.partialorder %v755_v40, 0.0  ;;  %v819_v44 = vmul.f32 0.2, %v755_v40 }
  0xbf   : > { %v1695_v45 = vsel %vm794_vm2, %v762_v37, %v826_v41  ;;  %v1703_v48 = vsel %vm802_vm3, %v770_v38, %v834_v42 }
  0xc0   : > { %v1697_v46 = vsel %vm779_vm4, %v747_v39, %v811_v43  ;;  %v1699_v47 = vsel %vm787_vm5, %v755_v40, %v819_v44  ;;  %890 = vst [vmem:[%s1681_s25 + $0x80] sm:$0xff] %v1695_v45 }
  0xc1   : > { %875 = vst [vmem:[%s1681_s25 + $0x8] sm:$0xff] %v1697_v46 }
  0xc2   : > { %883 = vst [vmem:[%s1681_s25 + $0x48] sm:$0xff] %v1699_v47  ;;  %v605_v49 = vpop.f32.mrf.mxu2  ;;  %v625_v50 = vpop.f32.mrf.mxu3 }
  0xc3   : > { %v568_v51 = vpop.f32.mrf.mxu0  ;;  %v588_v52 = vpop.f32.mrf.mxu1  ;;  %v763_v53 = vadd.f32 %v1673_v24, %v605_v49  ;;  %898 = vst [vmem:[%s1681_s25 + $0xc0] sm:$0xff] %v1703_v48  ;;  %v771_v54 = vadd.f32 %v1673_v24, %v625_v50  ;;  %v944_v50 = vmul.f32 %v1697_v46, %v1697_v46 }
  0xc4   : > { %v748_v55 = vadd.f32 %v1673_v24, %v568_v51  ;;  %v756_v56 = vadd.f32 %v1673_v24, %v588_v52 }
  0xc5   : > { %vm795_vm6 = vcmp.gt.f32.partialorder %v763_v53, 0.0  ;;  %v827_v57 = vmul.f32 0.2, %v763_v53  ;;  %vm803_vm7 = vcmp.gt.f32.partialorder %v771_v54, 0.0  ;;  %v835_v58 = vmul.f32 0.2, %v771_v54 }
  0xc6   : > { %vm780_vm8 = vcmp.gt.f32.partialorder %v748_v55, 0.0  ;;  %v812_v59 = vmul.f32 0.2, %v748_v55  ;;  %vm788_vm9 = vcmp.gt.f32.partialorder %v756_v56, 0.0  ;;  %v820_v60 = vmul.f32 0.2, %v756_v56 }
  0xc7   : > { %v1715_v61 = vsel %vm795_vm6, %v763_v53, %v827_v57  ;;  %v1723_v0 = vsel %vm803_vm7, %v771_v54, %v835_v58  ;;  %v943_v54 = vmul.f32 %v1683_v31, %v1683_v31 }
  0xc8   : > { %v1717_v62 = vsel %vm780_vm8, %v748_v55, %v812_v59  ;;  %v1719_v63 = vsel %vm788_vm9, %v756_v56, %v820_v60  ;;  %891 = vst [vmem:[%s1681_s25 + $0x88] sm:$0xff] %v1715_v61  ;;  %v906_v55 = vadd.f32 %v1697_v46, %v1683_v31 }
  0xc9   : > { %876 = vst [vmem:[%s1681_s25 + $0x10] sm:$0xff] %v1717_v62  ;;  %v975_v59 = vadd.f32 %v944_v50, %v943_v54  ;;  %v945_v60 = vmul.f32 %v1717_v62, %v1717_v62 }
  0xca   : > { %884 = vst [vmem:[%s1681_s25 + $0x50] sm:$0xff] %v1719_v63  ;;  %v608_v1 = vpop.f32.mrf.mxu2  ;;  %v628_v2 = vpop.f32.mrf.mxu3 }
  0xcb   : > { %v570_v3 = vpop.f32.mrf.mxu0  ;;  %v590_v4 = vpop.f32.mrf.mxu1  ;;  %v764_v5 = vadd.f32 %v1673_v24, %v608_v1  ;;  %899 = vst [vmem:[%s1681_s25 + $0xc8] sm:$0xff] %v1723_v0  ;;  %v772_v6 = vadd.f32 %v1673_v24, %v628_v2 }
  0xcc   : > { %v749_v7 = vadd.f32 %v1673_v24, %v570_v3  ;;  %v757_v8 = vadd.f32 %v1673_v24, %v590_v4 }
  0xcd   : > { %vm796_vm10 = vcmp.gt.f32.partialorder %v764_v5, 0.0  ;;  %v828_v9 = vmul.f32 0.2, %v764_v5  ;;  %vm804_vm11 = vcmp.gt.f32.partialorder %v772_v6, 0.0  ;;  %v836_v10 = vmul.f32 0.2, %v772_v6 }
  0xce   : > { %vm781_vm12 = vcmp.gt.f32.partialorder %v749_v7, 0.0  ;;  %v813_v11 = vmul.f32 0.2, %v749_v7  ;;  %vm789_vm13 = vcmp.gt.f32.partialorder %v757_v8, 0.0  ;;  %v821_v12 = vmul.f32 0.2, %v757_v8 }
  0xcf   : > { %v1735_v13 = vsel %vm796_vm10, %v764_v5, %v828_v9  ;;  %v1743_v16 = vsel %vm804_vm11, %v772_v6, %v836_v10  ;;  %v907_v10 = vadd.f32 %v906_v55, %v1717_v62 }
  0xd0   : > { %v1737_v14 = vsel %vm781_vm12, %v749_v7, %v813_v11  ;;  %v1739_v15 = vsel %vm789_vm13, %v757_v8, %v821_v12  ;;  %892 = vst [vmem:[%s1681_s25 + $0x90] sm:$0xff] %v1735_v13  ;;  %v976_v11 = vadd.f32 %v975_v59, %v945_v60 }
  0xd1   : > { %877 = vst [vmem:[%s1681_s25 + $0x18] sm:$0xff] %v1737_v14  ;;  %v946_v5 = vmul.f32 %v1737_v14, %v1737_v14 }
  0xd2   : > { %885 = vst [vmem:[%s1681_s25 + $0x58] sm:$0xff] %v1739_v15  ;;  %v610_v17 = vpop.f32.mrf.mxu2  ;;  %v630_v18 = vpop.f32.mrf.mxu3 }
  0xd3   : > { %v573_v19 = vpop.f32.mrf.mxu0  ;;  %v593_v20 = vpop.f32.mrf.mxu1  ;;  %v765_v21 = vadd.f32 %v1673_v24, %v610_v17  ;;  %900 = vst [vmem:[%s1681_s25 + $0xd0] sm:$0xff] %v1743_v16  ;;  %v773_v22 = vadd.f32 %v1673_v24, %v630_v18 }
  0xd4   : > { %v750_v23 = vadd.f32 %v1673_v24, %v573_v19  ;;  %v758_v25 = vadd.f32 %v1673_v24, %v593_v20 }
  0xd5   : > { %vm797_vm14 = vcmp.gt.f32.partialorder %v765_v21, 0.0  ;;  %v829_v26 = vmul.f32 0.2, %v765_v21  ;;  %vm805_vm15 = vcmp.gt.f32.partialorder %v773_v22, 0.0  ;;  %v837_v27 = vmul.f32 0.2, %v773_v22 }
  0xd6   : > { %vm782_vm0 = vcmp.gt.f32.partialorder %v750_v23, 0.0  ;;  %v814_v28 = vmul.f32 0.2, %v750_v23  ;;  %vm790_vm1 = vcmp.gt.f32.partialorder %v758_v25, 0.0  ;;  %v822_v29 = vmul.f32 0.2, %v758_v25 }
  0xd7   : > { %v1755_v30 = vsel %vm797_vm14, %v765_v21, %v829_v26  ;;  %v1763_v35 = vsel %vm805_vm15, %v773_v22, %v837_v27  ;;  %v908_v22 = vadd.f32 %v907_v10, %v1737_v14 }
  0xd8   : > { %v1757_v33 = vsel %vm782_vm0, %v750_v23, %v814_v28  ;;  %v1759_v34 = vsel %vm790_vm1, %v758_v25, %v822_v29  ;;  %893 = vst [vmem:[%s1681_s25 + $0x98] sm:$0xff] %v1755_v30  ;;  %v977_v23 = vadd.f32 %v976_v11, %v946_v5 }
  0xd9   : > { %878 = vst [vmem:[%s1681_s25 + $0x20] sm:$0xff] %v1757_v33  ;;  %v947_v18 = vmul.f32 %v1757_v33, %v1757_v33  ;;  %v909_v27 = vadd.f32 %v908_v22, %v1757_v33 }
  0xda   : > { %886 = vst [vmem:[%s1681_s25 + $0x60] sm:$0xff] %v1759_v34  ;;  %v613_v36 = vpop.f32.mrf.mxu2  ;;  %v633_v37 = vpop.f32.mrf.mxu3 }
  0xdb   : > { %v575_v38 = vpop.f32.mrf.mxu0  ;;  %v595_v39 = vpop.f32.mrf.mxu1  ;;  %v766_v40 = vadd.f32 %v1673_v24, %v613_v36  ;;  %901 = vst [vmem:[%s1681_s25 + $0xd8] sm:$0xff] %v1763_v35  ;;  %v774_v57 = vadd.f32 %v1673_v24, %v633_v37  ;;  %v978_v14 = vadd.f32 %v977_v23, %v947_v18 }
  0xdc   : > { %v751_v41 = vadd.f32 %v1673_v24, %v575_v38  ;;  %v759_v42 = vadd.f32 %v1673_v24, %v595_v39 }
  0xdd   : > { %vm798_vm2 = vcmp.gt.f32.partialorder %v766_v40, 0.0  ;;  %v830_v43 = vmul.f32 0.2, %v766_v40  ;;  %v838_v6 = vmul.f32 0.2, %v774_v57  ;;  %vm806_vm6 = vcmp.gt.f32.partialorder %v774_v57, 0.0 }
  0xde   : > { %vm783_vm3 = vcmp.gt.f32.partialorder %v751_v41, 0.0  ;;  %v815_v44 = vmul.f32 0.2, %v751_v41  ;;  %vm791_vm4 = vcmp.gt.f32.partialorder %v759_v42, 0.0  ;;  %v823_v49 = vmul.f32 0.2, %v759_v42 }
  0xdf   : > { %v1776_v51 = vsel %vm798_vm2, %v766_v40, %v830_v43  ;;  %v1807_v21 = vsel %vm806_vm6, %v774_v57, %v838_v6 }
  0xe0   : > { %v847_v52 = vsel %vm783_vm3, %v751_v41, %v815_v44  ;;  %v1778_v53 = vsel %vm791_vm4, %v759_v42, %v823_v49  ;;  %894 = vst [vmem:[%s1681_s25 + $0xa0] sm:$0xff] %v1776_v51 }
  0xe1   : > { %879 = vst [vmem:[%s1681_s25 + $0x28] sm:$0xff] %v847_v52  ;;  %v948_v28 = vmul.f32 %v847_v52, %v847_v52  ;;  %v910_v40 = vadd.f32 %v909_v27, %v847_v52 }
  0xe2   : > { %887 = vst [vmem:[%s1681_s25 + $0x68] sm:$0xff] %v1778_v53  ;;  %v615_v56 = vpop.f32.mrf.mxu2  ;;  %v635_v58 = vpop.f32.mrf.mxu3 }
  0xe3   : > { %v578_v1 = vpop.f32.mrf.mxu0  ;;  %v598_v2 = vpop.f32.mrf.mxu1  ;;  %v767_v3 = vadd.f32 %v1673_v24, %v615_v56  ;;  %v775_v4 = vadd.f32 %v1673_v24, %v635_v58  ;;  %902 = vst [vmem:[%s1681_s25 + $0xe0] sm:$0xff] %v1807_v21  ;;  %v979_v44 = vadd.f32 %v978_v14, %v948_v28  ;;  %v951_v58 = vmul.f32 %v1685_v32, %v1685_v32 }
  0xe4   : > { %v752_v31 = vadd.f32 %v1673_v24, %v578_v1  ;;  %v760_v46 = vadd.f32 %v1673_v24, %v598_v2 }
  0xe5   : > { %vm799_vm5 = vcmp.gt.f32.partialorder %v767_v3, 0.0  ;;  %v831_v7 = vmul.f32 0.2, %v767_v3  ;;  %vm807_vm7 = vcmp.gt.f32.partialorder %v775_v4, 0.0  ;;  %v839_v17 = vmul.f32 0.2, %v775_v4 }
  0xe6   : > { %vm784_vm8 = vcmp.gt.f32.partialorder %v752_v31, 0.0  ;;  %v816_v8 = vmul.f32 0.2, %v752_v31  ;;  %vm792_vm9 = vcmp.gt.f32.partialorder %v760_v46, 0.0  ;;  %v824_v9 = vmul.f32 0.2, %v760_v46 }
  0xe7   : > { %v1799_v12 = vsel %vm799_vm5, %v767_v3, %v831_v7  ;;  %v1812_v62 = vsel %vm807_vm7, %v775_v4, %v839_v17 }
  0xe8   : > { %v848_v19 = vsel %vm784_vm8, %v752_v31, %v816_v8  ;;  %v1803_v20 = vsel %vm792_vm9, %v760_v46, %v824_v9  ;;  %895 = vst [vmem:[%s1681_s25 + $0xa8] sm:$0xff] %v1799_v12  ;;  %v952_v31 = vmul.f32 %v1699_v47, %v1699_v47 }
  0xe9   : > { %880 = vst [vmem:[%s1681_s25 + $0x30] sm:$0xff] %v848_v19  ;;  %v949_v41 = vmul.f32 %v848_v19, %v848_v19  ;;  %v911_v49 = vadd.f32 %v910_v40, %v848_v19 }
  0xea   : > { %888 = vst [vmem:[%s1681_s25 + $0x70] sm:$0xff] %v1803_v20  ;;  %v618_v25 = vpop.f32.mrf.mxu2  ;;  %v638_v26 = vpop.f32.mrf.mxu3 }
  0xeb   : > { %v580_v29 = vpop.f32.mrf.mxu0  ;;  %v600_v36 = vpop.f32.mrf.mxu1  ;;  %v768_v37 = vadd.f32 %v1673_v24, %v618_v25  ;;  %903 = vst [vmem:[%s1681_s25 + $0xe8] sm:$0xff] %v1812_v62  ;;  %v980_v56 = vadd.f32 %v979_v44, %v949_v41  ;;  %v776_v60 = vadd.f32 %v1673_v24, %v638_v26  ;;  %v956_v26 = vmul.f32 %v1778_v53, %v1778_v53 }
  0xec   : > { %v753_v38 = vadd.f32 %v1673_v24, %v580_v29  ;;  %v761_v39 = vadd.f32 %v1673_v24, %v600_v36  ;;  %v957_v29 = vmul.f32 %v1803_v20, %v1803_v20  ;;  %v960_v41 = vmul.f32 %v1715_v61, %v1715_v61 }
  0xed   : > { %vm800_vm10 = vcmp.gt.f32.partialorder %v768_v37, 0.0  ;;  %v832_v33 = vmul.f32 0.2, %v768_v37  ;;  %v840_v46 = vmul.f32 0.2, %v776_v60  ;;  %vm808_vm14 = vcmp.gt.f32.partialorder %v776_v60, 0.0 }
  0xee   : > { %vm785_vm11 = vcmp.gt.f32.partialorder %v753_v38, 0.0  ;;  %v817_v42 = vmul.f32 0.2, %v753_v38  ;;  %vm793_vm12 = vcmp.gt.f32.partialorder %v761_v39, 0.0  ;;  %v825_v43 = vmul.f32 0.2, %v761_v39 }
  0xef   : > { %v1824_v50 = vsel %vm800_vm10, %v768_v37, %v832_v33  ;;  %v1842_v17 = vsel %vm808_vm14, %v776_v60, %v840_v46  ;;  %v962_v44 = vmul.f32 %v1755_v30, %v1755_v30 }
  0xf0   : > { %v849_v54 = vsel %vm785_vm11, %v753_v38, %v817_v42  ;;  %v857_v55 = vsel %vm793_vm12, %v761_v39, %v825_v43  ;;  %896 = vst [vmem:[%s1681_s25 + $0xb0] sm:$0xff] %v1824_v50  ;;  %v959_v39 = vmul.f32 %v1695_v45, %v1695_v45  ;;  %v961_v42 = vmul.f32 %v1735_v13, %v1735_v13 }
  0xf1   : > { %881 = vst [vmem:[%s1681_s25 + $0x38] sm:$0xff] %v849_v54  ;;  %v912_v57 = vadd.f32 %v911_v49, %v849_v54  ;;  %v950_v52 = vmul.f32 %v849_v54, %v849_v54  ;;  %v958_v14 = vmul.f32 %v857_v55, %v857_v55 }
  0xf2   : > { %889 = vst [vmem:[%s1681_s25 + $0x78] sm:$0xff] %v857_v55  ;;  %v620_v59 = vpop.f32.mrf.mxu2  ;;  %v640_v1 = vpop.f32.mrf.mxu3 }
  0xf3   : > { %v913_v2 = vadd.f32 %v912_v57, %v1685_v32  ;;  %v981_v3 = vadd.f32 %v980_v56, %v950_v52  ;;  %v769_v4 = vadd.f32 %v1673_v24, %v620_v59  ;;  %v777_v5 = vadd.f32 %v1673_v24, %v640_v1  ;;  %904 = vst [vmem:[%s1681_s25 + $0xf0] sm:$0xff] %v1842_v17 }
  0xf4   : > { %v953_v32 = vmul.f32 %v1719_v63, %v1719_v63  ;;  %v964_v57 = vmul.f32 %v1799_v12, %v1799_v12  ;;  %v965_v59 = vmul.f32 %v1824_v50, %v1824_v50 }
  0xf5   : > { %v914_v6 = vadd.f32 %v913_v2, %v1699_v47  ;;  %v982_v7 = vadd.f32 %v981_v3, %v951_v58  ;;  %vm801_vm13 = vcmp.gt.f32.partialorder %v769_v4, 0.0  ;;  %v833_v8 = vmul.f32 0.2, %v769_v4 }
  0xf6   : > { %vm809_vm15 = vcmp.gt.f32.partialorder %v777_v5, 0.0  ;;  %v841_v9 = vmul.f32 0.2, %v777_v5  ;;  %v954_v47 = vmul.f32 %v1739_v15, %v1739_v15  ;;  %v967_v2 = vmul.f32 %v1703_v48, %v1703_v48 }
  0xf7   : > { %v915_v10 = vadd.f32 %v914_v6, %v1719_v63  ;;  %v983_v24 = vadd.f32 %v982_v7, %v952_v31  ;;  %v865_v11 = vsel %vm801_vm13, %v769_v4, %v833_v8  ;;  %v955_v63 = vmul.f32 %v1759_v34, %v1759_v34 }
  0xf8   : > { %897 = vst [vmem:[%s1681_s25 + $0xb8] sm:$0xff] %v865_v11  ;;  %v1845_v18 = vsel %vm809_vm15, %v777_v5, %v841_v9  ;;  %v966_v1 = vmul.f32 %v865_v11, %v865_v11  ;;  %v968_v4 = vmul.f32 %v1723_v0, %v1723_v0  ;;  %v969_v31 = vmul.f32 %v1743_v16, %v1743_v16 }
  0xf9   : > { %v984_v19 = vadd.f32 %v983_v24, %v953_v32  ;;  %v916_v22 = vadd.f32 %v915_v10, %v1739_v15  ;;  %905 = vst [vmem:[%s1681_s25 + $0xf8] sm:$0xff] %v1845_v18  ;;  %v970_v6 = vmul.f32 %v1763_v35, %v1763_v35  ;;  %v971_v8 = vmul.f32 %v1807_v21, %v1807_v21  ;;  %s1020_s25 = scalar_lea.sflag [#allocation4], %s1909_s15 }
  0xfa   : > { %v972_v10 = vmul.f32 %v1812_v62, %v1812_v62 }
  0xfb   : > { %v917_v23 = vadd.f32 %v916_v22, %v1759_v34  ;;  %v985_v25 = vadd.f32 %v984_v19, %v954_v47  ;;  %v974_v22 = vmul.f32 %v1845_v18, %v1845_v18 }
  0xfd   : > { %v918_v27 = vadd.f32 %v917_v23, %v1778_v53  ;;  %v986_v28 = vadd.f32 %v985_v25, %v955_v63 }
  0xff   : > { %v919_v15 = vadd.f32 %v918_v27, %v1803_v20  ;;  %v987_v36 = vadd.f32 %v986_v28, %v956_v26 }
 0x101   : > { %v920_v37 = vadd.f32 %v919_v15, %v857_v55  ;;  %v988_v38 = vadd.f32 %v987_v36, %v957_v29 }
 0x103   : > { %v921_v34 = vadd.f32 %v920_v37, %v1695_v45  ;;  %v989_v40 = vadd.f32 %v988_v38, %v958_v14  ;;  %v963_v45 = vmul.f32 %v1776_v51, %v1776_v51 }
 0x105   : > { %v922_v53 = vadd.f32 %v921_v34, %v1715_v61  ;;  %v990_v33 = vadd.f32 %v989_v40, %v959_v39 }
 0x107   : > { %v991_v20 = vadd.f32 %v990_v33, %v960_v41  ;;  %v923_v43 = vadd.f32 %v922_v53, %v1735_v13 }
 0x109   : > { %v924_v49 = vadd.f32 %v923_v43, %v1755_v30  ;;  %v992_v54 = vadd.f32 %v991_v20, %v961_v42 }
 0x10b   : > { %v925_v55 = vadd.f32 %v924_v49, %v1776_v51  ;;  %v993_v56 = vadd.f32 %v992_v54, %v962_v44 }
 0x10d   : > { %v926_v61 = vadd.f32 %v925_v55, %v1799_v12  ;;  %v994_v52 = vadd.f32 %v993_v56, %v963_v45 }
 0x10f   : > { %v995_v58 = vadd.f32 %v994_v52, %v964_v57  ;;  %v927_v13 = vadd.f32 %v926_v61, %v1824_v50 }
 0x111   : > { %v996_v30 = vadd.f32 %v995_v58, %v965_v59  ;;  %v928_v60 = vadd.f32 %v927_v13, %v865_v11 }
 0x113   : > { %v929_v51 = vadd.f32 %v928_v60, %v1703_v48  ;;  %v997_v3 = vadd.f32 %v996_v30, %v966_v1 }
 0x115   : > { %v930_v12 = vadd.f32 %v929_v51, %v1723_v0  ;;  %v998_v5 = vadd.f32 %v997_v3, %v967_v2 }
 0x117   : > { %v999_v46 = vadd.f32 %v998_v5, %v968_v4  ;;  %v931_v50 = vadd.f32 %v930_v12, %v1743_v16 }
 0x119   : > { %v932_v7 = vadd.f32 %v931_v50, %v1763_v35  ;;  %v1000_v48 = vadd.f32 %v999_v46, %v969_v31  ;;  %v973_v35 = vmul.f32 %v1842_v17, %v1842_v17 }
 0x11b   : > { %v933_v0 = vadd.f32 %v932_v7, %v1807_v21  ;;  %v1001_v32 = vadd.f32 %v1000_v48, %v970_v6 }
 0x11d   : > { %v934_v9 = vadd.f32 %v933_v0, %v1812_v62  ;;  %v1002_v16 = vadd.f32 %v1001_v32, %v971_v8 }
 0x11f   : > { %v1003_v24 = vadd.f32 %v1002_v16, %v972_v10  ;;  %v935_v11 = vadd.f32 %v934_v9, %v1842_v17 }
 0x121   : > { %v1004_v47 = vadd.f32 %v1003_v24, %v973_v35  ;;  %v936_v19 = vadd.f32 %v935_v11, %v1845_v18 }
 0x123   : > { %v937_v21 = vrot.slane %v936_v19, 4  ;;  %v1005_v63 = vadd.f32 %v1004_v47, %v974_v22 }
 0x125   : > { %v938_v62 = vadd.f32 %v937_v21, %v936_v19  ;;  %v1006_v23 = vrot.slane %v1005_v63, 4 }
 0x127   : > { %v939_v25 = vrot.slane %v938_v62, 2  ;;  %v1007_v17 = vadd.f32 %v1006_v23, %v1005_v63 }
 0x129   : > { %v940_v26 = vadd.f32 %v939_v25, %v938_v62  ;;  %v1008_v27 = vrot.slane %v1007_v17, 2 }
 0x12b   : > { %v941_v18 = vrot.slane %v940_v26, 1  ;;  %v1009_v28 = vadd.f32 %v1008_v27, %v1007_v17 }
 0x12d   : > { %v942_v29 = vadd.f32 %v941_v18, %v940_v26  ;;  %v1010_v15 = vrot.slane %v1009_v28, 1 }
 0x12f   : > { %1012 = vst [vmem:[%s265_s13] sm:$0xff] %v942_v29  ;;  %v1011_v36 = vadd.f32 %v1010_v15, %v1009_v28 }
 0x130   : > { %1451 = shalt.err (!%p1448_p5)
}
 0x131   : > { %1363 = dma.vmem_to_hbm [thread:$0]  (%p1606_p4), %s1042_s14, 128, %s1044_s16, %s1020_s25   ;;  %1013 = vst [vmem:[%s272_s21] sm:$0xff] %v1011_v36 }
 0x132   : > { %s1025_s12 = scalar_lea.sflag [#allocation6], %s1909_s15  ;;  %s1466_s13 = sshra.s32 %s1921_s24, 4  ;;  %s1467_s13 = int_to_ptr.hbm [resolvable:$true] %s1466_s13 }
 0x133   : > { %s1468_s27 = scalar_lea.hbm %s1467_s13, 8  ;;  %s1472_s8 = scalar_lea.hbm %s1975_s5, 16 }
 0x134   : > { %p1469_p6 = scmp.ne.s32.totalorder %s1467_s13, %s1468_s27  ;;  %p1473_p10 = scmp.lt.s32.totalorder %s1467_s13, %s1975_s5 }
 0x135   : > { %p1474_p11 = scmp.lt.s32.totalorder %s1472_s8, %s1468_s27 }
 0x136   : > { %p1470_p7 = pnand %p1469_p6, %p1606_p4 }
 0x137   : > { %p1475_p12 = por %p1474_p11, %p1473_p10 }
 0x138   : > { %p1471_p9 = pneg %p1470_p7 }
 0x13a   : > { %p1476_p13 = pnand %p1475_p12, %p1471_p9 }
 0x13c   : > { %1479 = shalt.err (!%p1476_p13)
}
 0x13d   : > { %1364 = dma.vmem_to_hbm [thread:$0]  (%p1606_p4), %s1919_s17, 128, %s1921_s24, %s1025_s12  }
 0x13e PF: > { %p1374_p0 = scmp.ge.s32.totalorder %s1534_s23, 2  ;;  %s1077_s15 = sand.u32 1, %s1514_s18  }
 0x13f   : > { %s1078_s14 = scalar_lea.sflag [#allocation4], %s1077_s15 }
 0x140   : > { %p1368_p1 = pnand %p1374_p0, %p1613_p8 }
 0x142   : > { %p1369_p2 = pneg %p1368_p1 }
 0x144   : > { %1505 = dma.done.wait (%p1369_p2), %s1078_s14, 128  }
 0x145   : > { %1507 = vsyncadd (%p1369_p2), %s1078_s14, 4294967168  ;;  %s1088_s16 = scalar_lea.sflag [#allocation6], %s1077_s15 }
 0x146   : > { %1509 = dma.done.wait (%p1369_p2), %s1088_s16, 128  }
 0x147   : > { %1511 = vsyncadd (%p1369_p2), %s1088_s16, 4294967168  ;;  %s22_s23 = sadd.s32 1, %s1534_s23   ;;  %s1978_s18 = smov %s1518_s19 }
 0x148   : > { %p19_p3 = scmp.ge.s32.totalorder %s22_s23, 4   ;;  %s1979_s19 = smov %s1522_s20 }
 0x149   : > { %s1980_s20 = smov %s1619_s6  ;;  %s1981_s21 = smov %s1530_s22 }
 0x14a   : > { %s1982_s22 = smov %s1984_s26  ;;  %21 = sbr.rel (!%p19_p3) target bundleno = 6 (0x6), region = 107 }
 0x14f   :  { %1094 = vsyncpa [#allocation4], 1 }
 0x150   :  { %1096 = vsyncpa [#allocation4 + $0x1], 1 }
 0x151   :  { %1097 = vsyncpa [#allocation6], 1 }
 0x152   :  { %1099 = vsyncpa [#allocation6 + $0x1], 1 }

// kernel: discriminator_forward.10
= control target key start
LH: loop header
LB: loop body
LE: loop exit
PB: predicated region body
PF: predicated region fallthrough
CT: control target
= control target key end

     0   :  { %s298_s0 = inlined_call_operand.vmem [shape: f32[128,128], index: 0, kind: input, shape index: {}]   ;;  %s299_s1 = inlined_call_operand.vmem [shape: f32[1,128], index: 1, kind: input, shape index: {}]   ;;  %s300_s2 = inlined_call_operand.vmem [shape: f32[1,128], index: 2, kind: input, shape index: {}]   ;;  %s301_s3 = inlined_call_operand.vmem [shape: f32[128,128], index: 3, kind: output, shape index: {}]  }
   0x1   :  { %v14_v0 = vld [vmem:[%s298_s0] sm:$0xff]  ;;  %v15_v3 = vld [vmem:[%s298_s0 + $0x8] sm:$0xff]  ;;  %v16_v6 = vld [vmem:[%s298_s0 + $0x10] sm:$0xff] }
   0x2   :  { %v166_v1 = vld [vmem:[%s299_s1] ss:$0 sm:$0xff]  ;;  %v17_v7 = vld [vmem:[%s298_s0 + $0x18] sm:$0xff]  ;;  %v19_v12 = vld [vmem:[%s298_s0 + $0x28] sm:$0xff] }
   0x3   :  { %v171_v2 = vld [vmem:[%s300_s2] ss:$0 sm:$0xff]  ;;  %v34_v4 = vmul.f32 %v166_v1, %v14_v0  ;;  %v35_v5 = vmul.f32 %v166_v1, %v15_v3  ;;  %v36_v9 = vmul.f32 %v166_v1, %v16_v6  ;;  %v37_v10 = vmul.f32 %v166_v1, %v17_v7  ;;  %v20_v13 = vld [vmem:[%s298_s0 + $0x30] sm:$0xff]  ;;  %v21_v14 = vld [vmem:[%s298_s0 + $0x38] sm:$0xff] }
   0x4   :  { %v18_v8 = vld [vmem:[%s298_s0 + $0x20] sm:$0xff]  ;;  %v39_v17 = vmul.f32 %v166_v1, %v19_v12  ;;  %v40_v18 = vmul.f32 %v166_v1, %v20_v13  ;;  %v41_v22 = vmul.f32 %v166_v1, %v21_v14  ;;  %v23_v24 = vld [vmem:[%s298_s0 + $0x48] sm:$0xff]  ;;  %v24_v32 = vld [vmem:[%s298_s0 + $0x50] sm:$0xff] }
   0x5   :  { %v38_v11 = vmul.f32 %v166_v1, %v18_v8  ;;  %v54_v15 = vadd.f32 %v171_v2, %v34_v4  ;;  %v55_v16 = vadd.f32 %v171_v2, %v35_v5  ;;  %v56_v19 = vadd.f32 %v171_v2, %v36_v9  ;;  %v22_v23 = vld [vmem:[%s298_s0 + $0x40] sm:$0xff]  ;;  %v25_v41 = vld [vmem:[%s298_s0 + $0x58] sm:$0xff]  ;;  %v27_v52 = vld [vmem:[%s298_s0 + $0x68] sm:$0xff] }
   0x6   :  { %v57_v20 = vadd.f32 %v171_v2, %v37_v10  ;;  %v59_v35 = vadd.f32 %v171_v2, %v39_v17  ;;  %v60_v36 = vadd.f32 %v171_v2, %v40_v18  ;;  %v61_v38 = vadd.f32 %v171_v2, %v41_v22  ;;  %v26_v51 = vld [vmem:[%s298_s0 + $0x60] sm:$0xff]  ;;  %v28_v56 = vld [vmem:[%s298_s0 + $0x70] sm:$0xff]  ;;  %v29_v59 = vld [vmem:[%s298_s0 + $0x78] sm:$0xff] }
   0x7   :  { %v58_v21 = vadd.f32 %v171_v2, %v38_v11  ;;  %vm70_vm0 = vcmp.gt.f32.partialorder %v54_v15, 0.0  ;;  %v86_v25 = vmul.f32 0.2, %v54_v15  ;;  %vm71_vm1 = vcmp.gt.f32.partialorder %v55_v16, 0.0 }
   0x8   :  { %v87_v26 = vmul.f32 0.2, %v55_v16  ;;  %vm72_vm2 = vcmp.gt.f32.partialorder %v56_v19, 0.0  ;;  %v88_v27 = vmul.f32 0.2, %v56_v19  ;;  %vm73_vm3 = vcmp.gt.f32.partialorder %v57_v20, 0.0 }
   0x9   :  { %v89_v28 = vmul.f32 0.2, %v57_v20  ;;  %v102_v29 = vsel %vm70_vm0, %v54_v15, %v86_v25  ;;  %vm74_vm4 = vcmp.gt.f32.partialorder %v58_v21, 0.0  ;;  %v90_v31 = vmul.f32 0.2, %v58_v21 }
   0xa   :  { %v103_v30 = vsel %vm71_vm1, %v55_v16, %v87_v26  ;;  %118 = vst [vmem:[%s301_s3] sm:$0xff] %v102_v29  ;;  %v104_v33 = vsel %vm72_vm2, %v56_v19, %v88_v27  ;;  %v42_v39 = vmul.f32 %v166_v1, %v22_v23  ;;  %v43_v40 = vmul.f32 %v166_v1, %v23_v24 }
   0xb   :  { %v105_v34 = vsel %vm73_vm3, %v57_v20, %v89_v28  ;;  %119 = vst [vmem:[%s301_s3 + $0x8] sm:$0xff] %v103_v30  ;;  %v106_v37 = vsel %vm74_vm4, %v58_v21, %v90_v31  ;;  %vm75_vm5 = vcmp.gt.f32.partialorder %v59_v35, 0.0  ;;  %v91_v42 = vmul.f32 0.2, %v59_v35 }
   0xc   :  { %120 = vst [vmem:[%s301_s3 + $0x10] sm:$0xff] %v104_v33  ;;  %vm76_vm6 = vcmp.gt.f32.partialorder %v60_v36, 0.0  ;;  %v44_v43 = vmul.f32 %v166_v1, %v24_v32  ;;  %v92_v44 = vmul.f32 0.2, %v60_v36  ;;  %vm77_vm7 = vcmp.gt.f32.partialorder %v61_v38, 0.0 }
   0xd   :  { %121 = vst [vmem:[%s301_s3 + $0x18] sm:$0xff] %v105_v34  ;;  %v93_v45 = vmul.f32 0.2, %v61_v38  ;;  %v62_v46 = vadd.f32 %v171_v2, %v42_v39  ;;  %v107_v47 = vsel %vm75_vm5, %v59_v35, %v91_v42  ;;  %v63_v48 = vadd.f32 %v171_v2, %v43_v40 }
   0xe   :  { %122 = vst [vmem:[%s301_s3 + $0x20] sm:$0xff] %v106_v37  ;;  %v64_v49 = vadd.f32 %v171_v2, %v44_v43  ;;  %v45_v50 = vmul.f32 %v166_v1, %v25_v41  ;;  %v108_v53 = vsel %vm76_vm6, %v60_v36, %v92_v44  ;;  %v46_v62 = vmul.f32 %v166_v1, %v26_v51 }
   0xf   :  { %123 = vst [vmem:[%s301_s3 + $0x28] sm:$0xff] %v107_v47  ;;  %v109_v54 = vsel %vm77_vm7, %v61_v38, %v93_v45  ;;  %vm78_vm8 = vcmp.gt.f32.partialorder %v62_v46, 0.0  ;;  %v94_v55 = vmul.f32 0.2, %v62_v46  ;;  %vm79_vm9 = vcmp.gt.f32.partialorder %v63_v48, 0.0 }
  0x10   :  { %124 = vst [vmem:[%s301_s3 + $0x30] sm:$0xff] %v108_v53  ;;  %v95_v57 = vmul.f32 0.2, %v63_v48  ;;  %vm80_vm10 = vcmp.gt.f32.partialorder %v64_v49, 0.0  ;;  %v65_v58 = vadd.f32 %v171_v2, %v45_v50  ;;  %v96_v61 = vmul.f32 0.2, %v64_v49 }
  0x11   :  { %125 = vst [vmem:[%s301_s3 + $0x38] sm:$0xff] %v109_v54  ;;  %v110_v60 = vsel %vm78_vm8, %v62_v46, %v94_v55  ;;  %v47_v63 = vmul.f32 %v166_v1, %v27_v52  ;;  %v48_v4 = vmul.f32 %v166_v1, %v28_v56  ;;  %v66_v6 = vadd.f32 %v171_v2, %v46_v62 }
  0x12   :  { %126 = vst [vmem:[%s301_s3 + $0x40] sm:$0xff] %v110_v60  ;;  %v111_v0 = vsel %vm79_vm9, %v63_v48, %v95_v57  ;;  %vm81_vm11 = vcmp.gt.f32.partialorder %v65_v58, 0.0  ;;  %v97_v3 = vmul.f32 0.2, %v65_v58  ;;  %v112_v5 = vsel %vm80_vm10, %v64_v49, %v96_v61 }
  0x13   :  { %127 = vst [vmem:[%s301_s3 + $0x48] sm:$0xff] %v111_v0  ;;  %v67_v7 = vadd.f32 %v171_v2, %v47_v63  ;;  %v49_v8 = vmul.f32 %v166_v1, %v29_v59  ;;  %v68_v10 = vadd.f32 %v171_v2, %v48_v4  ;;  %vm82_vm12 = vcmp.gt.f32.partialorder %v66_v6, 0.0 }
  0x14   :  { %128 = vst [vmem:[%s301_s3 + $0x50] sm:$0xff] %v112_v5  ;;  %v113_v9 = vsel %vm81_vm11, %v65_v58, %v97_v3  ;;  %v98_v11 = vmul.f32 0.2, %v66_v6 }
  0x15   :  { %129 = vst [vmem:[%s301_s3 + $0x58] sm:$0xff] %v113_v9  ;;  %vm83_vm13 = vcmp.gt.f32.partialorder %v67_v7, 0.0  ;;  %v69_v12 = vadd.f32 %v171_v2, %v49_v8  ;;  %v99_v13 = vmul.f32 0.2, %v67_v7  ;;  %vm84_vm14 = vcmp.gt.f32.partialorder %v68_v10, 0.0 }
  0x16   :  { %v100_v14 = vmul.f32 0.2, %v68_v10  ;;  %v114_v1 = vsel %vm82_vm12, %v66_v6, %v98_v11 }
  0x17   :  { %vm85_vm15 = vcmp.gt.f32.partialorder %v69_v12, 0.0  ;;  %v101_v15 = vmul.f32 0.2, %v69_v12  ;;  %130 = vst [vmem:[%s301_s3 + $0x60] sm:$0xff] %v114_v1  ;;  %v115_v16 = vsel %vm83_vm13, %v67_v7, %v99_v13 }
  0x18   :  { %v116_v17 = vsel %vm84_vm14, %v68_v10, %v100_v14  ;;  %131 = vst [vmem:[%s301_s3 + $0x68] sm:$0xff] %v115_v16 }
  0x19   :  { %v117_v18 = vsel %vm85_vm15, %v69_v12, %v101_v15  ;;  %132 = vst [vmem:[%s301_s3 + $0x70] sm:$0xff] %v116_v17 }
  0x1a   :  { %133 = vst [vmem:[%s301_s3 + $0x78] sm:$0xff] %v117_v18 }

// kernel: discriminator_forward.9
= control target key start
LH: loop header
LB: loop body
LE: loop exit
PB: predicated region body
PF: predicated region fallthrough
CT: control target
= control target key end

     0   :  { %s1789_s18 = smov 0   ;;  %s1791_s19 = smov 0   ;;  %s2099_s0 = inlined_call_operand.vmem [shape: bf16[128,1024], index: 0, kind: input, shape index: {}]   ;;  %s2100_s1 = inlined_call_operand.vmem [shape: bf16[1024,128], index: 1, kind: input, shape index: {}]   ;;  %s2101_s2 = inlined_call_operand.vmem [shape: f32[1,128], index: 2, kind: input, shape index: {}]   ;;  %s2102_s3 = inlined_call_operand.vmem [shape: f32[128,128], index: 3, kind: output, shape index: {0}]   ;;  %s2103_s4 = inlined_call_operand.vmem [shape: f32[1,8,128], index: 4, kind: output, shape index: {1}]   ;;  %s2104_s5 = inlined_call_operand.vmem [shape: f32[1,8,128], index: 5, kind: output, shape index: {2}]  }
   0x1   :  { %s1793_s20 = smov 0   ;;  %s1795_s21 = smov 0  }
   0x2   :  { %s1797_s22 = smov 0  }
   0x3 LB: > { %s25_s23 = sadd.s32 1, %s1752_s21  ;;  %p44_p1 = scmp.ne.s32.totalorder %s1744_s19, %s1740_s18  ;;  %s1756_s22 = sphi %s1797_s22, %s16_s22   ;;  %s1752_s21 = sphi %s1795_s21, %s2108_s21   ;;  %s1748_s20 = sphi %s1793_s20, %s2107_s20   ;;  %s1744_s19 = sphi %s1791_s19, %s2106_s19   ;;  %s1740_s18 = sphi %s1789_s18, %s2105_s18  }
   0x4   : > { %p26_p0 = scmp.ge.s32.totalorder %s25_s23, 2  ;;  %p45_p2 = scmp.eq.s32.totalorder %s1756_s22, 0 }
   0x5   : > { %s37_s25 = sadd.s32 1, %s1744_s19  ;;  %p1339_p5 = scmp.ge.s32.totalorder %s1756_s22, 2 }
   0x6   : > { %s2110_s23 = smov (%p26_p0, %s25_s23), 0  ;;  %p46_p3 = por %p45_p2, %p44_p1 }
   0x7   : > { %s33_s24 = ssub.s32 %s1752_s21, %s2110_s23  ;;  %198 = sbr.rel (%p1339_p5) target bundleno = 48 (0x30), region = 20 }
   0x8   : > { %p35_p4 = scmp.eq.s32.totalorder %s33_s24, 0 }
   0xa   : > { %s1824_s26 = scalar_select %p35_p4, %s1744_s19, %s37_s25  }
   0xc   : > { %201 = sbr.rel (!%p46_p3) target bundleno = 48 (0x30), region = 24  ;;  %s203_s27 = sand.u32 (%p46_p3), 1, %s1744_s19  }
   0xd   : > { %s1611_s28 = sshll.u32 (%p46_p3), %s1752_s21, 4  ;;  %s1340_s29 = sshll.u32 (%p46_p3), %s203_s27, 8 }
   0xe   : > { %s1832_s7 = scalar_lea.vmem (%p46_p3), %s2099_s0, %s1611_s28  ;;  %s1837_s8 = scalar_lea.vmem (%p46_p3), [#allocation3], %s1340_s29 }
   0xf   : > { %v224_v0 = vld [vmem:[%s1832_s7] sm:$0xff] (%p46_p3)  ;;  %v226_v1 = vld [vmem:[%s1832_s7 + $0x8] sm:$0xff] (%p46_p3) }
  0x10   : > { %v228_v2 = vld [vmem:[%s1832_s7 + $0x20] sm:$0xff] (%p46_p3)  ;;  %225 = vst [vmem:[%s1837_s8] sm:$0xff] (%p46_p3), %v224_v0  ;;  %v230_v3 = vld [vmem:[%s1832_s7 + $0x28] sm:$0xff] (%p46_p3) }
  0x11   : > { %227 = vst [vmem:[%s1837_s8 + $0x8] sm:$0xff] %v226_v1  ;;  %v232_v4 = vld [vmem:[%s1832_s7 + $0x40] sm:$0xff]  ;;  %v234_v5 = vld [vmem:[%s1832_s7 + $0x48] sm:$0xff] }
  0x12   : > { %229 = vst [vmem:[%s1837_s8 + $0x10] sm:$0xff] %v228_v2  ;;  %v236_v6 = vld [vmem:[%s1832_s7 + $0x60] sm:$0xff]  ;;  %v238_v7 = vld [vmem:[%s1832_s7 + $0x68] sm:$0xff] }
  0x13   : > { %231 = vst [vmem:[%s1837_s8 + $0x18] sm:$0xff] %v230_v3  ;;  %v240_v8 = vld [vmem:[%s1832_s7 + $0x80] sm:$0xff]  ;;  %v242_v9 = vld [vmem:[%s1832_s7 + $0x88] sm:$0xff] }
  0x14   : > { %233 = vst [vmem:[%s1837_s8 + $0x20] sm:$0xff] %v232_v4  ;;  %v244_v10 = vld [vmem:[%s1832_s7 + $0xa0] sm:$0xff]  ;;  %v246_v11 = vld [vmem:[%s1832_s7 + $0xa8] sm:$0xff] }
  0x15   : > { %235 = vst [vmem:[%s1837_s8 + $0x28] sm:$0xff] %v234_v5  ;;  %v248_v12 = vld [vmem:[%s1832_s7 + $0xc0] sm:$0xff]  ;;  %v250_v13 = vld [vmem:[%s1832_s7 + $0xc8] sm:$0xff] }
  0x16   : > { %237 = vst [vmem:[%s1837_s8 + $0x30] sm:$0xff] %v236_v6  ;;  %v252_v14 = vld [vmem:[%s1832_s7 + $0xe0] sm:$0xff]  ;;  %v254_v15 = vld [vmem:[%s1832_s7 + $0xe8] sm:$0xff] }
  0x17   : > { %239 = vst [vmem:[%s1837_s8 + $0x38] sm:$0xff] %v238_v7  ;;  %v256_v16 = vld [vmem:[%s1832_s7 + $0x100] sm:$0xff]  ;;  %v258_v17 = vld [vmem:[%s1832_s7 + $0x108] sm:$0xff] }
  0x18   : > { %241 = vst [vmem:[%s1837_s8 + $0x40] sm:$0xff] %v240_v8  ;;  %v260_v18 = vld [vmem:[%s1832_s7 + $0x120] sm:$0xff]  ;;  %v262_v19 = vld [vmem:[%s1832_s7 + $0x128] sm:$0xff] }
  0x19   : > { %243 = vst [vmem:[%s1837_s8 + $0x48] sm:$0xff] %v242_v9  ;;  %v264_v20 = vld [vmem:[%s1832_s7 + $0x140] sm:$0xff]  ;;  %v266_v21 = vld [vmem:[%s1832_s7 + $0x148] sm:$0xff] }
  0x1a   : > { %245 = vst [vmem:[%s1837_s8 + $0x50] sm:$0xff] %v244_v10  ;;  %v268_v22 = vld [vmem:[%s1832_s7 + $0x160] sm:$0xff]  ;;  %v270_v23 = vld [vmem:[%s1832_s7 + $0x168] sm:$0xff] }
  0x1b   : > { %247 = vst [vmem:[%s1837_s8 + $0x58] sm:$0xff] %v246_v11  ;;  %v272_v24 = vld [vmem:[%s1832_s7 + $0x180] sm:$0xff]  ;;  %v274_v25 = vld [vmem:[%s1832_s7 + $0x188] sm:$0xff] }
  0x1c   : > { %249 = vst [vmem:[%s1837_s8 + $0x60] sm:$0xff] %v248_v12  ;;  %v276_v26 = vld [vmem:[%s1832_s7 + $0x1a0] sm:$0xff]  ;;  %v278_v27 = vld [vmem:[%s1832_s7 + $0x1a8] sm:$0xff] }
  0x1d   : > { %251 = vst [vmem:[%s1837_s8 + $0x68] sm:$0xff] %v250_v13  ;;  %v280_v28 = vld [vmem:[%s1832_s7 + $0x1c0] sm:$0xff]  ;;  %v282_v29 = vld [vmem:[%s1832_s7 + $0x1c8] sm:$0xff] }
  0x1e   : > { %253 = vst [vmem:[%s1837_s8 + $0x70] sm:$0xff] %v252_v14  ;;  %v284_v30 = vld [vmem:[%s1832_s7 + $0x1e0] sm:$0xff]  ;;  %v286_v31 = vld [vmem:[%s1832_s7 + $0x1e8] sm:$0xff] }
  0x1f   : > { %255 = vst [vmem:[%s1837_s8 + $0x78] sm:$0xff] %v254_v15 }
  0x20   : > { %257 = vst [vmem:[%s1837_s8 + $0x80] sm:$0xff] %v256_v16 }
  0x21   : > { %259 = vst [vmem:[%s1837_s8 + $0x88] sm:$0xff] %v258_v17 }
  0x22   : > { %261 = vst [vmem:[%s1837_s8 + $0x90] sm:$0xff] %v260_v18 }
  0x23   : > { %263 = vst [vmem:[%s1837_s8 + $0x98] sm:$0xff] %v262_v19 }
  0x24   : > { %265 = vst [vmem:[%s1837_s8 + $0xa0] sm:$0xff] %v264_v20 }
  0x25   : > { %267 = vst [vmem:[%s1837_s8 + $0xa8] sm:$0xff] %v266_v21 }
  0x26   : > { %269 = vst [vmem:[%s1837_s8 + $0xb0] sm:$0xff] %v268_v22 }
  0x27   : > { %271 = vst [vmem:[%s1837_s8 + $0xb8] sm:$0xff] %v270_v23 }
  0x28   : > { %273 = vst [vmem:[%s1837_s8 + $0xc0] sm:$0xff] %v272_v24 }
  0x29   : > { %275 = vst [vmem:[%s1837_s8 + $0xc8] sm:$0xff] %v274_v25 }
  0x2a   : > { %277 = vst [vmem:[%s1837_s8 + $0xd0] sm:$0xff] %v276_v26 }
  0x2b   : > { %279 = vst [vmem:[%s1837_s8 + $0xd8] sm:$0xff] %v278_v27 }
  0x2c   : > { %281 = vst [vmem:[%s1837_s8 + $0xe0] sm:$0xff] %v280_v28 }
  0x2d   : > { %283 = vst [vmem:[%s1837_s8 + $0xe8] sm:$0xff] %v282_v29 }
  0x2e   : > { %285 = vst [vmem:[%s1837_s8 + $0xf0] sm:$0xff] %v284_v30 }
  0x2f   : > { %287 = vst [vmem:[%s1837_s8 + $0xf8] sm:$0xff] %v286_v31 }
  0x30 PF: > { %p1343_p6 = scmp.ge.s32.totalorder %s1756_s22, 1  ;;  %p301_p7 = scmp.lt.s32.totalorder %s1756_s22, 3 }
  0x32   : > { %p302_p8 = pnand %p1343_p6, %p301_p7 }
  0x33   : > { %s308_s9 = sand.u32 (!%p302_p8), 1, %s1740_s18   ;;  %s1345_s10 = sshll.u32 (!%p302_p8), %s1748_s20, 6 }
  0x34   : > { %305 = sbr.rel (%p302_p8) target bundleno = 421 (0x1a5), region = 51  ;;  %s1344_s11 = sshll.u32 (!%p302_p8), %s308_s9, 8 }
  0x35   : > { %p351_p9 = scmp.lt.s32.totalorder (!%p302_p8), %s1345_s10, 127  ;;  %s1909_s16 = scalar_lea.vmem (!%p302_p8), [#allocation3], %s1344_s11 }
  0x36   : > { %p1347_p10 = scmp.ne.s32.totalorder (!%p302_p8), %s1748_s20, 0 }
  0x39   : > { %s2112_s10 = smov (!%p351_p9, %s1345_s10), 127  ;;  %373 = sbr.rel (%p1347_p10) target bundleno = 79 (0x4f), region = 59 }
  0x3a   : > { %s1346_s12 = sshll.u32 %s2112_s10, 2 }
  0x3b   : > { %s1907_s15 = scalar_lea.vmem %s2100_s1, %s1346_s12 }
  0x3e   : > { %v1758_v32 = vmov 0.0  }
  0x3f   : > { %374 = vst [vmem:[#allocation2 + $0x30] sm:$0xff] %v1758_v32 }
  0x40   : > { %375 = vst [vmem:[#allocation2] sm:$0xff] %v1758_v32 }
  0x41   : > { %376 = vst [vmem:[#allocation2 + $0x58] sm:$0xff] %v1758_v32 }
  0x42   : > { %377 = vst [vmem:[#allocation2 + $0x18] sm:$0xff] %v1758_v32 }
  0x43   : > { %378 = vst [vmem:[#allocation2 + $0x50] sm:$0xff] %v1758_v32 }
  0x44   : > { %379 = vst [vmem:[#allocation2 + $0x68] sm:$0xff] %v1758_v32 }
  0x45   : > { %380 = vst [vmem:[#allocation2 + $0x8] sm:$0xff] %v1758_v32 }
  0x46   : > { %381 = vst [vmem:[#allocation2 + $0x48] sm:$0xff] %v1758_v32 }
  0x47   : > { %382 = vst [vmem:[#allocation2 + $0x40] sm:$0xff] %v1758_v32 }
  0x48   : > { %383 = vst [vmem:[#allocation2 + $0x20] sm:$0xff] %v1758_v32 }
  0x49   : > { %384 = vst [vmem:[#allocation2 + $0x10] sm:$0xff] %v1758_v32 }
  0x4a   : > { %385 = vst [vmem:[#allocation2 + $0x38] sm:$0xff] %v1758_v32 }
  0x4b   : > { %386 = vst [vmem:[#allocation2 + $0x60] sm:$0xff] %v1758_v32 }
  0x4c   : > { %387 = vst [vmem:[#allocation2 + $0x70] sm:$0xff] %v1758_v32 }
  0x4d   : > { %388 = vst [vmem:[#allocation2 + $0x78] sm:$0xff] %v1758_v32 }
  0x4e   : > { %389 = vst [vmem:[#allocation2 + $0x28] sm:$0xff] %v1758_v32 }
  0x4f PF: > { %v1651_v33 = vld [vmem:[%s1907_s15 + $0x38] sm:$0xff]  ;;  %v1650_v37 = vld [vmem:[%s1907_s15 + $0x30] sm:$0xff]  ;;  %v1649_v41 = vld [vmem:[%s1907_s15 + $0x28] sm:$0xff]  ;;  %p1604_p11 = scmp.ne.s32.totalorder %s1748_s20, 1 }
  0x50   : > { %v1659_v34 = vld [vmem:[%s1907_s15 + $0x78] sm:$0xff]  ;;  %854 = vmatpush.bf16.msra.mxu0 %v1651_v33  ;;  %v1658_v38 = vld [vmem:[%s1907_s15 + $0x70] sm:$0xff]  ;;  %v1657_v42 = vld [vmem:[%s1907_s15 + $0x68] sm:$0xff] }
  0x51   : > { %v1667_v35 = vld [vmem:[%s1907_s15 + $0xb8] sm:$0xff]  ;;  %903 = vmatpush.bf16.msra.mxu1 %v1659_v34  ;;  %v1666_v39 = vld [vmem:[%s1907_s15 + $0xb0] sm:$0xff]  ;;  %v1665_v43 = vld [vmem:[%s1907_s15 + $0xa8] sm:$0xff] }
  0x52   : > { %v1675_v36 = vld [vmem:[%s1907_s15 + $0xf8] sm:$0xff]  ;;  %952 = vmatpush.bf16.msra.mxu2 %v1667_v35  ;;  %v1674_v40 = vld [vmem:[%s1907_s15 + $0xf0] sm:$0xff]  ;;  %v1673_v44 = vld [vmem:[%s1907_s15 + $0xe8] sm:$0xff] }
  0x53   : > { %1001 = vmatpush.bf16.msra.mxu3 %v1675_v36  ;;  %v1648_v45 = vld [vmem:[%s1907_s15 + $0x20] sm:$0xff]  ;;  %v1647_v49 = vld [vmem:[%s1907_s15 + $0x18] sm:$0xff]  ;;  %v1646_v53 = vld [vmem:[%s1907_s15 + $0x10] sm:$0xff] }
  0x54   : > { %855 = vmatpush.bf16.msra.mxu0 %v1650_v37  ;;  %v1656_v46 = vld [vmem:[%s1907_s15 + $0x60] sm:$0xff]  ;;  %v1655_v50 = vld [vmem:[%s1907_s15 + $0x58] sm:$0xff]  ;;  %v1654_v54 = vld [vmem:[%s1907_s15 + $0x50] sm:$0xff] }
  0x55   : > { %904 = vmatpush.bf16.msra.mxu1 %v1658_v38  ;;  %v1664_v47 = vld [vmem:[%s1907_s15 + $0xa0] sm:$0xff]  ;;  %v1663_v51 = vld [vmem:[%s1907_s15 + $0x98] sm:$0xff]  ;;  %v1662_v55 = vld [vmem:[%s1907_s15 + $0x90] sm:$0xff] }
  0x56   : > { %953 = vmatpush.bf16.msra.mxu2 %v1666_v39  ;;  %v1672_v48 = vld [vmem:[%s1907_s15 + $0xe0] sm:$0xff]  ;;  %v1671_v52 = vld [vmem:[%s1907_s15 + $0xd8] sm:$0xff]  ;;  %v1670_v56 = vld [vmem:[%s1907_s15 + $0xd0] sm:$0xff] }
  0x57   : > { %1002 = vmatpush.bf16.msra.mxu3 %v1674_v40  ;;  %v1645_v57 = vld [vmem:[%s1907_s15 + $0x8] sm:$0xff]  ;;  %v1644_v61 = vld [vmem:[%s1907_s15] sm:$0xff]  ;;  %v1614_v2 = vld [vmem:[%s1909_s16 + $0xc] sm:$0xf0] }
  0x58   : > { %856 = vmatpush.bf16.msra.mxu0 %v1649_v41  ;;  %v1653_v58 = vld [vmem:[%s1907_s15 + $0x48] sm:$0xff]  ;;  %v1652_v62 = vld [vmem:[%s1907_s15 + $0x40] sm:$0xff]  ;;  %v1352_v4 = vld [vmem:[%s1909_s16 + $0x10] sm:$0xf0] }
  0x59   : > { %905 = vmatpush.bf16.msra.mxu1 %v1657_v42  ;;  %v1661_v59 = vld [vmem:[%s1907_s15 + $0x88] sm:$0xff]  ;;  %v1660_v63 = vld [vmem:[%s1907_s15 + $0x80] sm:$0xff]  ;;  %v1615_v6 = vld [vmem:[%s1909_s16 + $0x14] sm:$0xf0] }
  0x5a   : > { %954 = vmatpush.bf16.msra.mxu2 %v1665_v43  ;;  %v1669_v60 = vld [vmem:[%s1907_s15 + $0xc8] sm:$0xff]  ;;  %v1668_v0 = vld [vmem:[%s1907_s15 + $0xc0] sm:$0xff]  ;;  %v1360_v8 = vld [vmem:[%s1909_s16 + $0x18] sm:$0xf0] }
  0x5b   : > { %1003 = vmatpush.bf16.msra.mxu3 %v1673_v44  ;;  %v1350_v1 = vld [vmem:[%s1909_s16] sm:$0xf]  ;;  %v1612_v3 = vld [vmem:[%s1909_s16 + $0x4] sm:$0xf]  ;;  %v1358_v5 = vld [vmem:[%s1909_s16 + $0x8] sm:$0xf] }
  0x5c   : > { %857 = vmatpush.bf16.msra.mxu0 %v1648_v45  ;;  %v1613_v7 = vld [vmem:[%s1909_s16 + $0xc] sm:$0xf]  ;;  %v1351_v9 = vor.u32 %v1614_v2, %v1350_v1  ;;  %v1355_v10 = vor.u32 %v1612_v3, %v1352_v4  ;;  %v1359_v11 = vor.u32 %v1615_v6, %v1358_v5  ;;  %v1366_v13 = vld [vmem:[%s1909_s16 + $0x20] sm:$0xf]  ;;  %v1618_v14 = vld [vmem:[%s1909_s16 + $0x2c] sm:$0xf0] }
  0x5d   : > { %906 = vmatpush.bf16.msra.mxu1 %v1656_v46  ;;  %v1363_v12 = vor.u32 %v1613_v7, %v1360_v8  ;;  %v1616_v15 = vld [vmem:[%s1909_s16 + $0x24] sm:$0xf]  ;;  %v1368_v16 = vld [vmem:[%s1909_s16 + $0x30] sm:$0xf0]  ;;  %v1374_v17 = vld [vmem:[%s1909_s16 + $0x28] sm:$0xf]  ;;  %v1367_v21 = vor.u32 %v1618_v14, %v1366_v13 }
  0x5e   : > { %955 = vmatpush.bf16.msra.mxu2 %v1664_v47  ;;  %v1619_v18 = vld [vmem:[%s1909_s16 + $0x34] sm:$0xf0]  ;;  %v1617_v19 = vld [vmem:[%s1909_s16 + $0x2c] sm:$0xf]  ;;  %v1376_v20 = vld [vmem:[%s1909_s16 + $0x38] sm:$0xf0]  ;;  %v1371_v22 = vor.u32 %v1616_v15, %v1368_v16 }
  0x5f   : > { %1004 = vmatpush.bf16.msra.mxu3 %v1672_v48  ;;  %v1375_v23 = vor.u32 %v1619_v18, %v1374_v17  ;;  %v1379_v24 = vor.u32 %v1617_v19, %v1376_v20  ;;  %v1382_v25 = vld [vmem:[%s1909_s16 + $0x40] sm:$0xf]  ;;  %v1622_v26 = vld [vmem:[%s1909_s16 + $0x4c] sm:$0xf0]  ;;  %v1620_v27 = vld [vmem:[%s1909_s16 + $0x44] sm:$0xf] }
  0x60   : > { %858 = vmatpush.bf16.msra.mxu0 %v1647_v49  ;;  %v1384_v28 = vld [vmem:[%s1909_s16 + $0x50] sm:$0xf0]  ;;  %v1390_v29 = vld [vmem:[%s1909_s16 + $0x48] sm:$0xf]  ;;  %v1623_v30 = vld [vmem:[%s1909_s16 + $0x54] sm:$0xf0]  ;;  %v1383_v33 = vor.u32 %v1622_v26, %v1382_v25 }
  0x61   : > { %907 = vmatpush.bf16.msra.mxu1 %v1655_v50  ;;  %v1621_v31 = vld [vmem:[%s1909_s16 + $0x4c] sm:$0xf]  ;;  %v1392_v32 = vld [vmem:[%s1909_s16 + $0x58] sm:$0xf0]  ;;  %v1387_v34 = vor.u32 %v1620_v27, %v1384_v28  ;;  %v1391_v35 = vor.u32 %v1623_v30, %v1390_v29  ;;  %v1398_v37 = vld [vmem:[%s1909_s16 + $0x60] sm:$0xf] }
  0x62   : > { %956 = vmatpush.bf16.msra.mxu2 %v1663_v51  ;;  %v1395_v36 = vor.u32 %v1621_v31, %v1392_v32  ;;  %v1626_v38 = vld [vmem:[%s1909_s16 + $0x6c] sm:$0xf0]  ;;  %v1624_v39 = vld [vmem:[%s1909_s16 + $0x64] sm:$0xf]  ;;  %v1400_v40 = vld [vmem:[%s1909_s16 + $0x70] sm:$0xf0] }
  0x63   : > { %1005 = vmatpush.bf16.msra.mxu3 %v1671_v52  ;;  %v1406_v41 = vld [vmem:[%s1909_s16 + $0x68] sm:$0xf]  ;;  %v1627_v42 = vld [vmem:[%s1909_s16 + $0x74] sm:$0xf0]  ;;  %v1625_v43 = vld [vmem:[%s1909_s16 + $0x6c] sm:$0xf]  ;;  %v1399_v45 = vor.u32 %v1626_v38, %v1398_v37  ;;  %v1403_v46 = vor.u32 %v1624_v39, %v1400_v40 }
  0x64   : > { %859 = vmatpush.bf16.msra.mxu0 %v1646_v53  ;;  %v1408_v44 = vld [vmem:[%s1909_s16 + $0x78] sm:$0xf0]  ;;  %v1407_v47 = vor.u32 %v1627_v42, %v1406_v41  ;;  %v1414_v49 = vld [vmem:[%s1909_s16 + $0x80] sm:$0xf]  ;;  %v1630_v50 = vld [vmem:[%s1909_s16 + $0x8c] sm:$0xf0] }
  0x65   : > { %908 = vmatpush.bf16.msra.mxu1 %v1654_v54  ;;  %v1411_v48 = vor.u32 %v1625_v43, %v1408_v44  ;;  %v1628_v51 = vld [vmem:[%s1909_s16 + $0x84] sm:$0xf]  ;;  %v1416_v52 = vld [vmem:[%s1909_s16 + $0x90] sm:$0xf0]  ;;  %v1422_v53 = vld [vmem:[%s1909_s16 + $0x88] sm:$0xf] }
  0x66   : > { %957 = vmatpush.bf16.msra.mxu2 %v1662_v55  ;;  %v1631_v54 = vld [vmem:[%s1909_s16 + $0x94] sm:$0xf0]  ;;  %v1629_v55 = vld [vmem:[%s1909_s16 + $0x8c] sm:$0xf]  ;;  %v1438_v1 = vld [vmem:[%s1909_s16 + $0xa8] sm:$0xf] }
  0x67   : > { %1006 = vmatpush.bf16.msra.mxu3 %v1670_v56  ;;  %v1424_v56 = vld [vmem:[%s1909_s16 + $0x98] sm:$0xf0]  ;;  %v1635_v2 = vld [vmem:[%s1909_s16 + $0xb4] sm:$0xf0]  ;;  %v1633_v3 = vld [vmem:[%s1909_s16 + $0xac] sm:$0xf] }
  0x68   : > { %860 = vmatpush.bf16.msra.mxu0 %v1645_v57  ;;  %v1415_v57 = vor.u32 %v1630_v50, %v1414_v49  ;;  %v1440_v4 = vld [vmem:[%s1909_s16 + $0xb8] sm:$0xf0]  ;;  %v1439_v7 = vor.u32 %v1635_v2, %v1438_v1  ;;  %v1454_v13 = vld [vmem:[%s1909_s16 + $0xc8] sm:$0xf]  ;;  %v1639_v14 = vld [vmem:[%s1909_s16 + $0xd4] sm:$0xf0] }
  0x69   : > { %909 = vmatpush.bf16.msra.mxu1 %v1653_v58  ;;  %v1419_v58 = vor.u32 %v1628_v51, %v1416_v52  ;;  %v1443_v8 = vor.u32 %v1633_v3, %v1440_v4  ;;  %v1637_v15 = vld [vmem:[%s1909_s16 + $0xcc] sm:$0xf]  ;;  %v1456_v16 = vld [vmem:[%s1909_s16 + $0xd8] sm:$0xf0]  ;;  %v1455_v19 = vor.u32 %v1639_v14, %v1454_v13  ;;  %v1470_v25 = vld [vmem:[%s1909_s16 + $0xe8] sm:$0xf] }
  0x6a   : > { %958 = vmatpush.bf16.msra.mxu2 %v1661_v59  ;;  %v1423_v59 = vor.u32 %v1631_v54, %v1422_v53  ;;  %v1459_v20 = vor.u32 %v1637_v15, %v1456_v16  ;;  %v1643_v26 = vld [vmem:[%s1909_s16 + $0xf4] sm:$0xf0]  ;;  %v1641_v27 = vld [vmem:[%s1909_s16 + $0xec] sm:$0xf]  ;;  %v1472_v28 = vld [vmem:[%s1909_s16 + $0xf8] sm:$0xf0] }
  0x6b   : > { %1007 = vmatpush.bf16.msra.mxu3 %v1669_v60  ;;  %v1427_v60 = vor.u32 %v1629_v55, %v1424_v56  ;;  %v1471_v31 = vor.u32 %v1643_v26, %v1470_v25  ;;  %v1475_v32 = vor.u32 %v1641_v27, %v1472_v28  ;;  %v390_v41 = vld [vmem:[#allocation2 + $0x30] sm:$0xff]  ;;  %v391_v50 = vld [vmem:[#allocation2] sm:$0xff]  ;;  %v393_v4 = vld [vmem:[#allocation2 + $0x18] sm:$0xff] }
  0x6c   : > { %861 = vmatpush.bf16.msra.mxu0 %v1644_v61  ;;  %v1430_v61 = vld [vmem:[%s1909_s16 + $0xa0] sm:$0xf]  ;;  %v394_v13 = vld [vmem:[#allocation2 + $0x50] sm:$0xff] }
  0x6d   : > { %910 = vmatpush.bf16.msra.mxu1 %v1652_v62  ;;  %v1634_v62 = vld [vmem:[%s1909_s16 + $0xac] sm:$0xf0] }
  0x6e   : > { %959 = vmatpush.bf16.msra.mxu2 %v1660_v63  ;;  %v1632_v63 = vld [vmem:[%s1909_s16 + $0xa4] sm:$0xf]  ;;  %v1431_v5 = vor.u32 %v1634_v62, %v1430_v61 }
  0x6f   : > { %1008 = vmatpush.bf16.msra.mxu3 %v1668_v0  ;;  %862 = vmatmul.bf16.vlgmr.msra.gmra.mxu0 %v1351_v9  ;;  %v1432_v0 = vld [vmem:[%s1909_s16 + $0xb0] sm:$0xf0]  ;;  %v1446_v9 = vld [vmem:[%s1909_s16 + $0xc0] sm:$0xf] }
  0x70   : > { %911 = vmatmul.bf16.vlgmr.msra.gmra.mxu1 %v1355_v10  ;;  %v1435_v6 = vor.u32 %v1632_v63, %v1432_v0  ;;  %v1638_v10 = vld [vmem:[%s1909_s16 + $0xcc] sm:$0xf0] }
  0x71   : > { %960 = vmatmul.bf16.vlgmr.msra.gmra.mxu2 %v1359_v11  ;;  %v1636_v11 = vld [vmem:[%s1909_s16 + $0xc4] sm:$0xf]  ;;  %v1447_v17 = vor.u32 %v1638_v10, %v1446_v9 }
  0x72   : > { %1009 = vmatmul.bf16.vlgmr.msra.gmra.mxu3 %v1363_v12  ;;  %v1448_v12 = vld [vmem:[%s1909_s16 + $0xd0] sm:$0xf0] }
  0x73   : > { %v1451_v18 = vor.u32 %v1636_v11, %v1448_v12 }
  0x7f   : > { %867 = vmatmul.bf16.gmra.mxu0 %v1367_v21  ;;  %v1462_v21 = vld [vmem:[%s1909_s16 + $0xe0] sm:$0xf] }
  0x80   : > { %916 = vmatmul.bf16.gmra.mxu1 %v1371_v22  ;;  %v1642_v22 = vld [vmem:[%s1909_s16 + $0xec] sm:$0xf0] }
  0x81   : > { %965 = vmatmul.bf16.gmra.mxu2 %v1375_v23  ;;  %v1640_v23 = vld [vmem:[%s1909_s16 + $0xe4] sm:$0xf]  ;;  %v1463_v29 = vor.u32 %v1642_v22, %v1462_v21  ;;  %v395_v22 = vld [vmem:[#allocation2 + $0x68] sm:$0xff] }
  0x82   : > { %1014 = vmatmul.bf16.gmra.mxu3 %v1379_v24  ;;  %v1464_v24 = vld [vmem:[%s1909_s16 + $0xf0] sm:$0xf0] }
  0x83   : > { %v1467_v30 = vor.u32 %v1640_v23, %v1464_v24 }
  0x8f   : > { %872 = vmatmul.bf16.gmra.mxu0 %v1383_v33 }
  0x90   : > { %921 = vmatmul.bf16.gmra.mxu1 %v1387_v34 }
  0x91   : > { %970 = vmatmul.bf16.gmra.mxu2 %v1391_v35 }
  0x92   : > { %1019 = vmatmul.bf16.gmra.mxu3 %v1395_v36 }
  0x9f   : > { %877 = vmatmul.bf16.gmra.mxu0 %v1399_v45 }
  0xa0   : > { %926 = vmatmul.bf16.gmra.mxu1 %v1403_v46 }
  0xa1   : > { %975 = vmatmul.bf16.gmra.mxu2 %v1407_v47 }
  0xa2   : > { %1024 = vmatmul.bf16.gmra.mxu3 %v1411_v48 }
  0xaf   : > { %882 = vmatmul.bf16.gmra.mxu0 %v1415_v57 }
  0xb0   : > { %931 = vmatmul.bf16.gmra.mxu1 %v1419_v58 }
  0xb1   : > { %980 = vmatmul.bf16.gmra.mxu2 %v1423_v59  ;;  %v392_v59 = vld [vmem:[#allocation2 + $0x58] sm:$0xff] }
  0xb2   : > { %1029 = vmatmul.bf16.gmra.mxu3 %v1427_v60 }
  0xbf   : > { %887 = vmatmul.bf16.gmra.mxu0 %v1431_v5 }
  0xc0   : > { %936 = vmatmul.bf16.gmra.mxu1 %v1435_v6 }
  0xc1   : > { %985 = vmatmul.bf16.gmra.mxu2 %v1439_v7 }
  0xc2   : > { %1034 = vmatmul.bf16.gmra.mxu3 %v1443_v8 }
  0xcf   : > { %892 = vmatmul.bf16.gmra.mxu0 %v1447_v17 }
  0xd0   : > { %941 = vmatmul.bf16.gmra.mxu1 %v1451_v18 }
  0xd1   : > { %990 = vmatmul.bf16.gmra.mxu2 %v1455_v19 }
  0xd2   : > { %1039 = vmatmul.bf16.gmra.mxu3 %v1459_v20 }
  0xdf   : > { %897 = vmatmul.bf16.gmra.mxu0 %v1463_v29 }
  0xe0   : > { %946 = vmatmul.bf16.gmra.mxu1 %v1467_v30 }
  0xe1   : > { %995 = vmatmul.bf16.gmra.mxu2 %v1471_v31  ;;  %v396_v31 = vld [vmem:[#allocation2 + $0x8] sm:$0xff] }
  0xe2   : > { %1044 = vmatmul.bf16.gmra.mxu3 %v1475_v32 }
  0xec   : > { %v863_v33 = vpop.f32.mrf.mxu0 }
  0xed   : > { %v912_v34 = vpop.f32.mrf.mxu1 }
  0xee   : > { %v913_v35 = vadd.f32 %v912_v34, %v863_v33 }
  0xf4   : > { %v961_v36 = vpop.f32.mrf.mxu2  ;;  %v865_v39 = vpop.f32.mrf.mxu0 }
  0xf5   : > { %v1010_v37 = vpop.f32.mrf.mxu3  ;;  %v962_v38 = vadd.f32 %v961_v36, %v913_v35  ;;  %v914_v40 = vpop.f32.mrf.mxu1 }
  0xf6   : > { %v915_v44 = vadd.f32 %v914_v40, %v865_v39  ;;  %v397_v40 = vld [vmem:[#allocation2 + $0x48] sm:$0xff] }
  0xf7   : > { %v1011_v42 = vadd.f32 %v1010_v37, %v962_v38 }
  0xf9   : > { %v1050_v43 = vadd.f32 %v1011_v42, %v390_v41 }
  0xfb   : > { %1066 = vst [vmem:[#allocation2 + $0x30] sm:$0xff] %v1050_v43 }
  0xfc   : > { %v963_v45 = vpop.f32.mrf.mxu2  ;;  %v868_v48 = vpop.f32.mrf.mxu0 }
  0xfd   : > { %v1012_v46 = vpop.f32.mrf.mxu3  ;;  %v964_v47 = vadd.f32 %v963_v45, %v915_v44  ;;  %v917_v49 = vpop.f32.mrf.mxu1 }
  0xfe   : > { %v918_v53 = vadd.f32 %v917_v49, %v868_v48  ;;  %v398_v49 = vld [vmem:[#allocation2 + $0x40] sm:$0xff] }
  0xff   : > { %v1013_v51 = vadd.f32 %v1012_v46, %v964_v47 }
 0x101   : > { %v1051_v52 = vadd.f32 %v1013_v51, %v391_v50 }
 0x103   : > { %1067 = vst [vmem:[#allocation2] sm:$0xff] %v1051_v52 }
 0x104   : > { %v966_v54 = vpop.f32.mrf.mxu2  ;;  %v870_v57 = vpop.f32.mrf.mxu0 }
 0x105   : > { %v1015_v55 = vpop.f32.mrf.mxu3  ;;  %v967_v56 = vadd.f32 %v966_v54, %v918_v53  ;;  %v919_v58 = vpop.f32.mrf.mxu1 }
 0x106   : > { %v920_v62 = vadd.f32 %v919_v58, %v870_v57  ;;  %v399_v58 = vld [vmem:[#allocation2 + $0x20] sm:$0xff] }
 0x107   : > { %v1016_v60 = vadd.f32 %v1015_v55, %v967_v56 }
 0x109   : > { %v1052_v61 = vadd.f32 %v1016_v60, %v392_v59 }
 0x10b   : > { %1068 = vst [vmem:[#allocation2 + $0x58] sm:$0xff] %v1052_v61 }
 0x10c   : > { %v968_v63 = vpop.f32.mrf.mxu2  ;;  %v873_v2 = vpop.f32.mrf.mxu0 }
 0x10d   : > { %v1017_v0 = vpop.f32.mrf.mxu3  ;;  %v969_v1 = vadd.f32 %v968_v63, %v920_v62  ;;  %v922_v3 = vpop.f32.mrf.mxu1 }
 0x10e   : > { %v923_v7 = vadd.f32 %v922_v3, %v873_v2  ;;  %v400_v3 = vld [vmem:[#allocation2 + $0x10] sm:$0xff] }
 0x10f   : > { %v1018_v5 = vadd.f32 %v1017_v0, %v969_v1 }
 0x111   : > { %v1053_v6 = vadd.f32 %v1018_v5, %v393_v4 }
 0x113   : > { %1069 = vst [vmem:[#allocation2 + $0x18] sm:$0xff] %v1053_v6 }
 0x114   : > { %v971_v8 = vpop.f32.mrf.mxu2  ;;  %v875_v11 = vpop.f32.mrf.mxu0 }
 0x115   : > { %v1020_v9 = vpop.f32.mrf.mxu3  ;;  %v972_v10 = vadd.f32 %v971_v8, %v923_v7  ;;  %v924_v12 = vpop.f32.mrf.mxu1 }
 0x116   : > { %v925_v16 = vadd.f32 %v924_v12, %v875_v11  ;;  %v401_v12 = vld [vmem:[#allocation2 + $0x38] sm:$0xff] }
 0x117   : > { %v1021_v14 = vadd.f32 %v1020_v9, %v972_v10 }
 0x119   : > { %v1054_v15 = vadd.f32 %v1021_v14, %v394_v13 }
 0x11b   : > { %1070 = vst [vmem:[#allocation2 + $0x50] sm:$0xff] %v1054_v15 }
 0x11c   : > { %v973_v17 = vpop.f32.mrf.mxu2  ;;  %v878_v20 = vpop.f32.mrf.mxu0 }
 0x11d   : > { %v1022_v18 = vpop.f32.mrf.mxu3  ;;  %v974_v19 = vadd.f32 %v973_v17, %v925_v16  ;;  %v927_v21 = vpop.f32.mrf.mxu1 }
 0x11e   : > { %v928_v25 = vadd.f32 %v927_v21, %v878_v20  ;;  %v402_v21 = vld [vmem:[#allocation2 + $0x60] sm:$0xff] }
 0x11f   : > { %v1023_v23 = vadd.f32 %v1022_v18, %v974_v19 }
 0x121   : > { %v1055_v24 = vadd.f32 %v1023_v23, %v395_v22 }
 0x123   : > { %1071 = vst [vmem:[#allocation2 + $0x68] sm:$0xff] %v1055_v24 }
 0x124   : > { %v976_v26 = vpop.f32.mrf.mxu2  ;;  %v880_v29 = vpop.f32.mrf.mxu0 }
 0x125   : > { %v1025_v27 = vpop.f32.mrf.mxu3  ;;  %v977_v28 = vadd.f32 %v976_v26, %v928_v25  ;;  %v929_v30 = vpop.f32.mrf.mxu1 }
 0x126   : > { %v930_v34 = vadd.f32 %v929_v30, %v880_v29 }
 0x127   : > { %v1026_v32 = vadd.f32 %v1025_v27, %v977_v28  ;;  %v403_v28 = vld [vmem:[#allocation2 + $0x70] sm:$0xff] }
 0x129   : > { %v1056_v33 = vadd.f32 %v1026_v32, %v396_v31 }
 0x12b   : > { %1072 = vst [vmem:[#allocation2 + $0x8] sm:$0xff] %v1056_v33 }
 0x12c   : > { %v978_v35 = vpop.f32.mrf.mxu2  ;;  %v883_v38 = vpop.f32.mrf.mxu0 }
 0x12d   : > { %v1027_v36 = vpop.f32.mrf.mxu3  ;;  %v979_v37 = vadd.f32 %v978_v35, %v930_v34  ;;  %v932_v39 = vpop.f32.mrf.mxu1 }
 0x12e   : > { %v933_v43 = vadd.f32 %v932_v39, %v883_v38 }
 0x12f   : > { %v1028_v41 = vadd.f32 %v1027_v36, %v979_v37  ;;  %v404_v37 = vld [vmem:[#allocation2 + $0x78] sm:$0xff] }
 0x131   : > { %v1057_v42 = vadd.f32 %v1028_v41, %v397_v40 }
 0x133   : > { %1073 = vst [vmem:[#allocation2 + $0x48] sm:$0xff] %v1057_v42 }
 0x134   : > { %v981_v44 = vpop.f32.mrf.mxu2  ;;  %v885_v47 = vpop.f32.mrf.mxu0 }
 0x135   : > { %v1030_v45 = vpop.f32.mrf.mxu3  ;;  %v982_v46 = vadd.f32 %v981_v44, %v933_v43  ;;  %v934_v48 = vpop.f32.mrf.mxu1 }
 0x136   : > { %v935_v52 = vadd.f32 %v934_v48, %v885_v47 }
 0x137   : > { %v1031_v50 = vadd.f32 %v1030_v45, %v982_v46  ;;  %v405_v45 = vld [vmem:[#allocation2 + $0x28] sm:$0xff] }
 0x139   : > { %v1058_v51 = vadd.f32 %v1031_v50, %v398_v49 }
 0x13b   : > { %1074 = vst [vmem:[#allocation2 + $0x40] sm:$0xff] %v1058_v51 }
 0x13c   : > { %v983_v53 = vpop.f32.mrf.mxu2  ;;  %v888_v56 = vpop.f32.mrf.mxu0 }
 0x13d   : > { %v1032_v54 = vpop.f32.mrf.mxu3  ;;  %v984_v55 = vadd.f32 %v983_v53, %v935_v52  ;;  %v937_v57 = vpop.f32.mrf.mxu1 }
 0x13e   : > { %v938_v61 = vadd.f32 %v937_v57, %v888_v56 }
 0x13f   : > { %v1033_v59 = vadd.f32 %v1032_v54, %v984_v55 }
 0x141   : > { %v1059_v60 = vadd.f32 %v1033_v59, %v399_v58 }
 0x143   : > { %1075 = vst [vmem:[#allocation2 + $0x20] sm:$0xff] %v1059_v60 }
 0x144   : > { %v986_v62 = vpop.f32.mrf.mxu2  ;;  %v890_v1 = vpop.f32.mrf.mxu0 }
 0x145   : > { %v1035_v63 = vpop.f32.mrf.mxu3  ;;  %v987_v0 = vadd.f32 %v986_v62, %v938_v61  ;;  %v939_v2 = vpop.f32.mrf.mxu1 }
 0x146   : > { %v940_v6 = vadd.f32 %v939_v2, %v890_v1 }
 0x147   : > { %v1036_v4 = vadd.f32 %v1035_v63, %v987_v0 }
 0x149   : > { %v1060_v5 = vadd.f32 %v1036_v4, %v400_v3 }
 0x14b   : > { %1076 = vst [vmem:[#allocation2 + $0x10] sm:$0xff] %v1060_v5 }
 0x14c   : > { %v988_v7 = vpop.f32.mrf.mxu2  ;;  %v893_v10 = vpop.f32.mrf.mxu0 }
 0x14d   : > { %v1037_v8 = vpop.f32.mrf.mxu3  ;;  %v989_v9 = vadd.f32 %v988_v7, %v940_v6  ;;  %v942_v11 = vpop.f32.mrf.mxu1 }
 0x14e   : > { %v943_v15 = vadd.f32 %v942_v11, %v893_v10 }
 0x14f   : > { %v1038_v13 = vadd.f32 %v1037_v8, %v989_v9 }
 0x151   : > { %v1061_v14 = vadd.f32 %v1038_v13, %v401_v12 }
 0x153   : > { %1077 = vst [vmem:[#allocation2 + $0x38] sm:$0xff] %v1061_v14 }
 0x154   : > { %v991_v16 = vpop.f32.mrf.mxu2  ;;  %v895_v19 = vpop.f32.mrf.mxu0 }
 0x155   : > { %v1040_v17 = vpop.f32.mrf.mxu3  ;;  %v992_v18 = vadd.f32 %v991_v16, %v943_v15  ;;  %v944_v20 = vpop.f32.mrf.mxu1 }
 0x156   : > { %v945_v24 = vadd.f32 %v944_v20, %v895_v19 }
 0x157   : > { %v1041_v22 = vadd.f32 %v1040_v17, %v992_v18 }
 0x159   : > { %v1062_v23 = vadd.f32 %v1041_v22, %v402_v21 }
 0x15b   : > { %1078 = vst [vmem:[#allocation2 + $0x60] sm:$0xff] %v1062_v23 }
 0x15c   : > { %v993_v25 = vpop.f32.mrf.mxu2  ;;  %v898_v29 = vpop.f32.mrf.mxu0 }
 0x15d   : > { %v1042_v26 = vpop.f32.mrf.mxu3  ;;  %v994_v27 = vadd.f32 %v993_v25, %v945_v24  ;;  %v947_v30 = vpop.f32.mrf.mxu1 }
 0x15e   : > { %v948_v33 = vadd.f32 %v947_v30, %v898_v29 }
 0x15f   : > { %v1043_v31 = vadd.f32 %v1042_v26, %v994_v27 }
 0x161   : > { %v1063_v32 = vadd.f32 %v1043_v31, %v403_v28 }
 0x163   : > { %1079 = vst [vmem:[#allocation2 + $0x70] sm:$0xff] %v1063_v32 }
 0x164   : > { %v996_v34 = vpop.f32.mrf.mxu2  ;;  %v900_v39 = vpop.f32.mrf.mxu0 }
 0x165   : > { %v1045_v35 = vpop.f32.mrf.mxu3  ;;  %v997_v36 = vadd.f32 %v996_v34, %v948_v33  ;;  %v949_v40 = vpop.f32.mrf.mxu1 }
 0x166   : > { %v950_v42 = vadd.f32 %v949_v40, %v900_v39 }
 0x167   : > { %v1046_v38 = vadd.f32 %v1045_v35, %v997_v36 }
 0x169   : > { %v1064_v41 = vadd.f32 %v1046_v38, %v404_v37 }
 0x16b   : > { %1080 = vst [vmem:[#allocation2 + $0x78] sm:$0xff] %v1064_v41 }
 0x16c   : > { %v998_v43 = vpop.f32.mrf.mxu2 }
 0x16d   : > { %v999_v44 = vadd.f32 %v998_v43, %v950_v42  ;;  %v1047_v46 = vpop.f32.mrf.mxu3 }
 0x16f   : > { %v1048_v47 = vadd.f32 %v1047_v46, %v999_v44  ;;  %1085 = sbr.rel (%p1604_p11) target bundleno = 421 (0x1a5), region = 63 }
 0x171   : > { %v1065_v48 = vadd.f32 %v1048_v47, %v405_v45 }
 0x173   : > { %1081 = vst [vmem:[#allocation2 + $0x28] sm:$0xff] %v1065_v48 }
 0x174   : > { %v1086_v49 = vld [vmem:[#allocation2 + $0x30] sm:$0xff]  ;;  %v2012_v50 = vld [vmem:[%s2101_s2] ss:$0 sm:$0xff]  ;;  %v1088_v52 = vld [vmem:[#allocation2 + $0x58] sm:$0xff] }
 0x175   : > { %v1087_v51 = vld [vmem:[#allocation2] sm:$0xff]  ;;  %v1089_v53 = vld [vmem:[#allocation2 + $0x18] sm:$0xff]  ;;  %v1106_v54 = vadd.f32 %v2012_v50, %v1086_v49  ;;  %v1108_v56 = vadd.f32 %v2012_v50, %v1088_v52  ;;  %v1090_v58 = vld [vmem:[#allocation2 + $0x50] sm:$0xff] }
 0x176   : > { %v1107_v55 = vadd.f32 %v2012_v50, %v1087_v51  ;;  %v1109_v57 = vadd.f32 %v2012_v50, %v1089_v53  ;;  %v1110_v59 = vadd.f32 %v2012_v50, %v1090_v58  ;;  %v1091_v60 = vld [vmem:[#allocation2 + $0x68] sm:$0xff]  ;;  %v1094_v7 = vld [vmem:[#allocation2 + $0x40] sm:$0xff]  ;;  %v1096_v14 = vld [vmem:[#allocation2 + $0x10] sm:$0xff] }
 0x177   : > { %1122 = vst [vmem:[%s2102_s3] sm:$0xff] %v1106_v54  ;;  %v1159_v61 = vmul.f32 %v1106_v54, %v1106_v54  ;;  %v1161_v0 = vmul.f32 %v1108_v56, %v1108_v56  ;;  %v1092_v1 = vld [vmem:[#allocation2 + $0x8] sm:$0xff]  ;;  %v1111_v5 = vadd.f32 %v2012_v50, %v1091_v60  ;;  %v1095_v12 = vld [vmem:[#allocation2 + $0x20] sm:$0xff]  ;;  %v1114_v18 = vadd.f32 %v2012_v50, %v1094_v7  ;;  %v1097_v19 = vld [vmem:[#allocation2 + $0x38] sm:$0xff] }
 0x178   : > { %v1138_v62 = vadd.f32 %v1107_v55, %v1106_v54  ;;  %v1160_v63 = vmul.f32 %v1107_v55, %v1107_v55  ;;  %1123 = vst [vmem:[%s2102_s3 + $0x8] sm:$0xff] %v1107_v55  ;;  %v1162_v4 = vmul.f32 %v1109_v57, %v1109_v57  ;;  %v1093_v6 = vld [vmem:[#allocation2 + $0x48] sm:$0xff]  ;;  %v1163_v10 = vmul.f32 %v1110_v59, %v1110_v59  ;;  %v1098_v21 = vld [vmem:[#allocation2 + $0x60] sm:$0xff]  ;;  %v1099_v26 = vld [vmem:[#allocation2 + $0x70] sm:$0xff] }
 0x179   : > { %1124 = vst [vmem:[%s2102_s3 + $0x10] sm:$0xff] %v1108_v56  ;;  %v1112_v11 = vadd.f32 %v2012_v50, %v1092_v1  ;;  %v1113_v13 = vadd.f32 %v2012_v50, %v1093_v6  ;;  %v1164_v17 = vmul.f32 %v1111_v5, %v1111_v5  ;;  %v1115_v20 = vadd.f32 %v2012_v50, %v1095_v12  ;;  %v1100_v28 = vld [vmem:[#allocation2 + $0x78] sm:$0xff] }
 0x17a   : > { %v1175_v2 = vadd.f32 %v1160_v63, %v1159_v61  ;;  %v1139_v3 = vadd.f32 %v1138_v62, %v1108_v56  ;;  %1125 = vst [vmem:[%s2102_s3 + $0x18] sm:$0xff] %v1109_v57  ;;  %v1116_v25 = vadd.f32 %v2012_v50, %v1096_v14  ;;  %v1117_v27 = vadd.f32 %v2012_v50, %v1097_v19  ;;  %v1101_v33 = vld [vmem:[#allocation2 + $0x28] sm:$0xff] }
 0x17b   : > { %1126 = vst [vmem:[%s2102_s3 + $0x20] sm:$0xff] %v1110_v59  ;;  %v1165_v24 = vmul.f32 %v1112_v11, %v1112_v11  ;;  %v1166_v31 = vmul.f32 %v1113_v13, %v1113_v13  ;;  %v1118_v32 = vadd.f32 %v2012_v50, %v1098_v21  ;;  %v1119_v34 = vadd.f32 %v2012_v50, %v1099_v26 }
 0x17c   : > { %v1176_v8 = vadd.f32 %v1175_v2, %v1161_v0  ;;  %v1140_v9 = vadd.f32 %v1139_v3, %v1109_v57  ;;  %1127 = vst [vmem:[%s2102_s3 + $0x28] sm:$0xff] %v1111_v5  ;;  %v1167_v37 = vmul.f32 %v1114_v18, %v1114_v18  ;;  %v1120_v38 = vadd.f32 %v2012_v50, %v1100_v28 }
 0x17d   : > { %1128 = vst [vmem:[%s2102_s3 + $0x30] sm:$0xff] %v1112_v11  ;;  %v1121_v39 = vadd.f32 %v2012_v50, %v1101_v33  ;;  %v1168_v42 = vmul.f32 %v1115_v20, %v1115_v20  ;;  %v1169_v45 = vmul.f32 %v1116_v25, %v1116_v25  ;;  %v1170_v48 = vmul.f32 %v1117_v27, %v1117_v27 }
 0x17e   : > { %v1177_v15 = vadd.f32 %v1176_v8, %v1162_v4  ;;  %v1141_v16 = vadd.f32 %v1140_v9, %v1110_v59  ;;  %1129 = vst [vmem:[%s2102_s3 + $0x38] sm:$0xff] %v1113_v13  ;;  %v1171_v50 = vmul.f32 %v1118_v32, %v1118_v32  ;;  %v1172_v54 = vmul.f32 %v1119_v34, %v1119_v34 }
 0x17f   : > { %1130 = vst [vmem:[%s2102_s3 + $0x40] sm:$0xff] %v1114_v18  ;;  %v1173_v57 = vmul.f32 %v1120_v38, %v1120_v38  ;;  %v1174_v59 = vmul.f32 %v1121_v39, %v1121_v39 }
 0x180   : > { %v1178_v22 = vadd.f32 %v1177_v15, %v1163_v10  ;;  %v1142_v23 = vadd.f32 %v1141_v16, %v1111_v5  ;;  %1131 = vst [vmem:[%s2102_s3 + $0x48] sm:$0xff] %v1115_v20 }
 0x181   : > { %1132 = vst [vmem:[%s2102_s3 + $0x50] sm:$0xff] %v1116_v25 }
 0x182   : > { %v1179_v29 = vadd.f32 %v1178_v22, %v1164_v17  ;;  %v1143_v30 = vadd.f32 %v1142_v23, %v1112_v11  ;;  %1133 = vst [vmem:[%s2102_s3 + $0x58] sm:$0xff] %v1117_v27 }
 0x183   : > { %1134 = vst [vmem:[%s2102_s3 + $0x60] sm:$0xff] %v1118_v32 }
 0x184   : > { %v1180_v35 = vadd.f32 %v1179_v29, %v1165_v24  ;;  %v1144_v36 = vadd.f32 %v1143_v30, %v1113_v13  ;;  %1135 = vst [vmem:[%s2102_s3 + $0x68] sm:$0xff] %v1119_v34 }
 0x185   : > { %1136 = vst [vmem:[%s2102_s3 + $0x70] sm:$0xff] %v1120_v38 }
 0x186   : > { %v1181_v40 = vadd.f32 %v1180_v35, %v1166_v31  ;;  %v1145_v41 = vadd.f32 %v1144_v36, %v1114_v18  ;;  %1137 = vst [vmem:[%s2102_s3 + $0x78] sm:$0xff] %v1121_v39 }
 0x188   : > { %v1182_v43 = vadd.f32 %v1181_v40, %v1167_v37  ;;  %v1146_v44 = vadd.f32 %v1145_v41, %v1115_v20 }
 0x18a   : > { %v1183_v46 = vadd.f32 %v1182_v43, %v1168_v42  ;;  %v1147_v47 = vadd.f32 %v1146_v44, %v1116_v25 }
 0x18c   : > { %v1184_v49 = vadd.f32 %v1183_v46, %v1169_v45  ;;  %v1148_v51 = vadd.f32 %v1147_v47, %v1117_v27 }
 0x18e   : > { %v1185_v52 = vadd.f32 %v1184_v49, %v1170_v48  ;;  %v1149_v53 = vadd.f32 %v1148_v51, %v1118_v32 }
 0x190   : > { %v1186_v55 = vadd.f32 %v1185_v52, %v1171_v50  ;;  %v1150_v56 = vadd.f32 %v1149_v53, %v1119_v34 }
 0x192   : > { %v1151_v58 = vadd.f32 %v1150_v56, %v1120_v38  ;;  %v1187_v60 = vadd.f32 %v1186_v55, %v1172_v54 }
 0x194   : > { %v1152_v61 = vadd.f32 %v1151_v58, %v1121_v39  ;;  %v1188_v62 = vadd.f32 %v1187_v60, %v1173_v57 }
 0x196   : > { %v1153_v63 = vrot.slane %v1152_v61, 4  ;;  %v1189_v0 = vadd.f32 %v1188_v62, %v1174_v59 }
 0x198   : > { %v1154_v1 = vadd.f32 %v1153_v63, %v1152_v61  ;;  %v1190_v2 = vrot.slane %v1189_v0, 4 }
 0x19a   : > { %v1155_v3 = vrot.slane %v1154_v1, 2  ;;  %v1191_v4 = vadd.f32 %v1190_v2, %v1189_v0 }
 0x19c   : > { %v1156_v5 = vadd.f32 %v1155_v3, %v1154_v1  ;;  %v1192_v6 = vrot.slane %v1191_v4, 2 }
 0x19e   : > { %v1157_v7 = vrot.slane %v1156_v5, 1  ;;  %v1193_v8 = vadd.f32 %v1192_v6, %v1191_v4 }
 0x1a0   : > { %v1158_v9 = vadd.f32 %v1157_v7, %v1156_v5  ;;  %v1194_v10 = vrot.slane %v1193_v8, 1 }
 0x1a2   : > { %1196 = vst [vmem:[%s2103_s4] sm:$0xff] %v1158_v9  ;;  %v1195_v11 = vadd.f32 %v1194_v10, %v1193_v8 }
 0x1a4   : > { %1197 = vst [vmem:[%s2104_s5] sm:$0xff] %v1195_v11 }
 0x1a5 PF: > { %s16_s22 = sadd.s32 1, %s1756_s22   ;;  %s2105_s18 = smov %s1744_s19 }
 0x1a6   : > { %p13_p12 = scmp.ge.s32.totalorder %s16_s22, 4   ;;  %s2106_s19 = smov %s1824_s26 }
 0x1a7   : > { %s2107_s20 = smov %s1752_s21  ;;  %s2108_s21 = smov %s2110_s23 }
 0x1a8   :  { %15 = sbr.rel (!%p13_p12) target bundleno = 3 (0x3), region = 125 }

// kernel: discriminator_forward.12
= control target key start
LH: loop header
LB: loop body
LE: loop exit
PB: predicated region body
PF: predicated region fallthrough
CT: control target
= control target key end

     0   :  { %s160_s0 = inlined_call_operand.vmem [shape: f32[32,256], index: 0, kind: input, shape index: {}]   ;;  %s161_s1 = inlined_call_operand.vmem [shape: f32[1,256], index: 1, kind: input, shape index: {}]   ;;  %s162_s2 = inlined_call_operand.vmem [shape: f32[1,256], index: 2, kind: input, shape index: {}]   ;;  %s163_s3 = inlined_call_operand.vmem [shape: f32[32,256], index: 3, kind: output, shape index: {}]  }
   0x1   :  { %v14_v0 = vld [vmem:[%s160_s0] sm:$0xff]  ;;  %v15_v5 = vld [vmem:[%s160_s0 + $0x8] sm:$0xff]  ;;  %v16_v8 = vld [vmem:[%s160_s0 + $0x10] sm:$0xff] }
   0x2   :  { %v22_v1 = vld [vmem:[%s161_s1] sm:$0x3]  ;;  %v17_v9 = vld [vmem:[%s160_s0 + $0x18] sm:$0xff]  ;;  %v19_v11 = vld [vmem:[%s160_s0 + $0x28] sm:$0xff] }
   0x3   :  { %v36_v2 = vld [vmem:[%s162_s2] sm:$0x3]  ;;  %v24_v3 = vperm.slane %v22_v1, 0  ;;  %v25_v6 = vperm.slane %v22_v1, 1  ;;  %v20_v16 = vld [vmem:[%s160_s0 + $0x30] sm:$0xff]  ;;  %v21_v17 = vld [vmem:[%s160_s0 + $0x38] sm:$0xff] }
   0x4   :  { %v38_v4 = vperm.slane %v36_v2, 0  ;;  %v39_v7 = vperm.slane %v36_v2, 1  ;;  %v18_v10 = vld [vmem:[%s160_s0 + $0x20] sm:$0xff] }
   0x5   :  { %v28_v12 = vmul.f32 %v24_v3, %v14_v0  ;;  %v29_v13 = vmul.f32 %v25_v6, %v15_v5  ;;  %v30_v14 = vmul.f32 %v24_v3, %v16_v8  ;;  %v31_v15 = vmul.f32 %v25_v6, %v17_v9 }
   0x6   :  { %v32_v18 = vmul.f32 %v24_v3, %v18_v10  ;;  %v33_v19 = vmul.f32 %v25_v6, %v19_v11  ;;  %v34_v20 = vmul.f32 %v24_v3, %v20_v16  ;;  %v35_v21 = vmul.f32 %v25_v6, %v21_v17 }
   0x7   :  { %v42_v22 = vadd.f32 %v38_v4, %v28_v12  ;;  %v43_v23 = vadd.f32 %v39_v7, %v29_v13  ;;  %v44_v24 = vadd.f32 %v38_v4, %v30_v14  ;;  %v45_v25 = vadd.f32 %v39_v7, %v31_v15 }
   0x8   :  { %v46_v26 = vadd.f32 %v38_v4, %v32_v18  ;;  %v47_v27 = vadd.f32 %v39_v7, %v33_v19  ;;  %v48_v28 = vadd.f32 %v38_v4, %v34_v20  ;;  %v49_v29 = vadd.f32 %v39_v7, %v35_v21 }
   0x9   :  { %vm50_vm0 = vcmp.gt.f32.partialorder %v42_v22, 0.0  ;;  %v58_v30 = vmul.f32 0.2, %v42_v22  ;;  %vm51_vm1 = vcmp.gt.f32.partialorder %v43_v23, 0.0  ;;  %v59_v31 = vmul.f32 0.2, %v43_v23 }
   0xa   :  { %vm52_vm2 = vcmp.gt.f32.partialorder %v44_v24, 0.0  ;;  %v60_v32 = vmul.f32 0.2, %v44_v24  ;;  %vm53_vm3 = vcmp.gt.f32.partialorder %v45_v25, 0.0  ;;  %v61_v33 = vmul.f32 0.2, %v45_v25 }
   0xb   :  { %v66_v34 = vsel %vm50_vm0, %v42_v22, %v58_v30  ;;  %v67_v35 = vsel %vm51_vm1, %v43_v23, %v59_v31  ;;  %vm54_vm4 = vcmp.gt.f32.partialorder %v46_v26, 0.0  ;;  %v62_v36 = vmul.f32 0.2, %v46_v26 }
   0xc   :  { %74 = vst [vmem:[%s163_s3] sm:$0xff] %v66_v34  ;;  %v68_v37 = vsel %vm52_vm2, %v44_v24, %v60_v32  ;;  %v69_v38 = vsel %vm53_vm3, %v45_v25, %v61_v33  ;;  %vm55_vm5 = vcmp.gt.f32.partialorder %v47_v27, 0.0  ;;  %v63_v39 = vmul.f32 0.2, %v47_v27 }
   0xd   :  { %75 = vst [vmem:[%s163_s3 + $0x8] sm:$0xff] %v67_v35  ;;  %v70_v40 = vsel %vm54_vm4, %v46_v26, %v62_v36  ;;  %vm56_vm6 = vcmp.gt.f32.partialorder %v48_v28, 0.0  ;;  %v64_v41 = vmul.f32 0.2, %v48_v28  ;;  %vm57_vm7 = vcmp.gt.f32.partialorder %v49_v29, 0.0 }
   0xe   :  { %76 = vst [vmem:[%s163_s3 + $0x10] sm:$0xff] %v68_v37  ;;  %v71_v42 = vsel %vm55_vm5, %v47_v27, %v63_v39  ;;  %v65_v43 = vmul.f32 0.2, %v49_v29 }
   0xf   :  { %77 = vst [vmem:[%s163_s3 + $0x18] sm:$0xff] %v69_v38  ;;  %v72_v44 = vsel %vm56_vm6, %v48_v28, %v64_v41 }
  0x10   :  { %78 = vst [vmem:[%s163_s3 + $0x20] sm:$0xff] %v70_v40  ;;  %v73_v45 = vsel %vm57_vm7, %v49_v29, %v65_v43 }
  0x11   :  { %79 = vst [vmem:[%s163_s3 + $0x28] sm:$0xff] %v71_v42 }
  0x12   :  { %80 = vst [vmem:[%s163_s3 + $0x30] sm:$0xff] %v72_v44 }
  0x13   :  { %81 = vst [vmem:[%s163_s3 + $0x38] sm:$0xff] %v73_v45 }

// kernel: discriminator_forward.11
= control target key start
LH: loop header
LB: loop body
LE: loop exit
PB: predicated region body
PF: predicated region fallthrough
CT: control target
= control target key end

     0   :  { %s1671_s18 = smov 0   ;;  %s1673_s19 = smov 0   ;;  %s1953_s0 = inlined_call_operand.vmem [shape: bf16[32,2048], index: 0, kind: input, shape index: {}]   ;;  %s1954_s1 = inlined_call_operand.vmem [shape: bf16[2048,256], index: 1, kind: input, shape index: {}]   ;;  %s1955_s2 = inlined_call_operand.vmem [shape: f32[1,256], index: 2, kind: input, shape index: {}]   ;;  %s1956_s3 = inlined_call_operand.vmem [shape: f32[32,256], index: 3, kind: output, shape index: {0}]   ;;  %s1957_s4 = inlined_call_operand.vmem [shape: f32[1,8,256], index: 4, kind: output, shape index: {1}]   ;;  %s1958_s5 = inlined_call_operand.vmem [shape: f32[1,8,256], index: 5, kind: output, shape index: {2}]  }
   0x1   :  { %s1675_s20 = smov 0   ;;  %s1677_s21 = smov 0  }
   0x2   :  { %s1679_s22 = smov 0  }
   0x3 LB: > { %s25_s23 = sadd.s32 1, %s1634_s21  ;;  %p44_p1 = scmp.ne.s32.totalorder %s1626_s19, %s1622_s18  ;;  %s1638_s22 = sphi %s1679_s22, %s16_s22   ;;  %s1634_s21 = sphi %s1677_s21, %s1962_s21   ;;  %s1630_s20 = sphi %s1675_s20, %s1961_s20   ;;  %s1626_s19 = sphi %s1673_s19, %s1960_s19   ;;  %s1622_s18 = sphi %s1671_s18, %s1959_s18  }
   0x4   : > { %p26_p0 = scmp.ge.s32.totalorder %s25_s23, 4  ;;  %p45_p2 = scmp.eq.s32.totalorder %s1638_s22, 0 }
   0x5   : > { %s37_s25 = sadd.s32 1, %s1626_s19  ;;  %p1180_p5 = scmp.ge.s32.totalorder %s1638_s22, 4 }
   0x6   : > { %s1964_s23 = smov (%p26_p0, %s25_s23), 0  ;;  %p46_p3 = por %p45_p2, %p44_p1 }
   0x7   : > { %s33_s24 = ssub.s32 %s1634_s21, %s1964_s23  ;;  %198 = sbr.rel (%p1180_p5) target bundleno = 24 (0x18), region = 20 }
   0x8   : > { %p35_p4 = scmp.eq.s32.totalorder %s33_s24, 0 }
   0xa   : > { %s1706_s26 = scalar_select %p35_p4, %s1626_s19, %s37_s25  }
   0xc   : > { %201 = sbr.rel (!%p46_p3) target bundleno = 24 (0x18), region = 24  ;;  %s203_s27 = sand.u32 (%p46_p3), 1, %s1626_s19  }
   0xd   : > { %s1485_s28 = sshll.u32 (%p46_p3), %s1634_s21, 4  ;;  %s1181_s29 = sshll.u32 (%p46_p3), %s203_s27, 6 }
   0xe   : > { %s211_s7 = scalar_lea.vmem (%p46_p3), %s1953_s0, %s1485_s28  ;;  %s205_s8 = scalar_lea.vmem (%p46_p3), [#allocation3], %s1181_s29 }
   0xf   : > { %v224_v0 = vld [vmem:[%s211_s7] sm:$0xff] (%p46_p3)  ;;  %v226_v1 = vld [vmem:[%s211_s7 + $0x8] sm:$0xff] (%p46_p3) }
  0x10   : > { %v228_v2 = vld [vmem:[%s211_s7 + $0x40] sm:$0xff] (%p46_p3)  ;;  %225 = vst [vmem:[%s205_s8] sm:$0xff] (%p46_p3), %v224_v0  ;;  %v230_v3 = vld [vmem:[%s211_s7 + $0x48] sm:$0xff] (%p46_p3) }
  0x11   : > { %227 = vst [vmem:[%s205_s8 + $0x8] sm:$0xff] %v226_v1  ;;  %v232_v4 = vld [vmem:[%s211_s7 + $0x80] sm:$0xff]  ;;  %v234_v5 = vld [vmem:[%s211_s7 + $0x88] sm:$0xff] }
  0x12   : > { %229 = vst [vmem:[%s205_s8 + $0x10] sm:$0xff] %v228_v2  ;;  %v236_v6 = vld [vmem:[%s211_s7 + $0xc0] sm:$0xff]  ;;  %v238_v7 = vld [vmem:[%s211_s7 + $0xc8] sm:$0xff] }
  0x13   : > { %231 = vst [vmem:[%s205_s8 + $0x18] sm:$0xff] %v230_v3 }
  0x14   : > { %233 = vst [vmem:[%s205_s8 + $0x20] sm:$0xff] %v232_v4 }
  0x15   : > { %235 = vst [vmem:[%s205_s8 + $0x28] sm:$0xff] %v234_v5 }
  0x16   : > { %237 = vst [vmem:[%s205_s8 + $0x30] sm:$0xff] %v236_v6 }
  0x17   : > { %239 = vst [vmem:[%s205_s8 + $0x38] sm:$0xff] %v238_v7 }
  0x18 PF: > { %p1184_p6 = scmp.ge.s32.totalorder %s1638_s22, 1  ;;  %p254_p7 = scmp.lt.s32.totalorder %s1638_s22, 5 }
  0x1a   : > { %p255_p8 = pnand %p1184_p6, %p254_p7 }
  0x1b   : > { %s261_s9 = sand.u32 (!%p255_p8), 1, %s1622_s18   ;;  %s1186_s10 = sshll.u32 (!%p255_p8), %s1630_s20, 6 }
  0x1c   : > { %258 = sbr.rel (%p255_p8) target bundleno = 305 (0x131), region = 51  ;;  %s1185_s11 = sshll.u32 (!%p255_p8), %s261_s9, 6 }
  0x1d   : > { %p308_p9 = scmp.lt.s32.totalorder (!%p255_p8), %s1186_s10, 255  ;;  %s1723_s16 = scalar_lea.vmem (!%p255_p8), [#allocation3], %s1185_s11 }
  0x1e   : > { %p1189_p10 = scmp.ne.s32.totalorder (!%p255_p8), %s1630_s20, 0 }
  0x21   : > { %s1966_s10 = smov (!%p308_p9, %s1186_s10), 255  ;;  %334 = sbr.rel (%p1189_p10) target bundleno = 47 (0x2f), region = 59 }
  0x22   : > { %s1486_s12 = sshll.u32 %s1966_s10, 3 }
  0x23   : > { %s1721_s15 = scalar_lea.vmem %s1954_s1, %s1486_s12 }
  0x26   : > { %v1640_v8 = vmov 0.0  }
  0x27   : > { %335 = vst [vmem:[#allocation2 + $0x30] sm:$0xff] %v1640_v8 }
  0x28   : > { %336 = vst [vmem:[#allocation2] sm:$0xff] %v1640_v8 }
  0x29   : > { %337 = vst [vmem:[#allocation2 + $0x18] sm:$0xff] %v1640_v8 }
  0x2a   : > { %338 = vst [vmem:[#allocation2 + $0x10] sm:$0xff] %v1640_v8 }
  0x2b   : > { %339 = vst [vmem:[#allocation2 + $0x8] sm:$0xff] %v1640_v8 }
  0x2c   : > { %340 = vst [vmem:[#allocation2 + $0x20] sm:$0xff] %v1640_v8 }
  0x2d   : > { %341 = vst [vmem:[#allocation2 + $0x28] sm:$0xff] %v1640_v8 }
  0x2e   : > { %342 = vst [vmem:[#allocation2 + $0x38] sm:$0xff] %v1640_v8 }
  0x2f PF: > { %v1280_v9 = vld [vmem:[%s1721_s15 + $0x70] sm:$0xf]  ;;  %v1510_v10 = vld [vmem:[%s1721_s15 + $0x74] sm:$0xf0]  ;;  %v1272_v20 = vld [vmem:[%s1721_s15 + $0x60] sm:$0xf] }
  0x30   : > { %v1344_v11 = vld [vmem:[%s1721_s15 + $0xf0] sm:$0xf]  ;;  %v1281_v12 = vor.u32 %v1510_v10, %v1280_v9  ;;  %v1526_v13 = vld [vmem:[%s1721_s15 + $0xf4] sm:$0xf0]  ;;  %v1508_v22 = vld [vmem:[%s1721_s15 + $0x64] sm:$0xf0] }
  0x31   : > { %v1408_v14 = vld [vmem:[%s1721_s15 + $0x170] sm:$0xf]  ;;  %v1542_v15 = vld [vmem:[%s1721_s15 + $0x174] sm:$0xf0]  ;;  %v1345_v16 = vor.u32 %v1526_v13, %v1344_v11  ;;  %v1336_v23 = vld [vmem:[%s1721_s15 + $0xe0] sm:$0xf]  ;;  %v1273_v25 = vor.u32 %v1508_v22, %v1272_v20 }
  0x32   : > { %v1409_v17 = vor.u32 %v1542_v15, %v1408_v14  ;;  %v1472_v18 = vld [vmem:[%s1721_s15 + $0x1f0] sm:$0xf]  ;;  %v1558_v19 = vld [vmem:[%s1721_s15 + $0x1f4] sm:$0xf0]  ;;  %783 = vmatpush.bf16.msra.mxu0 %v1281_v12  ;;  %v1524_v24 = vld [vmem:[%s1721_s15 + $0xe4] sm:$0xf0] }
  0x33   : > { %v1473_v21 = vor.u32 %v1558_v19, %v1472_v18  ;;  %802 = vmatpush.bf16.msra.mxu1 %v1345_v16  ;;  %v1337_v26 = vor.u32 %v1524_v24, %v1336_v23  ;;  %v1400_v27 = vld [vmem:[%s1721_s15 + $0x160] sm:$0xf]  ;;  %v1540_v28 = vld [vmem:[%s1721_s15 + $0x164] sm:$0xf0]  ;;  %v1264_v32 = vld [vmem:[%s1721_s15 + $0x50] sm:$0xf] }
  0x34   : > { %821 = vmatpush.bf16.msra.mxu2 %v1409_v17  ;;  %v1464_v29 = vld [vmem:[%s1721_s15 + $0x1e0] sm:$0xf]  ;;  %v1401_v30 = vor.u32 %v1540_v28, %v1400_v27  ;;  %v1556_v31 = vld [vmem:[%s1721_s15 + $0x1e4] sm:$0xf0]  ;;  %v1506_v33 = vld [vmem:[%s1721_s15 + $0x54] sm:$0xf0] }
  0x35   : > { %840 = vmatpush.bf16.msra.mxu3 %v1473_v21  ;;  %v1465_v34 = vor.u32 %v1556_v31, %v1464_v29  ;;  %v1328_v35 = vld [vmem:[%s1721_s15 + $0xd0] sm:$0xf]  ;;  %v1522_v36 = vld [vmem:[%s1721_s15 + $0xd4] sm:$0xf0]  ;;  %v1265_v38 = vor.u32 %v1506_v33, %v1264_v32  ;;  %v1256_v44 = vld [vmem:[%s1721_s15 + $0x40] sm:$0xf] }
  0x36   : > { %v1392_v37 = vld [vmem:[%s1721_s15 + $0x150] sm:$0xf]  ;;  %784 = vmatpush.bf16.msra.mxu0 %v1273_v25  ;;  %v1538_v39 = vld [vmem:[%s1721_s15 + $0x154] sm:$0xf0]  ;;  %v1329_v42 = vor.u32 %v1522_v36, %v1328_v35  ;;  %v1504_v45 = vld [vmem:[%s1721_s15 + $0x44] sm:$0xf0] }
  0x37   : > { %v1456_v40 = vld [vmem:[%s1721_s15 + $0x1d0] sm:$0xf]  ;;  %v1554_v41 = vld [vmem:[%s1721_s15 + $0x1d4] sm:$0xf0]  ;;  %803 = vmatpush.bf16.msra.mxu1 %v1337_v26  ;;  %v1393_v43 = vor.u32 %v1538_v39, %v1392_v37  ;;  %v1320_v46 = vld [vmem:[%s1721_s15 + $0xc0] sm:$0xf]  ;;  %v1257_v53 = vor.u32 %v1504_v45, %v1256_v44 }
  0x38   : > { %822 = vmatpush.bf16.msra.mxu2 %v1401_v30  ;;  %v1457_v47 = vor.u32 %v1554_v41, %v1456_v40  ;;  %v1520_v48 = vld [vmem:[%s1721_s15 + $0xc4] sm:$0xf0]  ;;  %v1384_v49 = vld [vmem:[%s1721_s15 + $0x140] sm:$0xf]  ;;  %v1248_v56 = vld [vmem:[%s1721_s15 + $0x30] sm:$0xf] }
  0x39   : > { %841 = vmatpush.bf16.msra.mxu3 %v1465_v34  ;;  %v1536_v50 = vld [vmem:[%s1721_s15 + $0x144] sm:$0xf0]  ;;  %v1448_v51 = vld [vmem:[%s1721_s15 + $0x1c0] sm:$0xf]  ;;  %v1321_v54 = vor.u32 %v1520_v48, %v1320_v46  ;;  %v1502_v57 = vld [vmem:[%s1721_s15 + $0x34] sm:$0xf0] }
  0x3a   : > { %v1552_v52 = vld [vmem:[%s1721_s15 + $0x1c4] sm:$0xf0]  ;;  %785 = vmatpush.bf16.msra.mxu0 %v1265_v38  ;;  %v1385_v55 = vor.u32 %v1536_v50, %v1384_v49  ;;  %v1312_v58 = vld [vmem:[%s1721_s15 + $0xb0] sm:$0xf]  ;;  %v1518_v60 = vld [vmem:[%s1721_s15 + $0xb4] sm:$0xf0]  ;;  %v1249_v1 = vor.u32 %v1502_v57, %v1248_v56 }
  0x3b   : > { %804 = vmatpush.bf16.msra.mxu1 %v1329_v42  ;;  %v1449_v59 = vor.u32 %v1552_v52, %v1448_v51  ;;  %v1376_v61 = vld [vmem:[%s1721_s15 + $0x130] sm:$0xf]  ;;  %v1534_v62 = vld [vmem:[%s1721_s15 + $0x134] sm:$0xf0]  ;;  %v1313_v2 = vor.u32 %v1518_v60, %v1312_v58  ;;  %v1240_v4 = vld [vmem:[%s1721_s15 + $0x20] sm:$0xf] }
  0x3c   : > { %823 = vmatpush.bf16.msra.mxu2 %v1393_v43  ;;  %v1440_v63 = vld [vmem:[%s1721_s15 + $0x1b0] sm:$0xf]  ;;  %v1550_v0 = vld [vmem:[%s1721_s15 + $0x1b4] sm:$0xf0]  ;;  %v1377_v3 = vor.u32 %v1534_v62, %v1376_v61  ;;  %v1500_v5 = vld [vmem:[%s1721_s15 + $0x24] sm:$0xf0] }
  0x3d   : > { %842 = vmatpush.bf16.msra.mxu3 %v1457_v47  ;;  %v1304_v6 = vld [vmem:[%s1721_s15 + $0xa0] sm:$0xf]  ;;  %v1441_v7 = vor.u32 %v1550_v0, %v1440_v63  ;;  %v1516_v8 = vld [vmem:[%s1721_s15 + $0xa4] sm:$0xf0]  ;;  %v1241_v13 = vor.u32 %v1500_v5, %v1240_v4  ;;  %v1232_v16 = vld [vmem:[%s1721_s15 + $0x10] sm:$0xf] }
  0x3e   : > { %786 = vmatpush.bf16.msra.mxu0 %v1257_v53  ;;  %v1368_v9 = vld [vmem:[%s1721_s15 + $0x120] sm:$0xf]  ;;  %v1532_v10 = vld [vmem:[%s1721_s15 + $0x124] sm:$0xf0]  ;;  %v1305_v14 = vor.u32 %v1516_v8, %v1304_v6  ;;  %v1498_v17 = vld [vmem:[%s1721_s15 + $0x14] sm:$0xf0] }
  0x3f   : > { %805 = vmatpush.bf16.msra.mxu1 %v1321_v54  ;;  %v1432_v11 = vld [vmem:[%s1721_s15 + $0x1a0] sm:$0xf]  ;;  %v1548_v12 = vld [vmem:[%s1721_s15 + $0x1a4] sm:$0xf0]  ;;  %v1369_v15 = vor.u32 %v1532_v10, %v1368_v9  ;;  %v1296_v18 = vld [vmem:[%s1721_s15 + $0x90] sm:$0xf]  ;;  %v1233_v26 = vor.u32 %v1498_v17, %v1232_v16 }
  0x40   : > { %824 = vmatpush.bf16.msra.mxu2 %v1385_v55  ;;  %v1433_v19 = vor.u32 %v1548_v12, %v1432_v11  ;;  %v1514_v20 = vld [vmem:[%s1721_s15 + $0x94] sm:$0xf0]  ;;  %v1360_v21 = vld [vmem:[%s1721_s15 + $0x110] sm:$0xf]  ;;  %v1224_v25 = vld [vmem:[%s1721_s15] sm:$0xf] }
  0x41   : > { %843 = vmatpush.bf16.msra.mxu3 %v1449_v59  ;;  %v1530_v22 = vld [vmem:[%s1721_s15 + $0x114] sm:$0xf0]  ;;  %v1424_v23 = vld [vmem:[%s1721_s15 + $0x190] sm:$0xf]  ;;  %v1496_v27 = vld [vmem:[%s1721_s15 + $0x4] sm:$0xf0]  ;;  %v1297_v30 = vor.u32 %v1514_v20, %v1296_v18 }
  0x42   : > { %787 = vmatpush.bf16.msra.mxu0 %v1249_v1  ;;  %v1546_v24 = vld [vmem:[%s1721_s15 + $0x194] sm:$0xf0]  ;;  %v1288_v28 = vld [vmem:[%s1721_s15 + $0x80] sm:$0xf]  ;;  %v1512_v29 = vld [vmem:[%s1721_s15 + $0x84] sm:$0xf0]  ;;  %v1361_v31 = vor.u32 %v1530_v22, %v1360_v21  ;;  %v1225_v43 = vor.u32 %v1496_v27, %v1224_v25 }
  0x43   : > { %806 = vmatpush.bf16.msra.mxu1 %v1313_v2  ;;  %v1352_v32 = vld [vmem:[%s1721_s15 + $0x100] sm:$0xf]  ;;  %v1528_v33 = vld [vmem:[%s1721_s15 + $0x104] sm:$0xf0]  ;;  %v1425_v35 = vor.u32 %v1546_v24, %v1424_v23  ;;  %v1489_v38 = vld [vmem:[%s1723_s16 + $0xc] sm:$0xf0]  ;;  %v1289_v47 = vor.u32 %v1512_v29, %v1288_v28 }
  0x44   : > { %825 = vmatpush.bf16.msra.mxu2 %v1377_v3  ;;  %v1416_v34 = vld [vmem:[%s1721_s15 + $0x180] sm:$0xf]  ;;  %v1544_v36 = vld [vmem:[%s1721_s15 + $0x184] sm:$0xf0]  ;;  %v1487_v39 = vld [vmem:[%s1723_s16 + $0x4] sm:$0xf]  ;;  %v1353_v48 = vor.u32 %v1528_v33, %v1352_v32 }
  0x45   : > { %844 = vmatpush.bf16.msra.mxu3 %v1441_v7  ;;  %v1192_v37 = vld [vmem:[%s1723_s16] sm:$0xf]  ;;  %v1194_v40 = vld [vmem:[%s1723_s16 + $0x10] sm:$0xf0]  ;;  %v1410_v42 = vld [vmem:[%s1721_s15 + $0x178] sm:$0xf0]  ;;  %v1417_v52 = vor.u32 %v1544_v36, %v1416_v34 }
  0x46   : > { %788 = vmatpush.bf16.msra.mxu0 %v1241_v13  ;;  %v1541_v41 = vld [vmem:[%s1721_s15 + $0x174] sm:$0xf]  ;;  %v1200_v44 = vld [vmem:[%s1723_s16 + $0x8] sm:$0xf]  ;;  %v1346_v46 = vld [vmem:[%s1721_s15 + $0xf8] sm:$0xf0]  ;;  %v1805_v57 = vor.u32 %v1489_v38, %v1192_v37  ;;  %v1810_v62 = vor.u32 %v1487_v39, %v1194_v40 }
  0x47   : > { %807 = vmatpush.bf16.msra.mxu1 %v1305_v14  ;;  %v1525_v45 = vld [vmem:[%s1721_s15 + $0xf4] sm:$0xf]  ;;  %v1490_v49 = vld [vmem:[%s1723_s16 + $0x14] sm:$0xf0]  ;;  %v1488_v50 = vld [vmem:[%s1723_s16 + $0xc] sm:$0xf]  ;;  %v1413_v53 = vor.u32 %v1541_v41, %v1410_v42 }
  0x48   : > { %826 = vmatpush.bf16.msra.mxu2 %v1369_v15  ;;  %v1202_v51 = vld [vmem:[%s1723_s16 + $0x18] sm:$0xf0]  ;;  %v1509_v54 = vld [vmem:[%s1721_s15 + $0x74] sm:$0xf]  ;;  %v1349_v58 = vor.u32 %v1525_v45, %v1346_v46  ;;  %v1539_v60 = vld [vmem:[%s1721_s15 + $0x164] sm:$0xf]  ;;  %v1812_v63 = vor.u32 %v1490_v49, %v1200_v44 }
  0x49   : > { %845 = vmatpush.bf16.msra.mxu3 %v1433_v19  ;;  %v1282_v55 = vld [vmem:[%s1721_s15 + $0x78] sm:$0xf0]  ;;  %v1557_v56 = vld [vmem:[%s1721_s15 + $0x1f4] sm:$0xf]  ;;  %v1402_v61 = vld [vmem:[%s1721_s15 + $0x168] sm:$0xf0]  ;;  %v1816_v2 = vor.u32 %v1488_v50, %v1202_v51 }
  0x4a   : > { %789 = vmatpush.bf16.msra.mxu0 %v1233_v26  ;;  %v1474_v59 = vld [vmem:[%s1721_s15 + $0x1f8] sm:$0xf0]  ;;  %v1523_v0 = vld [vmem:[%s1721_s15 + $0xe4] sm:$0xf]  ;;  %v1338_v1 = vld [vmem:[%s1721_s15 + $0xe8] sm:$0xf0]  ;;  %v1285_v3 = vor.u32 %v1509_v54, %v1282_v55  ;;  %v1405_v5 = vor.u32 %v1539_v60, %v1402_v61 }
  0x4b   : > { %808 = vmatpush.bf16.msra.mxu1 %v1297_v30  ;;  %v1477_v4 = vor.u32 %v1557_v56, %v1474_v59  ;;  %v1507_v6 = vld [vmem:[%s1721_s15 + $0x64] sm:$0xf]  ;;  %v1274_v7 = vld [vmem:[%s1721_s15 + $0x68] sm:$0xf0]  ;;  %v1341_v9 = vor.u32 %v1523_v0, %v1338_v1  ;;  %v1537_v11 = vld [vmem:[%s1721_s15 + $0x154] sm:$0xf] }
  0x4c   : > { %827 = vmatpush.bf16.msra.mxu2 %v1361_v31  ;;  %v1555_v8 = vld [vmem:[%s1721_s15 + $0x1e4] sm:$0xf]  ;;  %v1466_v10 = vld [vmem:[%s1721_s15 + $0x1e8] sm:$0xf0]  ;;  %v1394_v12 = vld [vmem:[%s1721_s15 + $0x158] sm:$0xf0]  ;;  %v1277_v15 = vor.u32 %v1507_v6, %v1274_v7 }
  0x4d   : > { %846 = vmatpush.bf16.msra.mxu3 %v1425_v35  ;;  %v1521_v13 = vld [vmem:[%s1721_s15 + $0xd4] sm:$0xf]  ;;  %v1330_v14 = vld [vmem:[%s1721_s15 + $0xd8] sm:$0xf0]  ;;  %v1469_v16 = vor.u32 %v1555_v8, %v1466_v10  ;;  %v1397_v17 = vor.u32 %v1537_v11, %v1394_v12  ;;  %v1535_v23 = vld [vmem:[%s1721_s15 + $0x144] sm:$0xf] }
  0x4e   : > { %790 = vmatpush.bf16.msra.mxu0 %v1225_v43  ;;  %v1505_v18 = vld [vmem:[%s1721_s15 + $0x54] sm:$0xf]  ;;  %v1266_v19 = vld [vmem:[%s1721_s15 + $0x58] sm:$0xf0]  ;;  %v1333_v21 = vor.u32 %v1521_v13, %v1330_v14  ;;  %v1386_v24 = vld [vmem:[%s1721_s15 + $0x148] sm:$0xf0] }
  0x4f   : > { %809 = vmatpush.bf16.msra.mxu1 %v1289_v47  ;;  %v1553_v20 = vld [vmem:[%s1721_s15 + $0x1d4] sm:$0xf]  ;;  %v1458_v22 = vld [vmem:[%s1721_s15 + $0x1d8] sm:$0xf0]  ;;  %v1519_v25 = vld [vmem:[%s1721_s15 + $0xc4] sm:$0xf]  ;;  %v1269_v27 = vor.u32 %v1505_v18, %v1266_v19  ;;  %v1389_v32 = vor.u32 %v1535_v23, %v1386_v24 }
  0x50   : > { %828 = vmatpush.bf16.msra.mxu2 %v1353_v48  ;;  %v1322_v26 = vld [vmem:[%s1721_s15 + $0xc8] sm:$0xf0]  ;;  %v1503_v28 = vld [vmem:[%s1721_s15 + $0x44] sm:$0xf]  ;;  %v1461_v31 = vor.u32 %v1553_v20, %v1458_v22  ;;  %v1208_v34 = vld [vmem:[%s1723_s16 + $0x20] sm:$0xf] }
  0x51   : > { %847 = vmatpush.bf16.msra.mxu3 %v1417_v52  ;;  %791 = vmatmul.bf16.vlgmr.msra.gmra.mxu0 %v1805_v57  ;;  %v1258_v29 = vld [vmem:[%s1721_s15 + $0x48] sm:$0xf0]  ;;  %v1551_v30 = vld [vmem:[%s1721_s15 + $0x1c4] sm:$0xf]  ;;  %v1493_v35 = vld [vmem:[%s1723_s16 + $0x2c] sm:$0xf0]  ;;  %v1325_v36 = vor.u32 %v1519_v25, %v1322_v26 }
  0x52   : > { %810 = vmatmul.bf16.vlgmr.msra.gmra.mxu1 %v1810_v62  ;;  %859 = vmatpush.bf16.msrb.mxu0 %v1285_v3  ;;  %v1450_v33 = vld [vmem:[%s1721_s15 + $0x1c8] sm:$0xf0]  ;;  %v1491_v37 = vld [vmem:[%s1723_s16 + $0x24] sm:$0xf]  ;;  %v1210_v38 = vld [vmem:[%s1723_s16 + $0x30] sm:$0xf0]  ;;  %v1261_v44 = vor.u32 %v1503_v28, %v1258_v29 }
  0x53   : > { %878 = vmatpush.bf16.msrb.mxu1 %v1349_v58  ;;  %829 = vmatmul.bf16.vlgmr.msra.gmra.mxu2 %v1812_v63  ;;  %v1533_v39 = vld [vmem:[%s1721_s15 + $0x134] sm:$0xf]  ;;  %v1378_v40 = vld [vmem:[%s1721_s15 + $0x138] sm:$0xf0]  ;;  %v1216_v41 = vld [vmem:[%s1723_s16 + $0x28] sm:$0xf]  ;;  %v1453_v48 = vor.u32 %v1551_v30, %v1450_v33  ;;  %v1862_v59 = vor.u32 %v1491_v37, %v1210_v38 }
  0x54   : > { %897 = vmatpush.bf16.msrb.mxu2 %v1413_v53  ;;  %848 = vmatmul.bf16.vlgmr.msra.gmra.mxu3 %v1816_v2  ;;  %v1517_v42 = vld [vmem:[%s1721_s15 + $0xb4] sm:$0xf]  ;;  %v1314_v43 = vld [vmem:[%s1721_s15 + $0xb8] sm:$0xf0]  ;;  %v1494_v45 = vld [vmem:[%s1723_s16 + $0x34] sm:$0xf0]  ;;  %v1381_v49 = vor.u32 %v1533_v39, %v1378_v40  ;;  %v1857_v53 = vor.u32 %v1493_v35, %v1208_v34 }
  0x55   : > { %916 = vmatpush.bf16.msrb.mxu3 %v1477_v4  ;;  %v1492_v46 = vld [vmem:[%s1723_s16 + $0x2c] sm:$0xf]  ;;  %v1218_v47 = vld [vmem:[%s1723_s16 + $0x38] sm:$0xf0]  ;;  %v1501_v50 = vld [vmem:[%s1721_s15 + $0x34] sm:$0xf]  ;;  %v1317_v54 = vor.u32 %v1517_v42, %v1314_v43  ;;  %v1864_v60 = vor.u32 %v1494_v45, %v1216_v41 }
  0x56   : > { %860 = vmatpush.bf16.msrb.mxu0 %v1277_v15  ;;  %v1250_v51 = vld [vmem:[%s1721_s15 + $0x38] sm:$0xf0]  ;;  %v1549_v52 = vld [vmem:[%s1721_s15 + $0x1b4] sm:$0xf]  ;;  %v1531_v56 = vld [vmem:[%s1721_s15 + $0x124] sm:$0xf]  ;;  %v1221_v1 = vor.u32 %v1492_v46, %v1218_v47 }
  0x57   : > { %879 = vmatpush.bf16.msrb.mxu1 %v1341_v9  ;;  %v1442_v55 = vld [vmem:[%s1721_s15 + $0x1b8] sm:$0xf0]  ;;  %v1370_v58 = vld [vmem:[%s1721_s15 + $0x128] sm:$0xf0]  ;;  %v1515_v61 = vld [vmem:[%s1721_s15 + $0xa4] sm:$0xf]  ;;  %v1253_v3 = vor.u32 %v1501_v50, %v1250_v51 }
  0x58   : > { %898 = vmatpush.bf16.msrb.mxu2 %v1405_v5  ;;  %v1306_v0 = vld [vmem:[%s1721_s15 + $0xa8] sm:$0xf0]  ;;  %v1445_v4 = vor.u32 %v1549_v52, %v1442_v55  ;;  %v1373_v5 = vor.u32 %v1531_v56, %v1370_v58  ;;  %v1499_v6 = vld [vmem:[%s1721_s15 + $0x24] sm:$0xf]  ;;  %v1529_v11 = vld [vmem:[%s1721_s15 + $0x114] sm:$0xf] }
  0x59   : > { %917 = vmatpush.bf16.msrb.mxu3 %v1469_v16  ;;  %v1242_v7 = vld [vmem:[%s1721_s15 + $0x28] sm:$0xf0]  ;;  %v1547_v8 = vld [vmem:[%s1721_s15 + $0x1a4] sm:$0xf]  ;;  %v1309_v9 = vor.u32 %v1515_v61, %v1306_v0  ;;  %v1362_v12 = vld [vmem:[%s1721_s15 + $0x118] sm:$0xf0] }
  0x5a   : > { %861 = vmatpush.bf16.msrb.mxu0 %v1269_v27  ;;  %v1434_v10 = vld [vmem:[%s1721_s15 + $0x1a8] sm:$0xf0]  ;;  %v1513_v13 = vld [vmem:[%s1721_s15 + $0x94] sm:$0xf]  ;;  %v1298_v14 = vld [vmem:[%s1721_s15 + $0x98] sm:$0xf0]  ;;  %v1245_v15 = vor.u32 %v1499_v6, %v1242_v7 }
  0x5b   : > { %880 = vmatpush.bf16.msrb.mxu1 %v1333_v21  ;;  %v1437_v16 = vor.u32 %v1547_v8, %v1434_v10  ;;  %v1497_v18 = vld [vmem:[%s1721_s15 + $0x14] sm:$0xf]  ;;  %v1234_v19 = vld [vmem:[%s1721_s15 + $0x18] sm:$0xf0]  ;;  %v1301_v21 = vor.u32 %v1513_v13, %v1298_v14  ;;  %v1527_v23 = vld [vmem:[%s1721_s15 + $0x104] sm:$0xf] }
  0x5c   : > { %899 = vmatpush.bf16.msrb.mxu2 %v1397_v17  ;;  %v1365_v17 = vor.u32 %v1529_v11, %v1362_v12  ;;  %v1545_v20 = vld [vmem:[%s1721_s15 + $0x194] sm:$0xf]  ;;  %v1426_v22 = vld [vmem:[%s1721_s15 + $0x198] sm:$0xf0]  ;;  %v1354_v24 = vld [vmem:[%s1721_s15 + $0x108] sm:$0xf0]  ;;  %v1237_v27 = vor.u32 %v1497_v18, %v1234_v19 }
  0x5d   : > { %918 = vmatpush.bf16.msrb.mxu3 %v1461_v31  ;;  %v1511_v25 = vld [vmem:[%s1721_s15 + $0x84] sm:$0xf]  ;;  %v1290_v26 = vld [vmem:[%s1721_s15 + $0x88] sm:$0xf0]  ;;  %v1429_v28 = vor.u32 %v1545_v20, %v1426_v22  ;;  %v1357_v29 = vor.u32 %v1527_v23, %v1354_v24  ;;  %v343_v43 = vld [vmem:[#allocation2 + $0x30] sm:$0xff]  ;;  %p1478_p11 = scmp.ne.s32.totalorder %s1630_s20, 3 }
  0x5e   : > { %862 = vmatpush.bf16.msrb.mxu0 %v1261_v44  ;;  %v1495_v30 = vld [vmem:[%s1721_s15 + $0x4] sm:$0xf]  ;;  %v1226_v31 = vld [vmem:[%s1721_s15 + $0x8] sm:$0xf0]  ;;  %v346_v24 = vld [vmem:[#allocation2 + $0x10] sm:$0xff] }
  0x5f   : > { %881 = vmatpush.bf16.msrb.mxu1 %v1325_v36  ;;  %v1543_v33 = vld [vmem:[%s1721_s15 + $0x184] sm:$0xf]  ;;  %v1418_v34 = vld [vmem:[%s1721_s15 + $0x188] sm:$0xf0]  ;;  %v1229_v35 = vor.u32 %v1495_v30, %v1226_v31 }
  0x60   : > { %900 = vmatpush.bf16.msrb.mxu2 %v1389_v32  ;;  %v1293_v32 = vor.u32 %v1511_v25, %v1290_v26  ;;  %v1421_v36 = vor.u32 %v1543_v33, %v1418_v34  ;;  %v349_v6 = vld [vmem:[#allocation2 + $0x28] sm:$0xff]  ;;  %v348_v33 = vld [vmem:[#allocation2 + $0x20] sm:$0xff] }
  0x61   : > { %919 = vmatpush.bf16.msrb.mxu3 %v1453_v48  ;;  %796 = vmatmul.bf16.gmra.mxu0 %v1857_v53 }
  0x62   : > { %815 = vmatmul.bf16.gmra.mxu1 %v1862_v59  ;;  %863 = vmatpush.bf16.msrb.mxu0 %v1253_v3 }
  0x63   : > { %882 = vmatpush.bf16.msrb.mxu1 %v1317_v54  ;;  %834 = vmatmul.bf16.gmra.mxu2 %v1864_v60 }
  0x64   : > { %901 = vmatpush.bf16.msrb.mxu2 %v1381_v49  ;;  %853 = vmatmul.bf16.gmra.mxu3 %v1221_v1  ;;  %v345_v49 = vld [vmem:[#allocation2 + $0x18] sm:$0xff] }
  0x65   : > { %920 = vmatpush.bf16.msrb.mxu3 %v1445_v4 }
  0x66   : > { %864 = vmatpush.bf16.msrb.mxu0 %v1245_v15 }
  0x67   : > { %883 = vmatpush.bf16.msrb.mxu1 %v1309_v9 }
  0x68   : > { %902 = vmatpush.bf16.msrb.mxu2 %v1373_v5 }
  0x69   : > { %921 = vmatpush.bf16.msrb.mxu3 %v1437_v16 }
  0x6a   : > { %865 = vmatpush.bf16.msrb.mxu0 %v1237_v27 }
  0x6b   : > { %884 = vmatpush.bf16.msrb.mxu1 %v1301_v21 }
  0x6c   : > { %903 = vmatpush.bf16.msrb.mxu2 %v1365_v17  ;;  %v344_v17 = vld [vmem:[#allocation2] sm:$0xff] }
  0x6d   : > { %922 = vmatpush.bf16.msrb.mxu3 %v1429_v28 }
  0x6e   : > { %866 = vmatpush.bf16.msrb.mxu0 %v1229_v35 }
  0x6f   : > { %885 = vmatpush.bf16.msrb.mxu1 %v1293_v32 }
  0x70   : > { %904 = vmatpush.bf16.msrb.mxu2 %v1357_v29 }
  0x71   : > { %923 = vmatpush.bf16.msrb.mxu3 %v1421_v36  ;;  %867 = vmatmul.bf16.vlgmr.msrb.gmra.mxu0 %v1805_v57 }
  0x72   : > { %886 = vmatmul.bf16.vlgmr.msrb.gmra.mxu1 %v1810_v62 }
  0x73   : > { %905 = vmatmul.bf16.vlgmr.msrb.gmra.mxu2 %v1812_v63 }
  0x74   : > { %924 = vmatmul.bf16.vlgmr.msrb.gmra.mxu3 %v1816_v2 }
  0x81   : > { %872 = vmatmul.bf16.gmra.mxu0 %v1857_v53 }
  0x82   : > { %891 = vmatmul.bf16.gmra.mxu1 %v1862_v59  ;;  %v347_v59 = vld [vmem:[#allocation2 + $0x8] sm:$0xff] }
  0x83   : > { %910 = vmatmul.bf16.gmra.mxu2 %v1864_v60 }
  0x84   : > { %929 = vmatmul.bf16.gmra.mxu3 %v1221_v1 }
  0xce   : > { %v792_v37 = vpop.f32.mrf.mxu0 }
  0xcf   : > { %v811_v38 = vpop.f32.mrf.mxu1 }
  0xd0   : > { %v812_v39 = vadd.f32 %v811_v38, %v792_v37 }
  0xd6   : > { %v830_v40 = vpop.f32.mrf.mxu2  ;;  %v794_v57 = vpop.f32.mrf.mxu0 }
  0xd7   : > { %v831_v41 = vadd.f32 %v830_v40, %v812_v39  ;;  %v849_v42 = vpop.f32.mrf.mxu3  ;;  %v813_v62 = vpop.f32.mrf.mxu1 }
  0xd8   : > { %v814_v2 = vadd.f32 %v813_v62, %v794_v57 }
  0xd9   : > { %v850_v44 = vadd.f32 %v849_v42, %v831_v41  ;;  %v350_v41 = vld [vmem:[#allocation2 + $0x38] sm:$0xff] }
  0xdb   : > { %v935_v63 = vadd.f32 %v850_v44, %v343_v43 }
  0xdd   : > { %943 = vst [vmem:[#allocation2 + $0x30] sm:$0xff] %v935_v63 }
  0xde   : > { %v832_v45 = vpop.f32.mrf.mxu2  ;;  %v797_v48 = vpop.f32.mrf.mxu0 }
  0xdf   : > { %v833_v46 = vadd.f32 %v832_v45, %v814_v2  ;;  %v851_v47 = vpop.f32.mrf.mxu3  ;;  %v816_v50 = vpop.f32.mrf.mxu1 }
  0xe0   : > { %v817_v53 = vadd.f32 %v816_v50, %v797_v48 }
  0xe1   : > { %v852_v51 = vadd.f32 %v851_v47, %v833_v46 }
  0xe3   : > { %v937_v52 = vadd.f32 %v852_v51, %v345_v49 }
  0xe5   : > { %945 = vst [vmem:[#allocation2 + $0x18] sm:$0xff] %v937_v52 }
  0xe6   : > { %v835_v54 = vpop.f32.mrf.mxu2  ;;  %v799_v58 = vpop.f32.mrf.mxu0 }
  0xe7   : > { %v836_v55 = vadd.f32 %v835_v54, %v817_v53  ;;  %v854_v56 = vpop.f32.mrf.mxu3  ;;  %v818_v60 = vpop.f32.mrf.mxu1 }
  0xe8   : > { %v819_v1 = vadd.f32 %v818_v60, %v799_v58 }
  0xe9   : > { %v855_v61 = vadd.f32 %v854_v56, %v836_v55 }
  0xeb   : > { %v939_v0 = vadd.f32 %v855_v61, %v347_v59 }
  0xed   : > { %947 = vst [vmem:[#allocation2 + $0x8] sm:$0xff] %v939_v0 }
  0xee   : > { %v837_v3 = vpop.f32.mrf.mxu2  ;;  %v868_v7 = vpop.f32.mrf.mxu0 }
  0xef   : > { %v838_v4 = vadd.f32 %v837_v3, %v819_v1  ;;  %v856_v5 = vpop.f32.mrf.mxu3  ;;  %v887_v8 = vpop.f32.mrf.mxu1 }
  0xf0   : > { %v888_v11 = vadd.f32 %v887_v8, %v868_v7 }
  0xf1   : > { %v857_v9 = vadd.f32 %v856_v5, %v838_v4 }
  0xf3   : > { %v941_v10 = vadd.f32 %v857_v9, %v349_v6 }
  0xf5   : > { %949 = vst [vmem:[#allocation2 + $0x28] sm:$0xff] %v941_v10 }
  0xf6   : > { %v906_v12 = vpop.f32.mrf.mxu2  ;;  %v870_v15 = vpop.f32.mrf.mxu0 }
  0xf7   : > { %v925_v13 = vpop.f32.mrf.mxu3  ;;  %v907_v14 = vadd.f32 %v906_v12, %v888_v11  ;;  %v889_v16 = vpop.f32.mrf.mxu1 }
  0xf8   : > { %v890_v20 = vadd.f32 %v889_v16, %v870_v15 }
  0xf9   : > { %v926_v18 = vadd.f32 %v925_v13, %v907_v14 }
  0xfb   : > { %v936_v19 = vadd.f32 %v926_v18, %v344_v17 }
  0xfd   : > { %944 = vst [vmem:[#allocation2] sm:$0xff] %v936_v19 }
  0xfe   : > { %v908_v21 = vpop.f32.mrf.mxu2  ;;  %v873_v25 = vpop.f32.mrf.mxu0 }
  0xff   : > { %v927_v22 = vpop.f32.mrf.mxu3  ;;  %v909_v23 = vadd.f32 %v908_v21, %v890_v20  ;;  %v892_v26 = vpop.f32.mrf.mxu1 }
 0x100   : > { %v893_v29 = vadd.f32 %v892_v26, %v873_v25 }
 0x101   : > { %v928_v27 = vadd.f32 %v927_v22, %v909_v23 }
 0x103   : > { %v938_v28 = vadd.f32 %v928_v27, %v346_v24 }
 0x105   : > { %946 = vst [vmem:[#allocation2 + $0x10] sm:$0xff] %v938_v28 }
 0x106   : > { %v911_v30 = vpop.f32.mrf.mxu2  ;;  %v875_v35 = vpop.f32.mrf.mxu0 }
 0x107   : > { %v930_v31 = vpop.f32.mrf.mxu3  ;;  %v912_v32 = vadd.f32 %v911_v30, %v893_v29  ;;  %v894_v36 = vpop.f32.mrf.mxu1 }
 0x108   : > { %v895_v38 = vadd.f32 %v894_v36, %v875_v35 }
 0x109   : > { %v931_v34 = vadd.f32 %v930_v31, %v912_v32 }
 0x10b   : > { %v940_v37 = vadd.f32 %v931_v34, %v348_v33 }
 0x10d   : > { %948 = vst [vmem:[#allocation2 + $0x20] sm:$0xff] %v940_v37 }
 0x10e   : > { %v913_v39 = vpop.f32.mrf.mxu2 }
 0x10f   : > { %v914_v40 = vadd.f32 %v913_v39, %v895_v38  ;;  %v932_v42 = vpop.f32.mrf.mxu3 }
 0x111   : > { %v933_v57 = vadd.f32 %v932_v42, %v914_v40  ;;  %954 = sbr.rel (%p1478_p11) target bundleno = 305 (0x131), region = 63 }
 0x113   : > { %v942_v43 = vadd.f32 %v933_v57, %v350_v41 }
 0x115   : > { %950 = vst [vmem:[#allocation2 + $0x38] sm:$0xff] %v942_v43 }
 0x116   : > { %v955_v62 = vld [vmem:[#allocation2 + $0x30] sm:$0xff]  ;;  %v963_v44 = vld [vmem:[%s1955_s2] sm:$0x3]  ;;  %v957_v46 = vld [vmem:[#allocation2 + $0x18] sm:$0xff] }
 0x117   : > { %v956_v63 = vld [vmem:[#allocation2] sm:$0xff]  ;;  %v965_v2 = vperm.slane %v963_v44, 0  ;;  %v966_v45 = vperm.slane %v963_v44, 1  ;;  %v958_v47 = vld [vmem:[#allocation2 + $0x10] sm:$0xff]  ;;  %v959_v48 = vld [vmem:[#allocation2 + $0x8] sm:$0xff] }
 0x118   : > { %v960_v49 = vld [vmem:[#allocation2 + $0x20] sm:$0xff]  ;;  %v961_v50 = vld [vmem:[#allocation2 + $0x28] sm:$0xff] }
 0x119   : > { %v969_v52 = vadd.f32 %v965_v2, %v955_v62  ;;  %v970_v53 = vadd.f32 %v966_v45, %v956_v63  ;;  %v971_v54 = vadd.f32 %v965_v2, %v957_v46  ;;  %v972_v55 = vadd.f32 %v966_v45, %v958_v47 }
 0x11a   : > { %v973_v56 = vadd.f32 %v965_v2, %v959_v48  ;;  %v974_v58 = vadd.f32 %v966_v45, %v960_v49  ;;  %v975_v59 = vadd.f32 %v965_v2, %v961_v50 }
 0x11b   : > { %977 = vst [vmem:[%s1956_s3] sm:$0xff] %v969_v52  ;;  %v1003_v61 = vmul.f32 %v969_v52, %v969_v52  ;;  %v1004_v0 = vmul.f32 %v970_v53, %v970_v53  ;;  %v985_v1 = vadd.f32 %v971_v54, %v969_v52  ;;  %v1005_v3 = vmul.f32 %v971_v54, %v971_v54 }
 0x11c   : > { %v962_v51 = vld [vmem:[#allocation2 + $0x38] sm:$0xff]  ;;  %978 = vst [vmem:[%s1956_s3 + $0x8] sm:$0xff] %v970_v53  ;;  %v994_v4 = vadd.f32 %v972_v55, %v970_v53  ;;  %v1006_v5 = vmul.f32 %v972_v55, %v972_v55  ;;  %v1007_v6 = vmul.f32 %v973_v56, %v973_v56  ;;  %v1008_v7 = vmul.f32 %v974_v58, %v974_v58 }
 0x11d   : > { %v976_v60 = vadd.f32 %v966_v45, %v962_v51  ;;  %979 = vst [vmem:[%s1956_s3 + $0x10] sm:$0xff] %v971_v54  ;;  %v986_v8 = vadd.f32 %v985_v1, %v973_v56  ;;  %v1009_v9 = vmul.f32 %v975_v59, %v975_v59  ;;  %v1011_v10 = vadd.f32 %v1005_v3, %v1003_v61 }
 0x11e   : > { %980 = vst [vmem:[%s1956_s3 + $0x18] sm:$0xff] %v972_v55  ;;  %v995_v11 = vadd.f32 %v994_v4, %v974_v58  ;;  %v1020_v13 = vadd.f32 %v1006_v5, %v1004_v0 }
 0x11f   : > { %v1010_v12 = vmul.f32 %v976_v60, %v976_v60  ;;  %981 = vst [vmem:[%s1956_s3 + $0x20] sm:$0xff] %v973_v56  ;;  %v987_v14 = vadd.f32 %v986_v8, %v975_v59  ;;  %v1012_v15 = vadd.f32 %v1011_v10, %v1007_v6 }
 0x120   : > { %982 = vst [vmem:[%s1956_s3 + $0x28] sm:$0xff] %v974_v58  ;;  %v996_v16 = vadd.f32 %v995_v11, %v976_v60  ;;  %v1021_v17 = vadd.f32 %v1020_v13, %v1008_v7 }
 0x121   : > { %983 = vst [vmem:[%s1956_s3 + $0x30] sm:$0xff] %v975_v59  ;;  %v988_v18 = vrot.slane %v987_v14, 4  ;;  %v1013_v19 = vadd.f32 %v1012_v15, %v1009_v9 }
 0x122   : > { %984 = vst [vmem:[%s1956_s3 + $0x38] sm:$0xff] %v976_v60  ;;  %v997_v20 = vrot.slane %v996_v16, 4  ;;  %v1022_v21 = vadd.f32 %v1021_v17, %v1010_v12 }
 0x123   : > { %v989_v22 = vadd.f32 %v988_v18, %v987_v14  ;;  %v1014_v23 = vrot.slane %v1013_v19, 4 }
 0x124   : > { %v998_v24 = vadd.f32 %v997_v20, %v996_v16  ;;  %v1023_v25 = vrot.slane %v1022_v21, 4 }
 0x125   : > { %v990_v26 = vrot.slane %v989_v22, 2  ;;  %v1015_v27 = vadd.f32 %v1014_v23, %v1013_v19 }
 0x126   : > { %v999_v28 = vrot.slane %v998_v24, 2  ;;  %v1024_v29 = vadd.f32 %v1023_v25, %v1022_v21 }
 0x127   : > { %v991_v30 = vadd.f32 %v990_v26, %v989_v22  ;;  %v1016_v31 = vrot.slane %v1015_v27, 2 }
 0x128   : > { %v1000_v32 = vadd.f32 %v999_v28, %v998_v24  ;;  %v1025_v33 = vrot.slane %v1024_v29, 2 }
 0x129   : > { %v992_v34 = vrot.slane %v991_v30, 1  ;;  %v1017_v35 = vadd.f32 %v1016_v31, %v1015_v27 }
 0x12a   : > { %v1001_v36 = vrot.slane %v1000_v32, 1  ;;  %v1026_v37 = vadd.f32 %v1025_v33, %v1024_v29 }
 0x12b   : > { %v993_v38 = vadd.f32 %v992_v34, %v991_v30  ;;  %v1018_v39 = vrot.slane %v1017_v35, 1 }
 0x12c   : > { %v1002_v40 = vadd.f32 %v1001_v36, %v1000_v32  ;;  %v1027_v41 = vrot.slane %v1026_v37, 1 }
 0x12d   : > { %1029 = vst [vmem:[%s1957_s4] sm:$0xff] %v993_v38  ;;  %v1019_v42 = vadd.f32 %v1018_v39, %v1017_v35 }
 0x12e   : > { %1030 = vst [vmem:[%s1957_s4 + $0x8] sm:$0xff] %v1002_v40  ;;  %v1028_v57 = vadd.f32 %v1027_v41, %v1026_v37 }
 0x12f   : > { %1031 = vst [vmem:[%s1958_s5] sm:$0xff] %v1019_v42 }
 0x130   : > { %1032 = vst [vmem:[%s1958_s5 + $0x8] sm:$0xff] %v1028_v57 }
 0x131 PF: > { %s16_s22 = sadd.s32 1, %s1638_s22   ;;  %s1959_s18 = smov %s1626_s19 }
 0x132   : > { %p13_p12 = scmp.ge.s32.totalorder %s16_s22, 6   ;;  %s1960_s19 = smov %s1706_s26 }
 0x133   : > { %s1961_s20 = smov %s1634_s21  ;;  %s1962_s21 = smov %s1964_s23 }
 0x134   :  { %15 = sbr.rel (!%p13_p12) target bundleno = 3 (0x3), region = 125 }

// kernel: discriminator_forward.14
= control target key start
LH: loop header
LB: loop body
LE: loop exit
PB: predicated region body
PF: predicated region fallthrough
CT: control target
= control target key end

     0   :  { %s320_s0 = inlined_call_operand.vmem [shape: f32[32,512], index: 0, kind: input, shape index: {}]   ;;  %s321_s1 = inlined_call_operand.vmem [shape: f32[1,512], index: 1, kind: input, shape index: {}]   ;;  %s322_s2 = inlined_call_operand.vmem [shape: f32[1,512], index: 2, kind: input, shape index: {}]   ;;  %s323_s3 = inlined_call_operand.vmem [shape: f32[32,512], index: 3, kind: output, shape index: {}]  }
   0x1   :  { %v14_v0 = vld [vmem:[%s320_s0] sm:$0xff]  ;;  %v15_v5 = vld [vmem:[%s320_s0 + $0x8] sm:$0xff]  ;;  %v16_v8 = vld [vmem:[%s320_s0 + $0x10] sm:$0xff] }
   0x2   :  { %v30_v1 = vld [vmem:[%s321_s1] sm:$0xf]  ;;  %v17_v11 = vld [vmem:[%s320_s0 + $0x18] sm:$0xff]  ;;  %v19_v18 = vld [vmem:[%s320_s0 + $0x28] sm:$0xff] }
   0x3   :  { %v56_v2 = vld [vmem:[%s322_s2] sm:$0xf]  ;;  %v179_v3 = vperm.slane %v30_v1, 0  ;;  %v186_v6 = vperm.slane %v30_v1, 1  ;;  %v193_v9 = vperm.slane %v30_v1, 2  ;;  %v200_v12 = vperm.slane %v30_v1, 3 }
   0x4   :  { %v181_v4 = vperm.slane %v56_v2, 0  ;;  %v188_v7 = vperm.slane %v56_v2, 1  ;;  %v195_v10 = vperm.slane %v56_v2, 2  ;;  %v202_v13 = vperm.slane %v56_v2, 3  ;;  %v18_v14 = vld [vmem:[%s320_s0 + $0x20] sm:$0xff]  ;;  %v20_v19 = vld [vmem:[%s320_s0 + $0x30] sm:$0xff] }
   0x5   :  { %v40_v15 = vmul.f32 %v179_v3, %v14_v0  ;;  %v41_v16 = vmul.f32 %v186_v6, %v15_v5  ;;  %v44_v17 = vmul.f32 %v179_v3, %v18_v14  ;;  %v21_v20 = vld [vmem:[%s320_s0 + $0x38] sm:$0xff]  ;;  %v42_v21 = vmul.f32 %v193_v9, %v16_v8  ;;  %v22_v40 = vld [vmem:[%s320_s0 + $0x40] sm:$0xff]  ;;  %v23_v41 = vld [vmem:[%s320_s0 + $0x48] sm:$0xff] }
   0x6   :  { %v43_v22 = vmul.f32 %v200_v12, %v17_v11  ;;  %v45_v23 = vmul.f32 %v186_v6, %v19_v18  ;;  %v46_v24 = vmul.f32 %v193_v9, %v20_v19  ;;  %v47_v28 = vmul.f32 %v200_v12, %v21_v20  ;;  %v24_v42 = vld [vmem:[%s320_s0 + $0x50] sm:$0xff]  ;;  %v25_v46 = vld [vmem:[%s320_s0 + $0x58] sm:$0xff]  ;;  %v26_v50 = vld [vmem:[%s320_s0 + $0x60] sm:$0xff] }
   0x7   :  { %v66_v25 = vadd.f32 %v181_v4, %v40_v15  ;;  %v67_v26 = vadd.f32 %v188_v7, %v41_v16  ;;  %v70_v27 = vadd.f32 %v181_v4, %v44_v17  ;;  %v68_v29 = vadd.f32 %v195_v10, %v42_v21  ;;  %v27_v55 = vld [vmem:[%s320_s0 + $0x68] sm:$0xff]  ;;  %v28_v56 = vld [vmem:[%s320_s0 + $0x70] sm:$0xff]  ;;  %v29_v17 = vld [vmem:[%s320_s0 + $0x78] sm:$0xff] }
   0x8   :  { %v69_v30 = vadd.f32 %v202_v13, %v43_v22  ;;  %v71_v31 = vadd.f32 %v188_v7, %v45_v23  ;;  %v72_v32 = vadd.f32 %v195_v10, %v46_v24  ;;  %v73_v49 = vadd.f32 %v202_v13, %v47_v28 }
   0x9   :  { %vm82_vm0 = vcmp.gt.f32.partialorder %v66_v25, 0.0  ;;  %v98_v33 = vmul.f32 0.2, %v66_v25  ;;  %vm83_vm1 = vcmp.gt.f32.partialorder %v67_v26, 0.0  ;;  %v99_v34 = vmul.f32 0.2, %v67_v26 }
   0xa   :  { %vm84_vm2 = vcmp.gt.f32.partialorder %v68_v29, 0.0  ;;  %v100_v35 = vmul.f32 0.2, %v68_v29  ;;  %vm85_vm3 = vcmp.gt.f32.partialorder %v69_v30, 0.0  ;;  %v101_v36 = vmul.f32 0.2, %v69_v30 }
   0xb   :  { %v114_v37 = vsel %vm82_vm0, %v66_v25, %v98_v33  ;;  %v115_v38 = vsel %vm83_vm1, %v67_v26, %v99_v34  ;;  %vm86_vm4 = vcmp.gt.f32.partialorder %v70_v27, 0.0  ;;  %v102_v39 = vmul.f32 0.2, %v70_v27 }
   0xc   :  { %130 = vst [vmem:[%s323_s3] sm:$0xff] %v114_v37  ;;  %v116_v43 = vsel %vm84_vm2, %v68_v29, %v100_v35  ;;  %v117_v44 = vsel %vm85_vm3, %v69_v30, %v101_v36  ;;  %vm87_vm5 = vcmp.gt.f32.partialorder %v71_v31, 0.0  ;;  %v103_v45 = vmul.f32 0.2, %v71_v31 }
   0xd   :  { %131 = vst [vmem:[%s323_s3 + $0x8] sm:$0xff] %v115_v38  ;;  %v118_v47 = vsel %vm86_vm4, %v70_v27, %v102_v39  ;;  %vm88_vm6 = vcmp.gt.f32.partialorder %v72_v32, 0.0  ;;  %v104_v48 = vmul.f32 0.2, %v72_v32  ;;  %v48_v52 = vmul.f32 %v179_v3, %v22_v40 }
   0xe   :  { %132 = vst [vmem:[%s323_s3 + $0x10] sm:$0xff] %v116_v43  ;;  %v119_v51 = vsel %vm87_vm5, %v71_v31, %v103_v45  ;;  %v49_v53 = vmul.f32 %v186_v6, %v23_v41  ;;  %v50_v54 = vmul.f32 %v193_v9, %v24_v42  ;;  %vm89_vm7 = vcmp.gt.f32.partialorder %v73_v49, 0.0 }
   0xf   :  { %133 = vst [vmem:[%s323_s3 + $0x18] sm:$0xff] %v117_v44  ;;  %v120_v57 = vsel %vm88_vm6, %v72_v32, %v104_v48  ;;  %v105_v58 = vmul.f32 0.2, %v73_v49  ;;  %v51_v59 = vmul.f32 %v200_v12, %v25_v46  ;;  %v74_v60 = vadd.f32 %v181_v4, %v48_v52 }
  0x10   :  { %134 = vst [vmem:[%s323_s3 + $0x20] sm:$0xff] %v118_v47  ;;  %v75_v61 = vadd.f32 %v188_v7, %v49_v53  ;;  %v76_v62 = vadd.f32 %v195_v10, %v50_v54  ;;  %v52_v63 = vmul.f32 %v179_v3, %v26_v50  ;;  %v53_v2 = vmul.f32 %v186_v6, %v27_v55 }
  0x11   :  { %135 = vst [vmem:[%s323_s3 + $0x28] sm:$0xff] %v119_v51  ;;  %v121_v0 = vsel %vm89_vm7, %v73_v49, %v105_v58  ;;  %v77_v1 = vadd.f32 %v202_v13, %v51_v59  ;;  %v54_v5 = vmul.f32 %v193_v9, %v28_v56  ;;  %vm90_vm8 = vcmp.gt.f32.partialorder %v74_v60, 0.0 }
  0x12   :  { %136 = vst [vmem:[%s323_s3 + $0x30] sm:$0xff] %v120_v57  ;;  %v106_v8 = vmul.f32 0.2, %v74_v60  ;;  %vm91_vm9 = vcmp.gt.f32.partialorder %v75_v61, 0.0  ;;  %vm92_vm10 = vcmp.gt.f32.partialorder %v76_v62, 0.0  ;;  %v78_v14 = vadd.f32 %v181_v4, %v52_v63 }
  0x13   :  { %137 = vst [vmem:[%s323_s3 + $0x38] sm:$0xff] %v121_v0  ;;  %v107_v3 = vmul.f32 0.2, %v75_v61  ;;  %v108_v11 = vmul.f32 0.2, %v76_v62  ;;  %vm93_vm11 = vcmp.gt.f32.partialorder %v77_v1, 0.0  ;;  %v79_v9 = vadd.f32 %v188_v7, %v53_v2 }
  0x14   :  { %v122_v6 = vsel %vm90_vm8, %v74_v60, %v106_v8  ;;  %v109_v15 = vmul.f32 0.2, %v77_v1  ;;  %v80_v16 = vadd.f32 %v195_v10, %v54_v5  ;;  %vm94_vm12 = vcmp.gt.f32.partialorder %v78_v14, 0.0 }
  0x15   :  { %138 = vst [vmem:[%s323_s3 + $0x40] sm:$0xff] %v122_v6  ;;  %v123_v18 = vsel %vm91_vm9, %v75_v61, %v107_v3  ;;  %v124_v19 = vsel %vm92_vm10, %v76_v62, %v108_v11  ;;  %v110_v20 = vmul.f32 0.2, %v78_v14  ;;  %vm95_vm13 = vcmp.gt.f32.partialorder %v79_v9, 0.0 }
  0x16   :  { %139 = vst [vmem:[%s323_s3 + $0x48] sm:$0xff] %v123_v18  ;;  %v125_v4 = vsel %vm93_vm11, %v77_v1, %v109_v15  ;;  %v111_v7 = vmul.f32 0.2, %v79_v9  ;;  %vm96_vm14 = vcmp.gt.f32.partialorder %v80_v16, 0.0  ;;  %v112_v21 = vmul.f32 0.2, %v80_v16 }
  0x17   :  { %140 = vst [vmem:[%s323_s3 + $0x50] sm:$0xff] %v124_v19  ;;  %v126_v10 = vsel %vm94_vm12, %v78_v14, %v110_v20  ;;  %v55_v22 = vmul.f32 %v200_v12, %v29_v17 }
  0x18   :  { %141 = vst [vmem:[%s323_s3 + $0x58] sm:$0xff] %v125_v4  ;;  %v127_v23 = vsel %vm95_vm13, %v79_v9, %v111_v7  ;;  %v128_v24 = vsel %vm96_vm14, %v80_v16, %v112_v21 }
  0x19   :  { %142 = vst [vmem:[%s323_s3 + $0x60] sm:$0xff] %v126_v10  ;;  %v81_v25 = vadd.f32 %v202_v13, %v55_v22 }
  0x1a   :  { %143 = vst [vmem:[%s323_s3 + $0x68] sm:$0xff] %v127_v23 }
  0x1b   :  { %144 = vst [vmem:[%s323_s3 + $0x70] sm:$0xff] %v128_v24  ;;  %vm97_vm15 = vcmp.gt.f32.partialorder %v81_v25, 0.0  ;;  %v113_v12 = vmul.f32 0.2, %v81_v25 }
  0x1d   :  { %v129_v26 = vsel %vm97_vm15, %v81_v25, %v113_v12 }
  0x1e   :  { %145 = vst [vmem:[%s323_s3 + $0x78] sm:$0xff] %v129_v26 }

// kernel: discriminator_forward.13
= control target key start
LH: loop header
LB: loop body
LE: loop exit
PB: predicated region body
PF: predicated region fallthrough
CT: control target
= control target key end

     0   :  { %s2635_s18 = smov 0   ;;  %s2637_s19 = smov 0   ;;  %s3104_s0 = inlined_call_operand.vmem [shape: bf16[32,4096], index: 0, kind: input, shape index: {}]   ;;  %s3105_s1 = inlined_call_operand.vmem [shape: bf16[4096,512], index: 1, kind: input, shape index: {}]   ;;  %s3106_s2 = inlined_call_operand.vmem [shape: f32[1,512], index: 2, kind: input, shape index: {}]   ;;  %s3107_s3 = inlined_call_operand.vmem [shape: f32[32,512], index: 3, kind: output, shape index: {0}]   ;;  %s3108_s4 = inlined_call_operand.vmem [shape: f32[1,8,512], index: 4, kind: output, shape index: {1}]   ;;  %s3109_s5 = inlined_call_operand.vmem [shape: f32[1,8,512], index: 5, kind: output, shape index: {2}]  }
   0x1   :  { %s2639_s20 = smov 0   ;;  %s2641_s21 = smov 0  }
   0x2   :  { %s2643_s22 = smov 0  }
   0x3 LB: > { %s25_s23 = sadd.s32 1, %s2598_s21  ;;  %p44_p1 = scmp.ne.s32.totalorder %s2590_s19, %s2586_s18  ;;  %s2602_s22 = sphi %s2643_s22, %s16_s22   ;;  %s2598_s21 = sphi %s2641_s21, %s3113_s21   ;;  %s2594_s20 = sphi %s2639_s20, %s3112_s20   ;;  %s2590_s19 = sphi %s2637_s19, %s3111_s19   ;;  %s2586_s18 = sphi %s2635_s18, %s3110_s18  }
   0x4   : > { %p26_p0 = scmp.ge.s32.totalorder %s25_s23, 8  ;;  %p45_p2 = scmp.eq.s32.totalorder %s2602_s22, 0 }
   0x5   : > { %s37_s25 = sadd.s32 1, %s2590_s19  ;;  %p1824_p5 = scmp.ge.s32.totalorder %s2602_s22, 8 }
   0x6   : > { %s3115_s23 = smov (%p26_p0, %s25_s23), 0  ;;  %p46_p3 = por %p45_p2, %p44_p1 }
   0x7   : > { %s33_s24 = ssub.s32 %s2598_s21, %s3115_s23  ;;  %198 = sbr.rel (%p1824_p5) target bundleno = 24 (0x18), region = 20 }
   0x8   : > { %p35_p4 = scmp.eq.s32.totalorder %s33_s24, 0 }
   0xa   : > { %s2670_s26 = scalar_select %p35_p4, %s2590_s19, %s37_s25  }
   0xc   : > { %201 = sbr.rel (!%p46_p3) target bundleno = 24 (0x18), region = 24  ;;  %s203_s27 = sand.u32 (%p46_p3), 1, %s2590_s19  }
   0xd   : > { %s2385_s28 = sshll.u32 (%p46_p3), %s2598_s21, 4  ;;  %s1825_s29 = sshll.u32 (%p46_p3), %s203_s27, 6 }
   0xe   : > { %s211_s7 = scalar_lea.vmem (%p46_p3), %s3104_s0, %s2385_s28  ;;  %s205_s8 = scalar_lea.vmem (%p46_p3), [#allocation3], %s1825_s29 }
   0xf   : > { %v224_v0 = vld [vmem:[%s211_s7] sm:$0xff] (%p46_p3)  ;;  %v226_v1 = vld [vmem:[%s211_s7 + $0x8] sm:$0xff] (%p46_p3) }
  0x10   : > { %v228_v2 = vld [vmem:[%s211_s7 + $0x80] sm:$0xff] (%p46_p3)  ;;  %225 = vst [vmem:[%s205_s8] sm:$0xff] (%p46_p3), %v224_v0  ;;  %v230_v3 = vld [vmem:[%s211_s7 + $0x88] sm:$0xff] (%p46_p3) }
  0x11   : > { %227 = vst [vmem:[%s205_s8 + $0x8] sm:$0xff] %v226_v1  ;;  %v232_v4 = vld [vmem:[%s211_s7 + $0x100] sm:$0xff]  ;;  %v234_v5 = vld [vmem:[%s211_s7 + $0x108] sm:$0xff] }
  0x12   : > { %229 = vst [vmem:[%s205_s8 + $0x10] sm:$0xff] %v228_v2  ;;  %v236_v6 = vld [vmem:[%s211_s7 + $0x180] sm:$0xff]  ;;  %v238_v7 = vld [vmem:[%s211_s7 + $0x188] sm:$0xff] }
  0x13   : > { %231 = vst [vmem:[%s205_s8 + $0x18] sm:$0xff] %v230_v3 }
  0x14   : > { %233 = vst [vmem:[%s205_s8 + $0x20] sm:$0xff] %v232_v4 }
  0x15   : > { %235 = vst [vmem:[%s205_s8 + $0x28] sm:$0xff] %v234_v5 }
  0x16   : > { %237 = vst [vmem:[%s205_s8 + $0x30] sm:$0xff] %v236_v6 }
  0x17   : > { %239 = vst [vmem:[%s205_s8 + $0x38] sm:$0xff] %v238_v7 }
  0x18 PF: > { %p1828_p6 = scmp.ge.s32.totalorder %s2602_s22, 1  ;;  %p254_p7 = scmp.lt.s32.totalorder %s2602_s22, 9 }
  0x1a   : > { %p255_p8 = pnand %p1828_p6, %p254_p7 }
  0x1b   : > { %s261_s9 = sand.u32 (!%p255_p8), 1, %s2586_s18   ;;  %s1830_s10 = sshll.u32 (!%p255_p8), %s2594_s20, 6 }
  0x1c   : > { %258 = sbr.rel (%p255_p8) target bundleno = 388 (0x184), region = 51  ;;  %s1829_s11 = sshll.u32 (!%p255_p8), %s261_s9, 6 }
  0x1d   : > { %p308_p9 = scmp.lt.s32.totalorder (!%p255_p8), %s1830_s10, 511  ;;  %s2687_s16 = scalar_lea.vmem (!%p255_p8), [#allocation3], %s1829_s11 }
  0x1e   : > { %p1833_p10 = scmp.ne.s32.totalorder (!%p255_p8), %s2594_s20, 0 }
  0x21   : > { %s3117_s10 = smov (!%p308_p9, %s1830_s10), 511  ;;  %334 = sbr.rel (%p1833_p10) target bundleno = 55 (0x37), region = 59 }
  0x22   : > { %s2386_s12 = sshll.u32 %s3117_s10, 4 }
  0x23   : > { %s2685_s15 = scalar_lea.vmem %s3105_s1, %s2386_s12 }
  0x26   : > { %v2604_v8 = vmov 0.0  }
  0x27   : > { %335 = vst [vmem:[#allocation2 + $0x30] sm:$0xff] %v2604_v8 }
  0x28   : > { %336 = vst [vmem:[#allocation2] sm:$0xff] %v2604_v8 }
  0x29   : > { %337 = vst [vmem:[#allocation2 + $0x58] sm:$0xff] %v2604_v8 }
  0x2a   : > { %338 = vst [vmem:[#allocation2 + $0x18] sm:$0xff] %v2604_v8 }
  0x2b   : > { %339 = vst [vmem:[#allocation2 + $0x50] sm:$0xff] %v2604_v8 }
  0x2c   : > { %340 = vst [vmem:[#allocation2 + $0x68] sm:$0xff] %v2604_v8 }
  0x2d   : > { %341 = vst [vmem:[#allocation2 + $0x8] sm:$0xff] %v2604_v8 }
  0x2e   : > { %342 = vst [vmem:[#allocation2 + $0x48] sm:$0xff] %v2604_v8 }
  0x2f   : > { %343 = vst [vmem:[#allocation2 + $0x40] sm:$0xff] %v2604_v8 }
  0x30   : > { %344 = vst [vmem:[#allocation2 + $0x20] sm:$0xff] %v2604_v8 }
  0x31   : > { %345 = vst [vmem:[#allocation2 + $0x10] sm:$0xff] %v2604_v8 }
  0x32   : > { %346 = vst [vmem:[#allocation2 + $0x38] sm:$0xff] %v2604_v8 }
  0x33   : > { %347 = vst [vmem:[#allocation2 + $0x60] sm:$0xff] %v2604_v8 }
  0x34   : > { %348 = vst [vmem:[#allocation2 + $0x70] sm:$0xff] %v2604_v8 }
  0x35   : > { %349 = vst [vmem:[#allocation2 + $0x78] sm:$0xff] %v2604_v8 }
  0x36   : > { %350 = vst [vmem:[#allocation2 + $0x28] sm:$0xff] %v2604_v8 }
  0x37 PF: > { %v1980_v9 = vld [vmem:[%s2685_s15 + $0xe0] sm:$0xf]  ;;  %v2425_v10 = vld [vmem:[%s2685_s15 + $0xec] sm:$0xf0]  ;;  %p2378_p11 = scmp.ne.s32.totalorder %s2594_s20, 7 }
  0x38   : > { %v2108_v11 = vld [vmem:[%s2685_s15 + $0x1e0] sm:$0xf]  ;;  %v1981_v12 = vor.u32 %v2425_v10, %v1980_v9  ;;  %v2457_v13 = vld [vmem:[%s2685_s15 + $0x1ec] sm:$0xf0] }
  0x39   : > { %v2236_v14 = vld [vmem:[%s2685_s15 + $0x2e0] sm:$0xf]  ;;  %v2489_v15 = vld [vmem:[%s2685_s15 + $0x2ec] sm:$0xf0]  ;;  %v2109_v16 = vor.u32 %v2457_v13, %v2108_v11 }
  0x3a   : > { %v2237_v17 = vor.u32 %v2489_v15, %v2236_v14  ;;  %v2364_v18 = vld [vmem:[%s2685_s15 + $0x3e0] sm:$0xf]  ;;  %v2521_v19 = vld [vmem:[%s2685_s15 + $0x3ec] sm:$0xf0]  ;;  %1183 = vmatpush.bf16.msra.mxu0 %v1981_v12 }
  0x3b   : > { %v1964_v20 = vld [vmem:[%s2685_s15 + $0xc0] sm:$0xf]  ;;  %v2365_v21 = vor.u32 %v2521_v19, %v2364_v18  ;;  %v2421_v22 = vld [vmem:[%s2685_s15 + $0xcc] sm:$0xf0]  ;;  %1202 = vmatpush.bf16.msra.mxu1 %v2109_v16 }
  0x3c   : > { %v2092_v23 = vld [vmem:[%s2685_s15 + $0x1c0] sm:$0xf]  ;;  %v2453_v24 = vld [vmem:[%s2685_s15 + $0x1cc] sm:$0xf0]  ;;  %1221 = vmatpush.bf16.msra.mxu2 %v2237_v17  ;;  %v1965_v25 = vor.u32 %v2421_v22, %v1964_v20 }
  0x3d   : > { %v2093_v26 = vor.u32 %v2453_v24, %v2092_v23  ;;  %v2220_v27 = vld [vmem:[%s2685_s15 + $0x2c0] sm:$0xf]  ;;  %v2485_v28 = vld [vmem:[%s2685_s15 + $0x2cc] sm:$0xf0]  ;;  %1240 = vmatpush.bf16.msra.mxu3 %v2365_v21 }
  0x3e   : > { %v2348_v29 = vld [vmem:[%s2685_s15 + $0x3c0] sm:$0xf]  ;;  %v2221_v30 = vor.u32 %v2485_v28, %v2220_v27  ;;  %v2517_v31 = vld [vmem:[%s2685_s15 + $0x3cc] sm:$0xf0]  ;;  %1184 = vmatpush.bf16.msra.mxu0 %v1965_v25 }
  0x3f   : > { %v1948_v32 = vld [vmem:[%s2685_s15 + $0xa0] sm:$0xf]  ;;  %v2417_v33 = vld [vmem:[%s2685_s15 + $0xac] sm:$0xf0]  ;;  %v2349_v34 = vor.u32 %v2517_v31, %v2348_v29  ;;  %1203 = vmatpush.bf16.msra.mxu1 %v2093_v26 }
  0x40   : > { %v2076_v35 = vld [vmem:[%s2685_s15 + $0x1a0] sm:$0xf]  ;;  %v2449_v36 = vld [vmem:[%s2685_s15 + $0x1ac] sm:$0xf0]  ;;  %v1949_v38 = vor.u32 %v2417_v33, %v1948_v32  ;;  %1222 = vmatpush.bf16.msra.mxu2 %v2221_v30 }
  0x41   : > { %v2204_v37 = vld [vmem:[%s2685_s15 + $0x2a0] sm:$0xf]  ;;  %v2481_v39 = vld [vmem:[%s2685_s15 + $0x2ac] sm:$0xf0]  ;;  %v2077_v42 = vor.u32 %v2449_v36, %v2076_v35  ;;  %1241 = vmatpush.bf16.msra.mxu3 %v2349_v34 }
  0x42   : > { %v2332_v40 = vld [vmem:[%s2685_s15 + $0x3a0] sm:$0xf]  ;;  %v2513_v41 = vld [vmem:[%s2685_s15 + $0x3ac] sm:$0xf0]  ;;  %v2205_v43 = vor.u32 %v2481_v39, %v2204_v37  ;;  %1185 = vmatpush.bf16.msra.mxu0 %v1949_v38  ;;  %v2387_v39 = vld [vmem:[%s2687_s16 + $0x4] sm:$0xf] }
  0x43   : > { %v1932_v44 = vld [vmem:[%s2685_s15 + $0x80] sm:$0xf]  ;;  %v2413_v45 = vld [vmem:[%s2685_s15 + $0x8c] sm:$0xf0]  ;;  %v2333_v47 = vor.u32 %v2513_v41, %v2332_v40  ;;  %1204 = vmatpush.bf16.msra.mxu1 %v2077_v42  ;;  %v1838_v40 = vld [vmem:[%s2687_s16 + $0x10] sm:$0xf0] }
  0x44   : > { %v2060_v46 = vld [vmem:[%s2685_s15 + $0x180] sm:$0xf]  ;;  %v2445_v48 = vld [vmem:[%s2685_s15 + $0x18c] sm:$0xf0]  ;;  %v1933_v53 = vor.u32 %v2413_v45, %v1932_v44  ;;  %1223 = vmatpush.bf16.msra.mxu2 %v2205_v43  ;;  %v2487_v41 = vld [vmem:[%s2685_s15 + $0x2e4] sm:$0xf] }
  0x45   : > { %v2188_v49 = vld [vmem:[%s2685_s15 + $0x280] sm:$0xf]  ;;  %v2477_v50 = vld [vmem:[%s2685_s15 + $0x28c] sm:$0xf0]  ;;  %v2061_v54 = vor.u32 %v2445_v48, %v2060_v46  ;;  %1242 = vmatpush.bf16.msra.mxu3 %v2333_v47  ;;  %v2238_v42 = vld [vmem:[%s2685_s15 + $0x2f0] sm:$0xf0] }
  0x46   : > { %v2316_v51 = vld [vmem:[%s2685_s15 + $0x380] sm:$0xf]  ;;  %v2509_v52 = vld [vmem:[%s2685_s15 + $0x38c] sm:$0xf0]  ;;  %v2189_v55 = vor.u32 %v2477_v50, %v2188_v49  ;;  %1186 = vmatpush.bf16.msra.mxu0 %v1933_v53  ;;  %v1844_v44 = vld [vmem:[%s2687_s16 + $0x8] sm:$0xf]  ;;  %v2241_v53 = vor.u32 %v2487_v41, %v2238_v42 }
  0x47   : > { %v1916_v56 = vld [vmem:[%s2685_s15 + $0x60] sm:$0xf]  ;;  %v2409_v57 = vld [vmem:[%s2685_s15 + $0x6c] sm:$0xf0]  ;;  %v2317_v59 = vor.u32 %v2509_v52, %v2316_v51  ;;  %1205 = vmatpush.bf16.msra.mxu1 %v2061_v54  ;;  %v2455_v45 = vld [vmem:[%s2685_s15 + $0x1e4] sm:$0xf] }
  0x48   : > { %v2044_v58 = vld [vmem:[%s2685_s15 + $0x160] sm:$0xf]  ;;  %v2441_v60 = vld [vmem:[%s2685_s15 + $0x16c] sm:$0xf0]  ;;  %v1917_v1 = vor.u32 %v2409_v57, %v1916_v56  ;;  %1224 = vmatpush.bf16.msra.mxu2 %v2189_v55  ;;  %v2110_v46 = vld [vmem:[%s2685_s15 + $0x1f0] sm:$0xf0] }
  0x49   : > { %v2172_v61 = vld [vmem:[%s2685_s15 + $0x260] sm:$0xf]  ;;  %v2473_v62 = vld [vmem:[%s2685_s15 + $0x26c] sm:$0xf0]  ;;  %v2045_v2 = vor.u32 %v2441_v60, %v2044_v58  ;;  %1243 = vmatpush.bf16.msra.mxu3 %v2317_v59  ;;  %v2390_v49 = vld [vmem:[%s2687_s16 + $0x14] sm:$0xf0]  ;;  %v2113_v58 = vor.u32 %v2455_v45, %v2110_v46 }
  0x4a   : > { %v2300_v63 = vld [vmem:[%s2685_s15 + $0x360] sm:$0xf]  ;;  %v2505_v0 = vld [vmem:[%s2685_s15 + $0x36c] sm:$0xf0]  ;;  %v2173_v3 = vor.u32 %v2473_v62, %v2172_v61  ;;  %1187 = vmatpush.bf16.msra.mxu0 %v1917_v1  ;;  %v2388_v50 = vld [vmem:[%s2687_s16 + $0xc] sm:$0xf]  ;;  %v2774_v62 = vor.u32 %v2387_v39, %v1838_v40 }
  0x4b   : > { %v1900_v4 = vld [vmem:[%s2685_s15 + $0x40] sm:$0xf]  ;;  %v2405_v5 = vld [vmem:[%s2685_s15 + $0x4c] sm:$0xf0]  ;;  %v2301_v7 = vor.u32 %v2505_v0, %v2300_v63  ;;  %1206 = vmatpush.bf16.msra.mxu1 %v2045_v2  ;;  %v1846_v51 = vld [vmem:[%s2687_s16 + $0x18] sm:$0xf0]  ;;  %v2776_v63 = vor.u32 %v2390_v49, %v1844_v44 }
  0x4c   : > { %v2028_v6 = vld [vmem:[%s2685_s15 + $0x140] sm:$0xf]  ;;  %v2437_v8 = vld [vmem:[%s2685_s15 + $0x14c] sm:$0xf0]  ;;  %v1901_v13 = vor.u32 %v2405_v5, %v1900_v4  ;;  %1225 = vmatpush.bf16.msra.mxu2 %v2173_v3  ;;  %v2423_v54 = vld [vmem:[%s2685_s15 + $0xe4] sm:$0xf]  ;;  %v2780_v2 = vor.u32 %v2388_v50, %v1846_v51 }
  0x4d   : > { %v2156_v9 = vld [vmem:[%s2685_s15 + $0x240] sm:$0xf]  ;;  %v2469_v10 = vld [vmem:[%s2685_s15 + $0x24c] sm:$0xf0]  ;;  %v2029_v14 = vor.u32 %v2437_v8, %v2028_v6  ;;  %1244 = vmatpush.bf16.msra.mxu3 %v2301_v7  ;;  %v1982_v55 = vld [vmem:[%s2685_s15 + $0xf0] sm:$0xf0] }
  0x4e   : > { %v2284_v11 = vld [vmem:[%s2685_s15 + $0x340] sm:$0xf]  ;;  %v2501_v12 = vld [vmem:[%s2685_s15 + $0x34c] sm:$0xf0]  ;;  %v2157_v15 = vor.u32 %v2469_v10, %v2156_v9  ;;  %1188 = vmatpush.bf16.msra.mxu0 %v1901_v13  ;;  %v2519_v56 = vld [vmem:[%s2685_s15 + $0x3e4] sm:$0xf]  ;;  %v1985_v3 = vor.u32 %v2423_v54, %v1982_v55 }
  0x4f   : > { %v1884_v16 = vld [vmem:[%s2685_s15 + $0x20] sm:$0xf]  ;;  %v2401_v17 = vld [vmem:[%s2685_s15 + $0x2c] sm:$0xf0]  ;;  %v2285_v19 = vor.u32 %v2501_v12, %v2284_v11  ;;  %1207 = vmatpush.bf16.msra.mxu1 %v2029_v14  ;;  %v2366_v59 = vld [vmem:[%s2685_s15 + $0x3f0] sm:$0xf0] }
  0x50   : > { %v2012_v18 = vld [vmem:[%s2685_s15 + $0x120] sm:$0xf]  ;;  %v2433_v20 = vld [vmem:[%s2685_s15 + $0x12c] sm:$0xf0]  ;;  %v1885_v26 = vor.u32 %v2401_v17, %v1884_v16  ;;  %1226 = vmatpush.bf16.msra.mxu2 %v2157_v15  ;;  %v2483_v60 = vld [vmem:[%s2685_s15 + $0x2c4] sm:$0xf]  ;;  %v2369_v4 = vor.u32 %v2519_v56, %v2366_v59 }
  0x51   : > { %v2140_v21 = vld [vmem:[%s2685_s15 + $0x220] sm:$0xf]  ;;  %v2465_v22 = vld [vmem:[%s2685_s15 + $0x22c] sm:$0xf0]  ;;  %v2013_v30 = vor.u32 %v2433_v20, %v2012_v18  ;;  %1245 = vmatpush.bf16.msra.mxu3 %v2285_v19  ;;  %v2222_v61 = vld [vmem:[%s2685_s15 + $0x2d0] sm:$0xf0] }
  0x52   : > { %v2268_v23 = vld [vmem:[%s2685_s15 + $0x320] sm:$0xf]  ;;  %v2497_v24 = vld [vmem:[%s2685_s15 + $0x32c] sm:$0xf0]  ;;  %v2141_v31 = vor.u32 %v2465_v22, %v2140_v21  ;;  %1189 = vmatpush.bf16.msra.mxu0 %v1885_v26  ;;  %v2451_v0 = vld [vmem:[%s2685_s15 + $0x1c4] sm:$0xf]  ;;  %v2225_v5 = vor.u32 %v2483_v60, %v2222_v61 }
  0x53   : > { %v1868_v25 = vld [vmem:[%s2685_s15] sm:$0xf]  ;;  %v2397_v27 = vld [vmem:[%s2685_s15 + $0xc] sm:$0xf0]  ;;  %v2269_v35 = vor.u32 %v2497_v24, %v2268_v23  ;;  %1208 = vmatpush.bf16.msra.mxu1 %v2013_v30  ;;  %v2094_v1 = vld [vmem:[%s2685_s15 + $0x1d0] sm:$0xf0] }
  0x54   : > { %v1996_v28 = vld [vmem:[%s2685_s15 + $0x100] sm:$0xf]  ;;  %v2429_v29 = vld [vmem:[%s2685_s15 + $0x10c] sm:$0xf0]  ;;  %v1869_v43 = vor.u32 %v2397_v27, %v1868_v25  ;;  %1227 = vmatpush.bf16.msra.mxu2 %v2141_v31  ;;  %v2419_v6 = vld [vmem:[%s2685_s15 + $0xc4] sm:$0xf]  ;;  %v2097_v9 = vor.u32 %v2451_v0, %v2094_v1 }
  0x55   : > { %v2124_v32 = vld [vmem:[%s2685_s15 + $0x200] sm:$0xf]  ;;  %v2461_v33 = vld [vmem:[%s2685_s15 + $0x20c] sm:$0xf0]  ;;  %v1997_v47 = vor.u32 %v2429_v29, %v1996_v28  ;;  %1246 = vmatpush.bf16.msra.mxu3 %v2269_v35  ;;  %v1966_v7 = vld [vmem:[%s2685_s15 + $0xd0] sm:$0xf0] }
  0x56   : > { %v2252_v34 = vld [vmem:[%s2685_s15 + $0x300] sm:$0xf]  ;;  %v2493_v36 = vld [vmem:[%s2685_s15 + $0x30c] sm:$0xf0]  ;;  %v2125_v48 = vor.u32 %v2461_v33, %v2124_v32  ;;  %1190 = vmatpush.bf16.msra.mxu0 %v1869_v43  ;;  %v2515_v8 = vld [vmem:[%s2685_s15 + $0x3c4] sm:$0xf]  ;;  %v1969_v15 = vor.u32 %v2419_v6, %v1966_v7 }
  0x57   : > { %v1836_v37 = vld [vmem:[%s2687_s16] sm:$0xf]  ;;  %v2389_v38 = vld [vmem:[%s2687_s16 + $0xc] sm:$0xf0]  ;;  %v2253_v52 = vor.u32 %v2493_v36, %v2252_v34  ;;  %1209 = vmatpush.bf16.msra.mxu1 %v1997_v47  ;;  %v2350_v10 = vld [vmem:[%s2685_s15 + $0x3d0] sm:$0xf0] }
  0x58   : > { %v2769_v57 = vor.u32 %v2389_v38, %v1836_v37  ;;  %1228 = vmatpush.bf16.msra.mxu2 %v2125_v48  ;;  %v2479_v11 = vld [vmem:[%s2685_s15 + $0x2a4] sm:$0xf]  ;;  %v2206_v12 = vld [vmem:[%s2685_s15 + $0x2b0] sm:$0xf0]  ;;  %v2353_v16 = vor.u32 %v2515_v8, %v2350_v10  ;;  %v1852_v34 = vld [vmem:[%s2687_s16 + $0x20] sm:$0xf] }
  0x59   : > { %1247 = vmatpush.bf16.msra.mxu3 %v2253_v52  ;;  %v2447_v13 = vld [vmem:[%s2685_s15 + $0x1a4] sm:$0xf]  ;;  %v2078_v14 = vld [vmem:[%s2685_s15 + $0x1b0] sm:$0xf0]  ;;  %v2209_v17 = vor.u32 %v2479_v11, %v2206_v12  ;;  %v2393_v35 = vld [vmem:[%s2687_s16 + $0x2c] sm:$0xf0] }
  0x5a   : > { %1191 = vmatmul.bf16.vlgmr.msra.gmra.mxu0 %v2769_v57  ;;  %1210 = vmatmul.bf16.vlgmr.msra.gmra.mxu1 %v2774_v62  ;;  %v2415_v18 = vld [vmem:[%s2685_s15 + $0xa4] sm:$0xf]  ;;  %v1950_v19 = vld [vmem:[%s2685_s15 + $0xb0] sm:$0xf0]  ;;  %v2081_v21 = vor.u32 %v2447_v13, %v2078_v14  ;;  %v1860_v41 = vld [vmem:[%s2687_s16 + $0x28] sm:$0xf] }
  0x5b   : > { %1278 = vmatpush.bf16.msrb.mxu1 %v2113_v58  ;;  %1229 = vmatmul.bf16.vlgmr.msra.gmra.mxu2 %v2776_v63  ;;  %v2511_v20 = vld [vmem:[%s2685_s15 + $0x3a4] sm:$0xf]  ;;  %v2334_v22 = vld [vmem:[%s2685_s15 + $0x3b0] sm:$0xf0]  ;;  %v1953_v27 = vor.u32 %v2415_v18, %v1950_v19  ;;  %v2394_v45 = vld [vmem:[%s2687_s16 + $0x34] sm:$0xf0] }
  0x5c   : > { %1297 = vmatpush.bf16.msrb.mxu2 %v2241_v53  ;;  %1248 = vmatmul.bf16.vlgmr.msra.gmra.mxu3 %v2780_v2  ;;  %v2475_v23 = vld [vmem:[%s2685_s15 + $0x284] sm:$0xf]  ;;  %v2190_v24 = vld [vmem:[%s2685_s15 + $0x290] sm:$0xf0]  ;;  %v2337_v31 = vor.u32 %v2511_v20, %v2334_v22  ;;  %v2392_v46 = vld [vmem:[%s2687_s16 + $0x2c] sm:$0xf]  ;;  %v2821_v53 = vor.u32 %v2393_v35, %v1852_v34  ;;  %v2828_v60 = vor.u32 %v2394_v45, %v1860_v41 }
  0x5d   : > { %1259 = vmatpush.bf16.msrb.mxu0 %v1985_v3  ;;  %1316 = vmatpush.bf16.msrb.mxu3 %v2369_v4  ;;  %v2443_v25 = vld [vmem:[%s2685_s15 + $0x184] sm:$0xf]  ;;  %v2062_v26 = vld [vmem:[%s2685_s15 + $0x190] sm:$0xf0]  ;;  %v2193_v32 = vor.u32 %v2475_v23, %v2190_v24  ;;  %v1862_v47 = vld [vmem:[%s2687_s16 + $0x38] sm:$0xf0] }
  0x5e   : > { %v2411_v28 = vld [vmem:[%s2685_s15 + $0x84] sm:$0xf]  ;;  %v1934_v29 = vld [vmem:[%s2685_s15 + $0x90] sm:$0xf0]  ;;  %v2065_v36 = vor.u32 %v2443_v25, %v2062_v26  ;;  %v2832_v1 = vor.u32 %v2392_v46, %v1862_v47  ;;  %v2426_v41 = vld [vmem:[%s2685_s15 + $0xf4] sm:$0xf0] }
  0x5f   : > { %1279 = vmatpush.bf16.msrb.mxu1 %v2097_v9  ;;  %v2507_v30 = vld [vmem:[%s2685_s15 + $0x384] sm:$0xf]  ;;  %v2318_v33 = vld [vmem:[%s2685_s15 + $0x390] sm:$0xf0]  ;;  %v1937_v44 = vor.u32 %v2411_v28, %v1934_v29  ;;  %v2490_v28 = vld [vmem:[%s2685_s15 + $0x2f4] sm:$0xf0] }
  0x60   : > { %1298 = vmatpush.bf16.msrb.mxu2 %v2225_v5  ;;  %v2391_v37 = vld [vmem:[%s2687_s16 + $0x24] sm:$0xf]  ;;  %v1854_v38 = vld [vmem:[%s2687_s16 + $0x30] sm:$0xf0]  ;;  %v2321_v48 = vor.u32 %v2507_v30, %v2318_v33  ;;  %v2228_v45 = vld [vmem:[%s2685_s15 + $0x2c8] sm:$0xf] }
  0x61   : > { %1260 = vmatpush.bf16.msrb.mxu0 %v1969_v15  ;;  %1317 = vmatpush.bf16.msrb.mxu3 %v2353_v16  ;;  %v2471_v39 = vld [vmem:[%s2685_s15 + $0x264] sm:$0xf]  ;;  %v2174_v40 = vld [vmem:[%s2685_s15 + $0x270] sm:$0xf0]  ;;  %v2826_v59 = vor.u32 %v2391_v37, %v1854_v38  ;;  %v2486_v46 = vld [vmem:[%s2685_s15 + $0x2d4] sm:$0xf0] }
  0x62   : > { %v2439_v42 = vld [vmem:[%s2685_s15 + $0x164] sm:$0xf]  ;;  %v2046_v43 = vld [vmem:[%s2685_s15 + $0x170] sm:$0xf0]  ;;  %v2177_v49 = vor.u32 %v2471_v39, %v2174_v40  ;;  %v1988_v40 = vld [vmem:[%s2685_s15 + $0xe8] sm:$0xf] }
  0x63   : > { %1280 = vmatpush.bf16.msrb.mxu1 %v2081_v21  ;;  %v2407_v50 = vld [vmem:[%s2685_s15 + $0x64] sm:$0xf]  ;;  %v1918_v51 = vld [vmem:[%s2685_s15 + $0x70] sm:$0xf0]  ;;  %v2049_v54 = vor.u32 %v2439_v42, %v2046_v43  ;;  %v2372_v42 = vld [vmem:[%s2685_s15 + $0x3e8] sm:$0xf] }
  0x64   : > { %1299 = vmatpush.bf16.msrb.mxu2 %v2209_v17  ;;  %v2503_v52 = vld [vmem:[%s2685_s15 + $0x364] sm:$0xf]  ;;  %v2302_v55 = vld [vmem:[%s2685_s15 + $0x370] sm:$0xf0]  ;;  %v1921_v3 = vor.u32 %v2407_v50, %v1918_v51  ;;  %v1972_v50 = vld [vmem:[%s2685_s15 + $0xc8] sm:$0xf] }
  0x65   : > { %1261 = vmatpush.bf16.msrb.mxu0 %v1953_v27  ;;  %1318 = vmatpush.bf16.msrb.mxu3 %v2337_v31  ;;  %v2467_v56 = vld [vmem:[%s2685_s15 + $0x244] sm:$0xf]  ;;  %v2158_v58 = vld [vmem:[%s2685_s15 + $0x250] sm:$0xf0]  ;;  %v2305_v4 = vor.u32 %v2503_v52, %v2302_v55  ;;  %v2244_v27 = vld [vmem:[%s2685_s15 + $0x2e8] sm:$0xf] }
  0x66   : > { %v2435_v61 = vld [vmem:[%s2685_s15 + $0x144] sm:$0xf]  ;;  %v2030_v0 = vld [vmem:[%s2685_s15 + $0x150] sm:$0xf0]  ;;  %v2161_v5 = vor.u32 %v2467_v56, %v2158_v58  ;;  %v2116_v31 = vld [vmem:[%s2685_s15 + $0x1e8] sm:$0xf]  ;;  %v2245_v39 = vor.u32 %v2490_v28, %v2244_v27 }
  0x67   : > { %1281 = vmatpush.bf16.msrb.mxu1 %v2065_v36  ;;  %v2403_v6 = vld [vmem:[%s2685_s15 + $0x44] sm:$0xf]  ;;  %v1902_v7 = vld [vmem:[%s2685_s15 + $0x50] sm:$0xf0]  ;;  %v2033_v9 = vor.u32 %v2435_v61, %v2030_v0  ;;  %v2422_v51 = vld [vmem:[%s2685_s15 + $0xd4] sm:$0xf0] }
  0x68   : > { %1300 = vmatpush.bf16.msrb.mxu2 %v2193_v32  ;;  %v2499_v8 = vld [vmem:[%s2685_s15 + $0x344] sm:$0xf]  ;;  %v2286_v10 = vld [vmem:[%s2685_s15 + $0x350] sm:$0xf0]  ;;  %v1905_v15 = vor.u32 %v2403_v6, %v1902_v7  ;;  %v2458_v32 = vld [vmem:[%s2685_s15 + $0x1f4] sm:$0xf0] }
  0x69   : > { %1262 = vmatpush.bf16.msrb.mxu0 %v1937_v44  ;;  %1319 = vmatpush.bf16.msrb.mxu3 %v2321_v48  ;;  %v2463_v11 = vld [vmem:[%s2685_s15 + $0x224] sm:$0xf]  ;;  %v2142_v12 = vld [vmem:[%s2685_s15 + $0x230] sm:$0xf0]  ;;  %v2289_v17 = vor.u32 %v2499_v8, %v2286_v10  ;;  %v2117_v43 = vor.u32 %v2458_v32, %v2116_v31  ;;  %v2522_v44 = vld [vmem:[%s2685_s15 + $0x3f4] sm:$0xf0] }
  0x6a   : > { %1196 = vmatmul.bf16.gmra.mxu0 %v2821_v53  ;;  %1215 = vmatmul.bf16.gmra.mxu1 %v2826_v59  ;;  %v2431_v13 = vld [vmem:[%s2685_s15 + $0x124] sm:$0xf]  ;;  %v2014_v14 = vld [vmem:[%s2685_s15 + $0x130] sm:$0xf0]  ;;  %v2145_v18 = vor.u32 %v2463_v11, %v2142_v12  ;;  %v2373_v52 = vor.u32 %v2522_v44, %v2372_v42  ;;  %v2100_v55 = vld [vmem:[%s2685_s15 + $0x1c8] sm:$0xf] }
  0x6b   : > { %1282 = vmatpush.bf16.msrb.mxu1 %v2049_v54  ;;  %1234 = vmatmul.bf16.gmra.mxu2 %v2828_v60  ;;  %v2399_v16 = vld [vmem:[%s2685_s15 + $0x24] sm:$0xf]  ;;  %v1886_v19 = vld [vmem:[%s2685_s15 + $0x30] sm:$0xf0]  ;;  %v2017_v22 = vor.u32 %v2431_v13, %v2014_v14  ;;  %v2229_v54 = vor.u32 %v2486_v46, %v2228_v45  ;;  %v2454_v56 = vld [vmem:[%s2685_s15 + $0x1d4] sm:$0xf0] }
  0x6c   : > { %1301 = vmatpush.bf16.msrb.mxu2 %v2177_v49  ;;  %1253 = vmatmul.bf16.gmra.mxu3 %v2832_v1  ;;  %v2495_v20 = vld [vmem:[%s2685_s15 + $0x324] sm:$0xf]  ;;  %v2270_v21 = vld [vmem:[%s2685_s15 + $0x330] sm:$0xf0]  ;;  %v1889_v29 = vor.u32 %v2399_v16, %v1886_v19  ;;  %v1989_v49 = vor.u32 %v2426_v41, %v1988_v40  ;;  %v2356_v58 = vld [vmem:[%s2685_s15 + $0x3c8] sm:$0xf] }
  0x6d   : > { %1263 = vmatpush.bf16.msrb.mxu0 %v1921_v3  ;;  %1320 = vmatpush.bf16.msrb.mxu3 %v2305_v4  ;;  %v2459_v23 = vld [vmem:[%s2685_s15 + $0x204] sm:$0xf]  ;;  %v2126_v24 = vld [vmem:[%s2685_s15 + $0x210] sm:$0xf0]  ;;  %v2273_v33 = vor.u32 %v2495_v20, %v2270_v21  ;;  %v2518_v61 = vld [vmem:[%s2685_s15 + $0x3d4] sm:$0xf0]  ;;  %v1973_v4 = vor.u32 %v2422_v51, %v1972_v50 }
  0x6e   : > { %v2427_v25 = vld [vmem:[%s2685_s15 + $0x104] sm:$0xf]  ;;  %v1998_v26 = vld [vmem:[%s2685_s15 + $0x110] sm:$0xf0]  ;;  %v2129_v34 = vor.u32 %v2459_v23, %v2126_v24  ;;  %v2212_v0 = vld [vmem:[%s2685_s15 + $0x2a8] sm:$0xf]  ;;  %v2357_v8 = vor.u32 %v2518_v61, %v2356_v58 }
  0x6f   : > { %1283 = vmatpush.bf16.msrb.mxu1 %v2033_v9  ;;  %v2395_v30 = vld [vmem:[%s2685_s15 + $0x4] sm:$0xf]  ;;  %v1870_v35 = vld [vmem:[%s2685_s15 + $0x10] sm:$0xf0]  ;;  %v2001_v38 = vor.u32 %v2427_v25, %v1998_v26  ;;  %v2482_v3 = vld [vmem:[%s2685_s15 + $0x2b4] sm:$0xf0] }
  0x70   : > { %1302 = vmatpush.bf16.msrb.mxu2 %v2161_v5  ;;  %v2491_v36 = vld [vmem:[%s2685_s15 + $0x304] sm:$0xf]  ;;  %v2254_v37 = vld [vmem:[%s2685_s15 + $0x310] sm:$0xf0]  ;;  %v1873_v47 = vor.u32 %v2395_v30, %v1870_v35  ;;  %v2101_v5 = vor.u32 %v2454_v56, %v2100_v55  ;;  %v1956_v6 = vld [vmem:[%s2685_s15 + $0xa8] sm:$0xf]  ;;  %v2213_v9 = vor.u32 %v2482_v3, %v2212_v0 }
  0x71   : > { %1264 = vmatpush.bf16.msrb.mxu0 %v1905_v15  ;;  %1321 = vmatpush.bf16.msrb.mxu3 %v2289_v17  ;;  %v2257_v48 = vor.u32 %v2491_v36, %v2254_v37  ;;  %v2418_v7 = vld [vmem:[%s2685_s15 + $0xb4] sm:$0xf0]  ;;  %v2084_v10 = vld [vmem:[%s2685_s15 + $0x1a8] sm:$0xf] }
  0x72   : > { %v2450_v11 = vld [vmem:[%s2685_s15 + $0x1b4] sm:$0xf0]  ;;  %v2340_v12 = vld [vmem:[%s2685_s15 + $0x3a8] sm:$0xf]  ;;  %v1957_v16 = vor.u32 %v2418_v7, %v1956_v6 }
  0x73   : > { %1284 = vmatpush.bf16.msrb.mxu1 %v2017_v22  ;;  %v2514_v13 = vld [vmem:[%s2685_s15 + $0x3b4] sm:$0xf0]  ;;  %v2196_v14 = vld [vmem:[%s2685_s15 + $0x288] sm:$0xf]  ;;  %v2085_v17 = vor.u32 %v2450_v11, %v2084_v10 }
  0x74   : > { %1303 = vmatpush.bf16.msrb.mxu2 %v2145_v18  ;;  %v2478_v15 = vld [vmem:[%s2685_s15 + $0x294] sm:$0xf0]  ;;  %v1940_v18 = vld [vmem:[%s2685_s15 + $0x88] sm:$0xf]  ;;  %v2341_v20 = vor.u32 %v2514_v13, %v2340_v12 }
  0x75   : > { %1265 = vmatpush.bf16.msrb.mxu0 %v1889_v29  ;;  %1322 = vmatpush.bf16.msrb.mxu3 %v2273_v33  ;;  %v2414_v19 = vld [vmem:[%s2685_s15 + $0x94] sm:$0xf0]  ;;  %v2197_v21 = vor.u32 %v2478_v15, %v2196_v14  ;;  %v2068_v22 = vld [vmem:[%s2685_s15 + $0x188] sm:$0xf] }
  0x76   : > { %v2446_v23 = vld [vmem:[%s2685_s15 + $0x194] sm:$0xf0]  ;;  %v2324_v24 = vld [vmem:[%s2685_s15 + $0x388] sm:$0xf]  ;;  %v1941_v28 = vor.u32 %v2414_v19, %v1940_v18 }
  0x77   : > { %1285 = vmatpush.bf16.msrb.mxu1 %v2001_v38  ;;  %v2510_v25 = vld [vmem:[%s2685_s15 + $0x394] sm:$0xf0]  ;;  %v2180_v26 = vld [vmem:[%s2685_s15 + $0x268] sm:$0xf]  ;;  %v2069_v29 = vor.u32 %v2446_v23, %v2068_v22  ;;  %v1990_v22 = vld [vmem:[%s2685_s15 + $0xf8] sm:$0xf0] }
  0x78   : > { %1304 = vmatpush.bf16.msrb.mxu2 %v2129_v34  ;;  %v2474_v27 = vld [vmem:[%s2685_s15 + $0x274] sm:$0xf0]  ;;  %v1924_v30 = vld [vmem:[%s2685_s15 + $0x68] sm:$0xf]  ;;  %v2325_v32 = vor.u32 %v2510_v25, %v2324_v24  ;;  %v2456_v23 = vld [vmem:[%s2685_s15 + $0x1ec] sm:$0xf] }
  0x79   : > { %1266 = vmatpush.bf16.msrb.mxu0 %v1873_v47  ;;  %1323 = vmatpush.bf16.msrb.mxu3 %v2257_v48  ;;  %v2410_v31 = vld [vmem:[%s2685_s15 + $0x74] sm:$0xf0]  ;;  %v2181_v33 = vor.u32 %v2474_v27, %v2180_v26  ;;  %v2052_v34 = vld [vmem:[%s2685_s15 + $0x168] sm:$0xf]  ;;  %v2118_v24 = vld [vmem:[%s2685_s15 + $0x1f8] sm:$0xf0] }
  0x7a   : > { %1286 = vmatmul.bf16.vlgmr.msrb.gmra.mxu1 %v2774_v62  ;;  %v2442_v35 = vld [vmem:[%s2685_s15 + $0x174] sm:$0xf0]  ;;  %v2308_v36 = vld [vmem:[%s2685_s15 + $0x368] sm:$0xf]  ;;  %v1925_v40 = vor.u32 %v2410_v31, %v1924_v30  ;;  %v2520_v25 = vld [vmem:[%s2685_s15 + $0x3ec] sm:$0xf] }
  0x7b   : > { %1354 = vmatpush.bf16.msra.mxu1 %v2117_v43  ;;  %1305 = vmatmul.bf16.vlgmr.msrb.gmra.mxu2 %v2776_v63  ;;  %v2506_v37 = vld [vmem:[%s2685_s15 + $0x374] sm:$0xf0]  ;;  %v2164_v38 = vld [vmem:[%s2685_s15 + $0x248] sm:$0xf]  ;;  %v2053_v41 = vor.u32 %v2442_v35, %v2052_v34  ;;  %v2374_v26 = vld [vmem:[%s2685_s15 + $0x3f8] sm:$0xf0] }
  0x7c   : > { %1373 = vmatpush.bf16.msra.mxu2 %v2245_v39  ;;  %1267 = vmatmul.bf16.vlgmr.msrb.gmra.mxu0 %v2769_v57  ;;  %v2470_v39 = vld [vmem:[%s2685_s15 + $0x254] sm:$0xf0]  ;;  %v1908_v42 = vld [vmem:[%s2685_s15 + $0x48] sm:$0xf]  ;;  %v2309_v44 = vor.u32 %v2506_v37, %v2308_v36  ;;  %v2230_v30 = vld [vmem:[%s2685_s15 + $0x2d8] sm:$0xf0]  ;;  %v2377_v34 = vor.u32 %v2520_v25, %v2374_v26 }
  0x7d   : > { %1335 = vmatpush.bf16.msra.mxu0 %v1989_v49  ;;  %1392 = vmatpush.bf16.msra.mxu3 %v2373_v52  ;;  %v2406_v43 = vld [vmem:[%s2685_s15 + $0x54] sm:$0xf0]  ;;  %v2165_v45 = vor.u32 %v2470_v39, %v2164_v38  ;;  %v2036_v46 = vld [vmem:[%s2685_s15 + $0x148] sm:$0xf]  ;;  %v2420_v35 = vld [vmem:[%s2685_s15 + $0xcc] sm:$0xf] }
  0x7e   : > { %1324 = vmatmul.bf16.vlgmr.msrb.gmra.mxu3 %v2780_v2  ;;  %v2438_v47 = vld [vmem:[%s2685_s15 + $0x154] sm:$0xf0]  ;;  %v2292_v48 = vld [vmem:[%s2685_s15 + $0x348] sm:$0xf]  ;;  %v1909_v52 = vor.u32 %v2406_v43, %v1908_v42  ;;  %v1974_v36 = vld [vmem:[%s2685_s15 + $0xd8] sm:$0xf0] }
  0x7f   : > { %1355 = vmatpush.bf16.msra.mxu1 %v2101_v5  ;;  %v2502_v49 = vld [vmem:[%s2685_s15 + $0x354] sm:$0xf0]  ;;  %v2148_v50 = vld [vmem:[%s2685_s15 + $0x228] sm:$0xf]  ;;  %v2452_v38 = vld [vmem:[%s2685_s15 + $0x1cc] sm:$0xf] }
  0x80   : > { %1374 = vmatpush.bf16.msra.mxu2 %v2229_v54  ;;  %v2466_v51 = vld [vmem:[%s2685_s15 + $0x234] sm:$0xf0]  ;;  %v2037_v54 = vor.u32 %v2438_v47, %v2036_v46  ;;  %v1892_v55 = vld [vmem:[%s2685_s15 + $0x28] sm:$0xf]  ;;  %v2293_v58 = vor.u32 %v2502_v49, %v2292_v48  ;;  %v2102_v39 = vld [vmem:[%s2685_s15 + $0x1d8] sm:$0xf0] }
  0x81   : > { %1336 = vmatpush.bf16.msra.mxu0 %v1973_v4  ;;  %1393 = vmatpush.bf16.msra.mxu3 %v2357_v8  ;;  %v2402_v56 = vld [vmem:[%s2685_s15 + $0x34] sm:$0xf0]  ;;  %v2149_v61 = vor.u32 %v2466_v51, %v2148_v50  ;;  %v2020_v0 = vld [vmem:[%s2685_s15 + $0x128] sm:$0xf]  ;;  %v2488_v8 = vld [vmem:[%s2685_s15 + $0x2ec] sm:$0xf]  ;;  %v2105_v47 = vor.u32 %v2452_v38, %v2102_v39 }
  0x82   : > { %v2434_v3 = vld [vmem:[%s2685_s15 + $0x134] sm:$0xf0]  ;;  %v2276_v4 = vld [vmem:[%s2685_s15 + $0x328] sm:$0xf]  ;;  %v1893_v10 = vor.u32 %v2402_v56, %v1892_v55  ;;  %v2358_v42 = vld [vmem:[%s2685_s15 + $0x3d8] sm:$0xf0] }
  0x83   : > { %1356 = vmatpush.bf16.msra.mxu1 %v2085_v17  ;;  %v2498_v5 = vld [vmem:[%s2685_s15 + $0x334] sm:$0xf0]  ;;  %v2132_v6 = vld [vmem:[%s2685_s15 + $0x208] sm:$0xf]  ;;  %v2021_v11 = vor.u32 %v2434_v3, %v2020_v0  ;;  %v2480_v43 = vld [vmem:[%s2685_s15 + $0x2ac] sm:$0xf] }
  0x84   : > { %1375 = vmatpush.bf16.msra.mxu2 %v2213_v9  ;;  %v2462_v7 = vld [vmem:[%s2685_s15 + $0x214] sm:$0xf0]  ;;  %v2246_v9 = vld [vmem:[%s2685_s15 + $0x2f8] sm:$0xf0]  ;;  %v1876_v12 = vld [vmem:[%s2685_s15 + $0x8] sm:$0xf]  ;;  %v2277_v15 = vor.u32 %v2498_v5, %v2276_v4 }
  0x85   : > { %1337 = vmatpush.bf16.msra.mxu0 %v1957_v16  ;;  %1394 = vmatpush.bf16.msra.mxu3 %v2341_v20  ;;  %v2398_v13 = vld [vmem:[%s2685_s15 + $0x14] sm:$0xf0]  ;;  %v2004_v14 = vld [vmem:[%s2685_s15 + $0x108] sm:$0xf]  ;;  %v2133_v16 = vor.u32 %v2462_v7, %v2132_v6  ;;  %v2249_v20 = vor.u32 %v2488_v8, %v2246_v9  ;;  %v1958_v46 = vld [vmem:[%s2685_s15 + $0xb8] sm:$0xf0] }
  0x86   : > { %v2430_v17 = vld [vmem:[%s2685_s15 + $0x114] sm:$0xf0]  ;;  %v2260_v18 = vld [vmem:[%s2685_s15 + $0x308] sm:$0xf]  ;;  %v1877_v27 = vor.u32 %v2398_v13, %v1876_v12  ;;  %v2448_v49 = vld [vmem:[%s2685_s15 + $0x1ac] sm:$0xf] }
  0x87   : > { %1357 = vmatpush.bf16.msra.mxu1 %v2069_v29  ;;  %v2494_v19 = vld [vmem:[%s2685_s15 + $0x314] sm:$0xf0]  ;;  %v2484_v29 = vld [vmem:[%s2685_s15 + $0x2cc] sm:$0xf]  ;;  %v2086_v50 = vld [vmem:[%s2685_s15 + $0x1b8] sm:$0xf0] }
  0x88   : > { %1376 = vmatpush.bf16.msra.mxu2 %v2197_v21  ;;  %v2424_v21 = vld [vmem:[%s2685_s15 + $0xec] sm:$0xf]  ;;  %v2261_v31 = vor.u32 %v2494_v19, %v2260_v18  ;;  %v2233_v37 = vor.u32 %v2484_v29, %v2230_v30  ;;  %v2342_v55 = vld [vmem:[%s2685_s15 + $0x3b8] sm:$0xf0]  ;;  %v2089_v3 = vor.u32 %v2448_v49, %v2086_v50 }
  0x89   : > { %1338 = vmatpush.bf16.msra.mxu0 %v1941_v28  ;;  %1395 = vmatpush.bf16.msra.mxu3 %v2325_v32  ;;  %v2005_v28 = vor.u32 %v2430_v17, %v2004_v14  ;;  %v1993_v32 = vor.u32 %v2424_v21, %v1990_v22  ;;  %v2476_v56 = vld [vmem:[%s2685_s15 + $0x28c] sm:$0xf]  ;;  %v1942_v0 = vld [vmem:[%s2685_s15 + $0x98] sm:$0xf0] }
  0x8a   : > { %1291 = vmatmul.bf16.gmra.mxu1 %v2826_v59  ;;  %v2444_v5 = vld [vmem:[%s2685_s15 + $0x18c] sm:$0xf]  ;;  %v2070_v6 = vld [vmem:[%s2685_s15 + $0x198] sm:$0xf0] }
  0x8b   : > { %1358 = vmatpush.bf16.msra.mxu1 %v2053_v41  ;;  %1310 = vmatmul.bf16.gmra.mxu2 %v2828_v60  ;;  %v2516_v41 = vld [vmem:[%s2685_s15 + $0x3cc] sm:$0xf]  ;;  %v2182_v12 = vld [vmem:[%s2685_s15 + $0x278] sm:$0xf0] }
  0x8c   : > { %1377 = vmatpush.bf16.msra.mxu2 %v2181_v33  ;;  %1272 = vmatmul.bf16.gmra.mxu0 %v2821_v53  ;;  %v2121_v33 = vor.u32 %v2456_v23, %v2118_v24  ;;  %v2361_v48 = vor.u32 %v2516_v41, %v2358_v42  ;;  %v2508_v9 = vld [vmem:[%s2685_s15 + $0x38c] sm:$0xf]  ;;  %v1926_v14 = vld [vmem:[%s2685_s15 + $0x78] sm:$0xf0] }
  0x8d   : > { %1339 = vmatpush.bf16.msra.mxu0 %v1925_v40  ;;  %1396 = vmatpush.bf16.msra.mxu3 %v2309_v44  ;;  %v1977_v40 = vor.u32 %v2420_v35, %v1974_v36  ;;  %v2214_v44 = vld [vmem:[%s2685_s15 + $0x2b8] sm:$0xf0]  ;;  %v2408_v13 = vld [vmem:[%s2685_s15 + $0x6c] sm:$0xf] }
  0x8e   : > { %1329 = vmatmul.bf16.gmra.mxu3 %v2832_v1  ;;  %v2217_v51 = vor.u32 %v2480_v43, %v2214_v44  ;;  %v2440_v17 = vld [vmem:[%s2685_s15 + $0x16c] sm:$0xf]  ;;  %v2054_v18 = vld [vmem:[%s2685_s15 + $0x178] sm:$0xf0] }
  0x8f   : > { %1359 = vmatpush.bf16.msra.mxu1 %v2037_v54  ;;  %v2512_v54 = vld [vmem:[%s2685_s15 + $0x3ac] sm:$0xf]  ;;  %v2310_v22 = vld [vmem:[%s2685_s15 + $0x378] sm:$0xf0] }
  0x90   : > { %1378 = vmatpush.bf16.msra.mxu2 %v2165_v45  ;;  %v2416_v45 = vld [vmem:[%s2685_s15 + $0xac] sm:$0xf]  ;;  %v2345_v4 = vor.u32 %v2512_v54, %v2342_v55  ;;  %v2166_v24 = vld [vmem:[%s2685_s15 + $0x258] sm:$0xf0] }
  0x91   : > { %1340 = vmatpush.bf16.msra.mxu0 %v1909_v52  ;;  %1397 = vmatpush.bf16.msra.mxu3 %v2293_v58  ;;  %v1961_v52 = vor.u32 %v2416_v45, %v1958_v46  ;;  %v2198_v58 = vld [vmem:[%s2685_s15 + $0x298] sm:$0xf0]  ;;  %v2504_v21 = vld [vmem:[%s2685_s15 + $0x36c] sm:$0xf] }
  0x92   : > { %v2201_v7 = vor.u32 %v2476_v56, %v2198_v58  ;;  %v2468_v23 = vld [vmem:[%s2685_s15 + $0x24c] sm:$0xf]  ;;  %v1910_v26 = vld [vmem:[%s2685_s15 + $0x58] sm:$0xf0] }
  0x93   : > { %1360 = vmatpush.bf16.msra.mxu1 %v2021_v11  ;;  %v2472_v11 = vld [vmem:[%s2685_s15 + $0x26c] sm:$0xf]  ;;  %v2038_v30 = vld [vmem:[%s2685_s15 + $0x158] sm:$0xf0] }
  0x94   : > { %1379 = vmatpush.bf16.msra.mxu2 %v2149_v61  ;;  %v2412_v61 = vld [vmem:[%s2685_s15 + $0x8c] sm:$0xf]  ;;  %v2185_v19 = vor.u32 %v2472_v11, %v2182_v12  ;;  %v2150_v36 = vld [vmem:[%s2685_s15 + $0x238] sm:$0xf0] }
  0x95   : > { %1341 = vmatpush.bf16.msra.mxu0 %v1893_v10  ;;  %1398 = vmatpush.bf16.msra.mxu3 %v2277_v15  ;;  %v1945_v8 = vor.u32 %v2412_v61, %v1942_v0  ;;  %v2326_v10 = vld [vmem:[%s2685_s15 + $0x398] sm:$0xf0]  ;;  %v2073_v15 = vor.u32 %v2444_v5, %v2070_v6  ;;  %v2404_v25 = vld [vmem:[%s2685_s15 + $0x4c] sm:$0xf] }
  0x96   : > { %v2436_v29 = vld [vmem:[%s2685_s15 + $0x14c] sm:$0xf]  ;;  %v1894_v38 = vld [vmem:[%s2685_s15 + $0x38] sm:$0xf0] }
  0x97   : > { %1361 = vmatpush.bf16.msra.mxu1 %v2005_v28  ;;  %v2313_v28 = vor.u32 %v2504_v21, %v2310_v22  ;;  %v2464_v35 = vld [vmem:[%s2685_s15 + $0x22c] sm:$0xf]  ;;  %v2041_v39 = vor.u32 %v2436_v29, %v2038_v30  ;;  %v2022_v42 = vld [vmem:[%s2685_s15 + $0x138] sm:$0xf0]  ;;  %v359_v22 = vld [vmem:[#allocation2 + $0x40] sm:$0xff] }
  0x98   : > { %1380 = vmatpush.bf16.msra.mxu2 %v2133_v16  ;;  %v2329_v16 = vor.u32 %v2508_v9, %v2326_v10  ;;  %v2432_v41 = vld [vmem:[%s2685_s15 + $0x12c] sm:$0xf]  ;;  %v2153_v43 = vor.u32 %v2464_v35, %v2150_v36  ;;  %v2278_v46 = vld [vmem:[%s2685_s15 + $0x338] sm:$0xf0]  ;;  %v363_v30 = vld [vmem:[#allocation2 + $0x60] sm:$0xff] }
  0x99   : > { %1342 = vmatpush.bf16.msra.mxu0 %v1877_v27  ;;  %1399 = vmatpush.bf16.msra.mxu3 %v2261_v31  ;;  %v2057_v27 = vor.u32 %v2440_v17, %v2054_v18  ;;  %v2169_v31 = vor.u32 %v2468_v23, %v2166_v24  ;;  %v2496_v45 = vld [vmem:[%s2685_s15 + $0x32c] sm:$0xf]  ;;  %v1878_v50 = vld [vmem:[%s2685_s15 + $0x18] sm:$0xf0] }
  0x9a   : > { %1362 = vmatmul.bf16.vlgmr.msra.gmra.mxu1 %v2774_v62  ;;  %v2396_v49 = vld [vmem:[%s2685_s15 + $0xc] sm:$0xf]  ;;  %v2006_v58 = vld [vmem:[%s2685_s15 + $0x118] sm:$0xf0] }
  0x9b   : > { %1430 = vmatpush.bf16.msrb.mxu1 %v2121_v33  ;;  %1381 = vmatmul.bf16.vlgmr.msra.gmra.mxu2 %v2776_v63  ;;  %v2500_v33 = vld [vmem:[%s2685_s15 + $0x34c] sm:$0xf]  ;;  %v1881_v56 = vor.u32 %v2396_v49, %v1878_v50  ;;  %v2262_v0 = vld [vmem:[%s2685_s15 + $0x318] sm:$0xf0] }
  0x9c   : > { %1449 = vmatpush.bf16.msrb.mxu2 %v2249_v20  ;;  %1343 = vmatmul.bf16.vlgmr.msra.gmra.mxu0 %v2769_v57  ;;  %v1929_v20 = vor.u32 %v2408_v13, %v1926_v14  ;;  %v2428_v54 = vld [vmem:[%s2685_s15 + $0x10c] sm:$0xf] }
  0x9d   : > { %1411 = vmatpush.bf16.msrb.mxu0 %v1993_v32  ;;  %1468 = vmatpush.bf16.msrb.mxu3 %v2377_v34  ;;  %v1913_v32 = vor.u32 %v2404_v25, %v1910_v26  ;;  %v2294_v34 = vld [vmem:[%s2685_s15 + $0x358] sm:$0xf0]  ;;  %v2492_v61 = vld [vmem:[%s2685_s15 + $0x30c] sm:$0xf] }
  0x9e   : > { %1400 = vmatmul.bf16.vlgmr.msra.gmra.mxu3 %v2780_v2  ;;  %v356_v50 = vld [vmem:[#allocation2 + $0x68] sm:$0xff] }
  0x9f   : > { %1431 = vmatpush.bf16.msrb.mxu1 %v2105_v47  ;;  %v2460_v47 = vld [vmem:[%s2685_s15 + $0x20c] sm:$0xf] }
  0xa0   : > { %1450 = vmatpush.bf16.msrb.mxu2 %v2233_v37  ;;  %v2400_v37 = vld [vmem:[%s2685_s15 + $0x2c] sm:$0xf] }
  0xa1   : > { %1412 = vmatpush.bf16.msrb.mxu0 %v1977_v40  ;;  %1469 = vmatpush.bf16.msrb.mxu3 %v2361_v48  ;;  %v2297_v40 = vor.u32 %v2500_v33, %v2294_v34  ;;  %v1897_v44 = vor.u32 %v2400_v37, %v1894_v38  ;;  %v2134_v48 = vld [vmem:[%s2685_s15 + $0x218] sm:$0xf0] }
  0xa2   : > { %v2137_v55 = vor.u32 %v2460_v47, %v2134_v48 }
  0xa3   : > { %1432 = vmatpush.bf16.msrb.mxu1 %v2089_v3  ;;  %v2009_v3 = vor.u32 %v2428_v54, %v2006_v58 }
  0xa4   : > { %1451 = vmatpush.bf16.msrb.mxu2 %v2217_v51  ;;  %v2025_v51 = vor.u32 %v2432_v41, %v2022_v42  ;;  %v352_v41 = vld [vmem:[#allocation2] sm:$0xff] }
  0xa5   : > { %1413 = vmatpush.bf16.msrb.mxu0 %v1961_v52  ;;  %1470 = vmatpush.bf16.msrb.mxu3 %v2345_v4  ;;  %v2281_v52 = vor.u32 %v2496_v45, %v2278_v46  ;;  %v2265_v4 = vor.u32 %v2492_v61, %v2262_v0 }
  0xa7   : > { %1433 = vmatpush.bf16.msrb.mxu1 %v2073_v15 }
  0xa8   : > { %1452 = vmatpush.bf16.msrb.mxu2 %v2201_v7 }
  0xa9   : > { %1414 = vmatpush.bf16.msrb.mxu0 %v1945_v8  ;;  %1471 = vmatpush.bf16.msrb.mxu3 %v2329_v16 }
  0xaa   : > { %1367 = vmatmul.bf16.gmra.mxu1 %v2826_v59 }
  0xab   : > { %1434 = vmatpush.bf16.msrb.mxu1 %v2057_v27  ;;  %1386 = vmatmul.bf16.gmra.mxu2 %v2828_v60 }
  0xac   : > { %1453 = vmatpush.bf16.msrb.mxu2 %v2185_v19  ;;  %1348 = vmatmul.bf16.gmra.mxu0 %v2821_v53 }
  0xad   : > { %1415 = vmatpush.bf16.msrb.mxu0 %v1929_v20  ;;  %1472 = vmatpush.bf16.msrb.mxu3 %v2313_v28 }
  0xae   : > { %1405 = vmatmul.bf16.gmra.mxu3 %v2832_v1 }
  0xaf   : > { %1435 = vmatpush.bf16.msrb.mxu1 %v2041_v39 }
  0xb0   : > { %1454 = vmatpush.bf16.msrb.mxu2 %v2169_v31 }
  0xb1   : > { %1416 = vmatpush.bf16.msrb.mxu0 %v1913_v32  ;;  %1473 = vmatpush.bf16.msrb.mxu3 %v2297_v40 }
  0xb3   : > { %1436 = vmatpush.bf16.msrb.mxu1 %v2025_v51 }
  0xb4   : > { %1455 = vmatpush.bf16.msrb.mxu2 %v2153_v43 }
  0xb5   : > { %1417 = vmatpush.bf16.msrb.mxu0 %v1897_v44  ;;  %1474 = vmatpush.bf16.msrb.mxu3 %v2281_v52 }
  0xb7   : > { %1437 = vmatpush.bf16.msrb.mxu1 %v2009_v3  ;;  %v360_v3 = vld [vmem:[#allocation2 + $0x20] sm:$0xff] }
  0xb8   : > { %1456 = vmatpush.bf16.msrb.mxu2 %v2137_v55 }
  0xb9   : > { %1418 = vmatpush.bf16.msrb.mxu0 %v1881_v56  ;;  %1475 = vmatpush.bf16.msrb.mxu3 %v2265_v4 }
  0xba   : > { %1438 = vmatmul.bf16.vlgmr.msrb.gmra.mxu1 %v2774_v62  ;;  %v351_v62 = vld [vmem:[#allocation2 + $0x30] sm:$0xff] }
  0xbb   : > { %1457 = vmatmul.bf16.vlgmr.msrb.gmra.mxu2 %v2776_v63 }
  0xbc   : > { %1419 = vmatmul.bf16.vlgmr.msrb.gmra.mxu0 %v2769_v57 }
  0xbe   : > { %1476 = vmatmul.bf16.vlgmr.msrb.gmra.mxu3 %v2780_v2 }
  0xca   : > { %1443 = vmatmul.bf16.gmra.mxu1 %v2826_v59 }
  0xcb   : > { %1462 = vmatmul.bf16.gmra.mxu2 %v2828_v60  ;;  %v355_v60 = vld [vmem:[#allocation2 + $0x50] sm:$0xff] }
  0xcc   : > { %1424 = vmatmul.bf16.gmra.mxu0 %v2821_v53 }
  0xce   : > { %1481 = vmatmul.bf16.gmra.mxu3 %v2832_v1 }
  0xd7   : > { %v1192_v5 = vpop.f32.mrf.mxu0  ;;  %v1211_v6 = vpop.f32.mrf.mxu1 }
  0xd8   : > { %v1212_v7 = vadd.f32 %v1211_v6, %v1192_v5 }
  0xde   : > { %v1230_v8 = vpop.f32.mrf.mxu2 }
  0xdf   : > { %v1231_v9 = vadd.f32 %v1230_v8, %v1212_v7  ;;  %v1249_v57 = vpop.f32.mrf.mxu3  ;;  %v1194_v10 = vpop.f32.mrf.mxu0 }
  0xe0   : > { %v1213_v11 = vpop.f32.mrf.mxu1 }
  0xe1   : > { %v1250_v63 = vadd.f32 %v1249_v57, %v1231_v9  ;;  %v1214_v2 = vadd.f32 %v1213_v11, %v1194_v10 }
  0xe3   : > { %v1487_v12 = vadd.f32 %v1250_v63, %v351_v62  ;;  %v364_v62 = vld [vmem:[#allocation2 + $0x70] sm:$0xff] }
  0xe5   : > { %1503 = vst [vmem:[#allocation2 + $0x30] sm:$0xff] %v1487_v12 }
  0xe6   : > { %v1232_v53 = vpop.f32.mrf.mxu2 }
  0xe7   : > { %v1233_v13 = vadd.f32 %v1232_v53, %v1214_v2  ;;  %v1251_v59 = vpop.f32.mrf.mxu3  ;;  %v1197_v14 = vpop.f32.mrf.mxu0 }
  0xe8   : > { %v1216_v15 = vpop.f32.mrf.mxu1 }
  0xe9   : > { %v1252_v1 = vadd.f32 %v1251_v59, %v1233_v13  ;;  %v1217_v17 = vadd.f32 %v1216_v15, %v1197_v14 }
  0xeb   : > { %v1491_v16 = vadd.f32 %v1252_v1, %v355_v60  ;;  %v353_v60 = vld [vmem:[#allocation2 + $0x58] sm:$0xff] }
  0xed   : > { %1507 = vst [vmem:[#allocation2 + $0x50] sm:$0xff] %v1491_v16 }
  0xee   : > { %v1235_v18 = vpop.f32.mrf.mxu2 }
  0xef   : > { %v1236_v19 = vadd.f32 %v1235_v18, %v1217_v17  ;;  %v1254_v20 = vpop.f32.mrf.mxu3  ;;  %v1199_v21 = vpop.f32.mrf.mxu0 }
  0xf0   : > { %v1218_v23 = vpop.f32.mrf.mxu1 }
  0xf1   : > { %v1255_v24 = vadd.f32 %v1254_v20, %v1236_v19  ;;  %v1219_v26 = vadd.f32 %v1218_v23, %v1199_v21 }
  0xf3   : > { %v1495_v25 = vadd.f32 %v1255_v24, %v359_v22  ;;  %v357_v22 = vld [vmem:[#allocation2 + $0x8] sm:$0xff] }
  0xf5   : > { %1511 = vst [vmem:[#allocation2 + $0x40] sm:$0xff] %v1495_v25 }
  0xf6   : > { %v1237_v27 = vpop.f32.mrf.mxu2 }
  0xf7   : > { %v1238_v28 = vadd.f32 %v1237_v27, %v1219_v26  ;;  %v1256_v29 = vpop.f32.mrf.mxu3 }
  0xf8   : > { %v1287_v32 = vpop.f32.mrf.mxu1 }
  0xf9   : > { %v1268_v31 = vpop.f32.mrf.mxu0  ;;  %v1257_v33 = vadd.f32 %v1256_v29, %v1238_v28 }
  0xfa   : > { %v1288_v35 = vadd.f32 %v1287_v32, %v1268_v31  ;;  %v361_v31 = vld [vmem:[#allocation2 + $0x10] sm:$0xff] }
  0xfb   : > { %v1499_v34 = vadd.f32 %v1257_v33, %v363_v30 }
  0xfd   : > { %1515 = vst [vmem:[#allocation2 + $0x60] sm:$0xff] %v1499_v34 }
  0xfe   : > { %v1306_v36 = vpop.f32.mrf.mxu2 }
  0xff   : > { %v1307_v38 = vadd.f32 %v1306_v36, %v1288_v35 }
 0x100   : > { %v1289_v40 = vpop.f32.mrf.mxu1 }
 0x101   : > { %v1325_v37 = vpop.f32.mrf.mxu3  ;;  %v1270_v39 = vpop.f32.mrf.mxu0 }
 0x102   : > { %v1326_v42 = vadd.f32 %v1325_v37, %v1307_v38  ;;  %v1290_v44 = vadd.f32 %v1289_v40, %v1270_v39  ;;  %v365_v40 = vld [vmem:[#allocation2 + $0x78] sm:$0xff] }
 0x104   : > { %v1488_v43 = vadd.f32 %v1326_v42, %v352_v41 }
 0x106   : > { %1504 = vst [vmem:[#allocation2] sm:$0xff] %v1488_v43  ;;  %v1308_v45 = vpop.f32.mrf.mxu2 }
 0x107   : > { %v1309_v47 = vadd.f32 %v1308_v45, %v1290_v44 }
 0x108   : > { %v1292_v49 = vpop.f32.mrf.mxu1 }
 0x109   : > { %v1327_v46 = vpop.f32.mrf.mxu3  ;;  %v1273_v48 = vpop.f32.mrf.mxu0 }
 0x10a   : > { %v1328_v51 = vadd.f32 %v1327_v46, %v1309_v47  ;;  %v1293_v54 = vadd.f32 %v1292_v49, %v1273_v48  ;;  %v354_v49 = vld [vmem:[#allocation2 + $0x18] sm:$0xff] }
 0x10c   : > { %v1492_v52 = vadd.f32 %v1328_v51, %v356_v50 }
 0x10e   : > { %1508 = vst [vmem:[#allocation2 + $0x68] sm:$0xff] %v1492_v52  ;;  %v1311_v55 = vpop.f32.mrf.mxu2 }
 0x10f   : > { %v1312_v58 = vadd.f32 %v1311_v55, %v1293_v54 }
 0x110   : > { %v1294_v0 = vpop.f32.mrf.mxu1 }
 0x111   : > { %v1330_v56 = vpop.f32.mrf.mxu3  ;;  %v1275_v61 = vpop.f32.mrf.mxu0 }
 0x112   : > { %v1331_v4 = vadd.f32 %v1330_v56, %v1312_v58  ;;  %v1295_v6 = vadd.f32 %v1294_v0, %v1275_v61  ;;  %v358_v58 = vld [vmem:[#allocation2 + $0x48] sm:$0xff] }
 0x114   : > { %v1496_v5 = vadd.f32 %v1331_v4, %v360_v3 }
 0x116   : > { %1512 = vst [vmem:[#allocation2 + $0x20] sm:$0xff] %v1496_v5  ;;  %v1313_v7 = vpop.f32.mrf.mxu2 }
 0x117   : > { %v1314_v9 = vadd.f32 %v1313_v7, %v1295_v6 }
 0x118   : > { %v1363_v10 = vpop.f32.mrf.mxu1 }
 0x119   : > { %v1332_v8 = vpop.f32.mrf.mxu3  ;;  %v1344_v57 = vpop.f32.mrf.mxu0 }
 0x11a   : > { %v1333_v11 = vadd.f32 %v1332_v8, %v1314_v9  ;;  %v1364_v12 = vadd.f32 %v1363_v10, %v1344_v57  ;;  %v362_v9 = vld [vmem:[#allocation2 + $0x38] sm:$0xff] }
 0x11c   : > { %v1500_v63 = vadd.f32 %v1333_v11, %v364_v62 }
 0x11e   : > { %1516 = vst [vmem:[#allocation2 + $0x70] sm:$0xff] %v1500_v63  ;;  %v1382_v2 = vpop.f32.mrf.mxu2 }
 0x11f   : > { %v1383_v13 = vadd.f32 %v1382_v2, %v1364_v12 }
 0x120   : > { %v1365_v14 = vpop.f32.mrf.mxu1 }
 0x121   : > { %v1401_v53 = vpop.f32.mrf.mxu3  ;;  %v1346_v59 = vpop.f32.mrf.mxu0 }
 0x122   : > { %v1402_v15 = vadd.f32 %v1401_v53, %v1383_v13  ;;  %v1366_v16 = vadd.f32 %v1365_v14, %v1346_v59  ;;  %v366_v53 = vld [vmem:[#allocation2 + $0x28] sm:$0xff] }
 0x124   : > { %v1489_v1 = vadd.f32 %v1402_v15, %v353_v60 }
 0x126   : > { %1505 = vst [vmem:[#allocation2 + $0x58] sm:$0xff] %v1489_v1  ;;  %v1384_v17 = vpop.f32.mrf.mxu2 }
 0x127   : > { %v1385_v19 = vadd.f32 %v1384_v17, %v1366_v16 }
 0x128   : > { %v1368_v21 = vpop.f32.mrf.mxu1 }
 0x129   : > { %v1403_v18 = vpop.f32.mrf.mxu3  ;;  %v1349_v20 = vpop.f32.mrf.mxu0 }
 0x12a   : > { %v1404_v23 = vadd.f32 %v1403_v18, %v1385_v19  ;;  %v1369_v25 = vadd.f32 %v1368_v21, %v1349_v20 }
 0x12c   : > { %v1493_v24 = vadd.f32 %v1404_v23, %v357_v22 }
 0x12e   : > { %1509 = vst [vmem:[#allocation2 + $0x8] sm:$0xff] %v1493_v24  ;;  %v1387_v26 = vpop.f32.mrf.mxu2 }
 0x12f   : > { %v1388_v28 = vadd.f32 %v1387_v26, %v1369_v25 }
 0x130   : > { %v1370_v30 = vpop.f32.mrf.mxu1 }
 0x131   : > { %v1406_v27 = vpop.f32.mrf.mxu3  ;;  %v1351_v29 = vpop.f32.mrf.mxu0 }
 0x132   : > { %v1407_v32 = vadd.f32 %v1406_v27, %v1388_v28  ;;  %v1371_v34 = vadd.f32 %v1370_v30, %v1351_v29 }
 0x134   : > { %v1497_v33 = vadd.f32 %v1407_v32, %v361_v31 }
 0x136   : > { %1513 = vst [vmem:[#allocation2 + $0x10] sm:$0xff] %v1497_v33  ;;  %v1389_v35 = vpop.f32.mrf.mxu2 }
 0x137   : > { %v1390_v37 = vadd.f32 %v1389_v35, %v1371_v34 }
 0x138   : > { %v1439_v39 = vpop.f32.mrf.mxu1 }
 0x139   : > { %v1408_v36 = vpop.f32.mrf.mxu3  ;;  %v1420_v38 = vpop.f32.mrf.mxu0 }
 0x13a   : > { %v1409_v41 = vadd.f32 %v1408_v36, %v1390_v37  ;;  %v1440_v43 = vadd.f32 %v1439_v39, %v1420_v38 }
 0x13c   : > { %v1501_v42 = vadd.f32 %v1409_v41, %v365_v40 }
 0x13e   : > { %1517 = vst [vmem:[#allocation2 + $0x78] sm:$0xff] %v1501_v42  ;;  %v1458_v44 = vpop.f32.mrf.mxu2 }
 0x13f   : > { %v1459_v46 = vadd.f32 %v1458_v44, %v1440_v43 }
 0x140   : > { %v1441_v48 = vpop.f32.mrf.mxu1 }
 0x141   : > { %v1477_v45 = vpop.f32.mrf.mxu3  ;;  %v1422_v47 = vpop.f32.mrf.mxu0 }
 0x142   : > { %v1478_v50 = vadd.f32 %v1477_v45, %v1459_v46  ;;  %v1442_v52 = vadd.f32 %v1441_v48, %v1422_v47 }
 0x144   : > { %v1490_v51 = vadd.f32 %v1478_v50, %v354_v49 }
 0x146   : > { %1506 = vst [vmem:[#allocation2 + $0x18] sm:$0xff] %v1490_v51  ;;  %v1460_v54 = vpop.f32.mrf.mxu2 }
 0x147   : > { %v1461_v56 = vadd.f32 %v1460_v54, %v1442_v52 }
 0x148   : > { %v1444_v0 = vpop.f32.mrf.mxu1 }
 0x149   : > { %v1479_v55 = vpop.f32.mrf.mxu3  ;;  %v1425_v61 = vpop.f32.mrf.mxu0 }
 0x14a   : > { %v1480_v3 = vadd.f32 %v1479_v55, %v1461_v56  ;;  %v1445_v5 = vadd.f32 %v1444_v0, %v1425_v61 }
 0x14c   : > { %v1494_v4 = vadd.f32 %v1480_v3, %v358_v58 }
 0x14e   : > { %1510 = vst [vmem:[#allocation2 + $0x48] sm:$0xff] %v1494_v4  ;;  %v1463_v6 = vpop.f32.mrf.mxu2 }
 0x14f   : > { %v1464_v8 = vadd.f32 %v1463_v6, %v1445_v5 }
 0x150   : > { %v1446_v62 = vpop.f32.mrf.mxu1 }
 0x151   : > { %v1482_v7 = vpop.f32.mrf.mxu3  ;;  %v1427_v10 = vpop.f32.mrf.mxu0 }
 0x152   : > { %v1483_v57 = vadd.f32 %v1482_v7, %v1464_v8  ;;  %v1447_v63 = vadd.f32 %v1446_v62, %v1427_v10 }
 0x154   : > { %v1498_v11 = vadd.f32 %v1483_v57, %v362_v9 }
 0x156   : > { %1514 = vst [vmem:[#allocation2 + $0x38] sm:$0xff] %v1498_v11  ;;  %v1465_v12 = vpop.f32.mrf.mxu2 }
 0x157   : > { %v1466_v2 = vadd.f32 %v1465_v12, %v1447_v63 }
 0x159   : > { %v1484_v13 = vpop.f32.mrf.mxu3 }
 0x15a   : > { %v1485_v59 = vadd.f32 %v1484_v13, %v1466_v2  ;;  %1522 = sbr.rel (%p2378_p11) target bundleno = 388 (0x184), region = 63 }
 0x15c   : > { %v1502_v14 = vadd.f32 %v1485_v59, %v366_v53 }
 0x15e   : > { %1518 = vst [vmem:[#allocation2 + $0x28] sm:$0xff] %v1502_v14 }
 0x15f   : > { %v1523_v60 = vld [vmem:[#allocation2 + $0x30] sm:$0xff]  ;;  %v1539_v15 = vld [vmem:[%s3106_s2] sm:$0xf]  ;;  %v1525_v18 = vld [vmem:[#allocation2 + $0x58] sm:$0xff] }
 0x160   : > { %v1524_v1 = vld [vmem:[#allocation2] sm:$0xff]  ;;  %v1541_v16 = vperm.slane %v1539_v15, 0  ;;  %v1542_v17 = vperm.slane %v1539_v15, 1  ;;  %v1543_v19 = vperm.slane %v1539_v15, 2  ;;  %v1526_v20 = vld [vmem:[#allocation2 + $0x18] sm:$0xff]  ;;  %v1544_v21 = vperm.slane %v1539_v15, 3 }
 0x161   : > { %v1527_v22 = vld [vmem:[#allocation2 + $0x50] sm:$0xff]  ;;  %v1528_v23 = vld [vmem:[#allocation2 + $0x68] sm:$0xff]  ;;  %v1531_v34 = vld [vmem:[#allocation2 + $0x40] sm:$0xff] }
 0x162   : > { %v1529_v24 = vld [vmem:[#allocation2 + $0x8] sm:$0xff]  ;;  %v1549_v25 = vadd.f32 %v1541_v16, %v1523_v60  ;;  %v1550_v26 = vadd.f32 %v1542_v17, %v1524_v1  ;;  %v1551_v27 = vadd.f32 %v1543_v19, %v1525_v18  ;;  %v1552_v28 = vadd.f32 %v1544_v21, %v1526_v20  ;;  %v1532_v35 = vld [vmem:[#allocation2 + $0x20] sm:$0xff]  ;;  %v1533_v40 = vld [vmem:[#allocation2 + $0x10] sm:$0xff] }
 0x163   : > { %v1530_v29 = vld [vmem:[#allocation2 + $0x48] sm:$0xff]  ;;  %v1553_v30 = vadd.f32 %v1541_v16, %v1527_v22  ;;  %v1554_v31 = vadd.f32 %v1542_v17, %v1528_v23  ;;  %v1555_v32 = vadd.f32 %v1543_v19, %v1529_v24  ;;  %v1534_v41 = vld [vmem:[#allocation2 + $0x38] sm:$0xff]  ;;  %v1535_v42 = vld [vmem:[#allocation2 + $0x60] sm:$0xff]  ;;  %v1557_v55 = vadd.f32 %v1541_v16, %v1531_v34 }
 0x164   : > { %v1556_v33 = vadd.f32 %v1544_v21, %v1530_v29  ;;  %1565 = vst [vmem:[%s3107_s3] sm:$0xff] %v1549_v25  ;;  %v1617_v36 = vmul.f32 %v1549_v25, %v1549_v25  ;;  %v1618_v37 = vmul.f32 %v1550_v26, %v1550_v26  ;;  %v1619_v38 = vmul.f32 %v1551_v27, %v1551_v27  ;;  %v1536_v47 = vld [vmem:[#allocation2 + $0x70] sm:$0xff]  ;;  %v1537_v48 = vld [vmem:[#allocation2 + $0x78] sm:$0xff] }
 0x165   : > { %v3017_v39 = vmul.f32 %v1552_v28, %v1552_v28  ;;  %1566 = vst [vmem:[%s3107_s3 + $0x8] sm:$0xff] %v1550_v26  ;;  %v1581_v43 = vadd.f32 %v1553_v30, %v1549_v25  ;;  %v1621_v44 = vmul.f32 %v1553_v30, %v1553_v30  ;;  %v1590_v45 = vadd.f32 %v1554_v31, %v1550_v26  ;;  %v1538_v49 = vld [vmem:[#allocation2 + $0x28] sm:$0xff] }
 0x166   : > { %v1622_v46 = vmul.f32 %v1554_v31, %v1554_v31  ;;  %1567 = vst [vmem:[%s3107_s3 + $0x10] sm:$0xff] %v1551_v27  ;;  %v1599_v50 = vadd.f32 %v1555_v32, %v1551_v27  ;;  %v1623_v51 = vmul.f32 %v1555_v32, %v1555_v32  ;;  %v1608_v52 = vadd.f32 %v1556_v33, %v1552_v28 }
 0x167   : > { %v1624_v54 = vmul.f32 %v1556_v33, %v1556_v33  ;;  %1568 = vst [vmem:[%s3107_s3 + $0x18] sm:$0xff] %v1552_v28  ;;  %v1558_v56 = vadd.f32 %v1542_v17, %v1532_v35  ;;  %v1559_v58 = vadd.f32 %v1543_v19, %v1533_v40  ;;  %v1560_v61 = vadd.f32 %v1544_v21, %v1534_v41 }
 0x168   : > { %1569 = vst [vmem:[%s3107_s3 + $0x20] sm:$0xff] %v1553_v30  ;;  %v1561_v0 = vadd.f32 %v1541_v16, %v1535_v42  ;;  %v1562_v3 = vadd.f32 %v1542_v17, %v1536_v47  ;;  %v1563_v4 = vadd.f32 %v1543_v19, %v1537_v48  ;;  %v1564_v5 = vadd.f32 %v1544_v21, %v1538_v49 }
 0x169   : > { %1570 = vst [vmem:[%s3107_s3 + $0x28] sm:$0xff] %v1554_v31  ;;  %v1625_v6 = vmul.f32 %v1557_v55, %v1557_v55  ;;  %v1626_v7 = vmul.f32 %v1558_v56, %v1558_v56  ;;  %v1627_v8 = vmul.f32 %v1559_v58, %v1559_v58  ;;  %v1628_v9 = vmul.f32 %v1560_v61, %v1560_v61 }
 0x16a   : > { %1571 = vst [vmem:[%s3107_s3 + $0x30] sm:$0xff] %v1555_v32  ;;  %v1582_v57 = vadd.f32 %v1581_v43, %v1557_v55  ;;  %v1591_v10 = vadd.f32 %v1590_v45, %v1558_v56  ;;  %v1600_v62 = vadd.f32 %v1599_v50, %v1559_v58  ;;  %v1609_v11 = vadd.f32 %v1608_v52, %v1560_v61 }
 0x16b   : > { %1572 = vst [vmem:[%s3107_s3 + $0x38] sm:$0xff] %v1556_v33  ;;  %v1629_v63 = vmul.f32 %v1561_v0, %v1561_v0  ;;  %v1633_v12 = vadd.f32 %v1621_v44, %v1617_v36  ;;  %v1630_v2 = vmul.f32 %v1562_v3, %v1562_v3  ;;  %v1642_v53 = vadd.f32 %v1622_v46, %v1618_v37 }
 0x16c   : > { %1573 = vst [vmem:[%s3107_s3 + $0x40] sm:$0xff] %v1557_v55  ;;  %v1583_v13 = vadd.f32 %v1582_v57, %v1561_v0  ;;  %v1592_v59 = vadd.f32 %v1591_v10, %v1562_v3  ;;  %v1601_v14 = vadd.f32 %v1600_v62, %v1563_v4  ;;  %v1610_v60 = vadd.f32 %v1609_v11, %v1564_v5 }
 0x16d   : > { %1574 = vst [vmem:[%s3107_s3 + $0x48] sm:$0xff] %v1558_v56  ;;  %v1634_v15 = vadd.f32 %v1633_v12, %v1625_v6  ;;  %v1643_v1 = vadd.f32 %v1642_v53, %v1626_v7  ;;  %v1631_v16 = vmul.f32 %v1563_v4, %v1563_v4  ;;  %v1651_v17 = vadd.f32 %v1623_v51, %v1619_v38 }
 0x16e   : > { %1575 = vst [vmem:[%s3107_s3 + $0x50] sm:$0xff] %v1559_v58  ;;  %v1584_v18 = vrot.slane %v1583_v13, 4  ;;  %v1593_v19 = vrot.slane %v1592_v59, 4  ;;  %v1602_v20 = vrot.slane %v1601_v14, 4  ;;  %v1611_v21 = vrot.slane %v1610_v60, 4 }
 0x16f   : > { %1576 = vst [vmem:[%s3107_s3 + $0x58] sm:$0xff] %v1560_v61  ;;  %v1635_v22 = vadd.f32 %v1634_v15, %v1629_v63  ;;  %v1644_v23 = vadd.f32 %v1643_v1, %v1630_v2  ;;  %v1652_v24 = vadd.f32 %v1651_v17, %v1627_v8  ;;  %v1632_v25 = vmul.f32 %v1564_v5, %v1564_v5 }
 0x170   : > { %1577 = vst [vmem:[%s3107_s3 + $0x60] sm:$0xff] %v1561_v0  ;;  %v1585_v26 = vadd.f32 %v1584_v18, %v1583_v13  ;;  %v1594_v27 = vadd.f32 %v1593_v19, %v1592_v59  ;;  %v1603_v28 = vadd.f32 %v1602_v20, %v1601_v14  ;;  %v1612_v29 = vadd.f32 %v1611_v21, %v1610_v60 }
 0x171   : > { %1578 = vst [vmem:[%s3107_s3 + $0x68] sm:$0xff] %v1562_v3  ;;  %v1636_v30 = vrot.slane %v1635_v22, 4  ;;  %v1645_v31 = vrot.slane %v1644_v23, 4  ;;  %v1653_v32 = vadd.f32 %v1652_v24, %v1631_v16  ;;  %v1660_v33 = vadd.f32 %v1624_v54, %v3017_v39 }
 0x172   : > { %1579 = vst [vmem:[%s3107_s3 + $0x70] sm:$0xff] %v1563_v4  ;;  %v1586_v34 = vrot.slane %v1585_v26, 2  ;;  %v1595_v35 = vrot.slane %v1594_v27, 2  ;;  %v1604_v36 = vrot.slane %v1603_v28, 2  ;;  %v1613_v37 = vrot.slane %v1612_v29, 2 }
 0x173   : > { %1580 = vst [vmem:[%s3107_s3 + $0x78] sm:$0xff] %v1564_v5  ;;  %v1637_v38 = vadd.f32 %v1636_v30, %v1635_v22  ;;  %v1646_v40 = vadd.f32 %v1645_v31, %v1644_v23  ;;  %v1654_v41 = vrot.slane %v1653_v32, 4  ;;  %v1661_v42 = vadd.f32 %v1660_v33, %v1628_v9 }
 0x174   : > { %v1587_v43 = vadd.f32 %v1586_v34, %v1585_v26  ;;  %v1596_v44 = vadd.f32 %v1595_v35, %v1594_v27  ;;  %v1605_v45 = vadd.f32 %v1604_v36, %v1603_v28  ;;  %v1614_v39 = vadd.f32 %v1613_v37, %v1612_v29 }
 0x175   : > { %v1638_v46 = vrot.slane %v1637_v38, 2  ;;  %v1647_v47 = vrot.slane %v1646_v40, 2  ;;  %v1655_v48 = vadd.f32 %v1654_v41, %v1653_v32  ;;  %v1662_v49 = vadd.f32 %v1661_v42, %v1632_v25 }
 0x176   : > { %v1588_v50 = vrot.slane %v1587_v43, 1  ;;  %v1597_v51 = vrot.slane %v1596_v44, 1  ;;  %v1606_v52 = vrot.slane %v1605_v45, 1  ;;  %v1615_v54 = vrot.slane %v1614_v39, 1 }
 0x177   : > { %v1639_v55 = vadd.f32 %v1638_v46, %v1637_v38  ;;  %v1648_v56 = vadd.f32 %v1647_v47, %v1646_v40  ;;  %v1656_v58 = vrot.slane %v1655_v48, 2  ;;  %v1663_v61 = vrot.slane %v1662_v49, 4 }
 0x178   : > { %v1589_v0 = vadd.f32 %v1588_v50, %v1587_v43  ;;  %v1598_v3 = vadd.f32 %v1597_v51, %v1596_v44  ;;  %v1607_v4 = vadd.f32 %v1606_v52, %v1605_v45  ;;  %v1616_v5 = vadd.f32 %v1615_v54, %v1614_v39 }
 0x179   : > { %v1640_v6 = vrot.slane %v1639_v55, 1  ;;  %v1649_v7 = vrot.slane %v1648_v56, 1  ;;  %v1657_v8 = vadd.f32 %v1656_v58, %v1655_v48  ;;  %v1664_v9 = vadd.f32 %v1663_v61, %v1662_v49 }
 0x17a   : > { %1669 = vst [vmem:[%s3108_s4] sm:$0xff] %v1589_v0 }
 0x17b   : > { %1670 = vst [vmem:[%s3108_s4 + $0x8] sm:$0xff] %v1598_v3  ;;  %v1641_v57 = vadd.f32 %v1640_v6, %v1639_v55  ;;  %v1650_v10 = vadd.f32 %v1649_v7, %v1648_v56  ;;  %v1658_v62 = vrot.slane %v1657_v8, 1  ;;  %v1665_v11 = vrot.slane %v1664_v9, 2 }
 0x17c   : > { %1671 = vst [vmem:[%s3108_s4 + $0x10] sm:$0xff] %v1607_v4 }
 0x17d   : > { %1672 = vst [vmem:[%s3108_s4 + $0x18] sm:$0xff] %v1616_v5  ;;  %v1659_v63 = vadd.f32 %v1658_v62, %v1657_v8  ;;  %v1666_v12 = vadd.f32 %v1665_v11, %v1664_v9 }
 0x17e   : > { %1673 = vst [vmem:[%s3109_s5] sm:$0xff] %v1641_v57 }
 0x17f   : > { %1674 = vst [vmem:[%s3109_s5 + $0x8] sm:$0xff] %v1650_v10  ;;  %v1667_v2 = vrot.slane %v1666_v12, 1 }
 0x180   : > { %1675 = vst [vmem:[%s3109_s5 + $0x10] sm:$0xff] %v1659_v63 }
 0x181   : > { %v1668_v53 = vadd.f32 %v1667_v2, %v1666_v12 }
 0x183   : > { %1676 = vst [vmem:[%s3109_s5 + $0x18] sm:$0xff] %v1668_v53 }
 0x184 PF: > { %s16_s22 = sadd.s32 1, %s2602_s22   ;;  %s3110_s18 = smov %s2590_s19 }
 0x185   : > { %p13_p12 = scmp.ge.s32.totalorder %s16_s22, 10   ;;  %s3111_s19 = smov %s2670_s26 }
 0x186   : > { %s3112_s20 = smov %s2598_s21  ;;  %s3113_s21 = smov %s3115_s23 }
 0x187   :  { %15 = sbr.rel (!%p13_p12) target bundleno = 3 (0x3), region = 125 }

// kernel: discriminator_forward.15
= control target key start
LH: loop header
LB: loop body
LE: loop exit
PB: predicated region body
PF: predicated region fallthrough
CT: control target
= control target key end

     0   :  { %11 = vsyncpa [#allocation5], 0  ;;  %s1360_s0 = inlined_call_operand.vmem [shape: bf16[16,8192], index: 0, kind: input, shape index: {}]   ;;  %s1361_s1 = inlined_call_operand.vmem [shape: bf16[8192,128], index: 1, kind: input, shape index: {}]   ;;  %s1362_s2 = inlined_call_operand.vmem [shape: f32[1,128], index: 2, kind: input, shape index: {}]   ;;  %s1363_s3 = inlined_call_operand.vmem [shape: f32[16,128], index: 3, kind: output, shape index: {0}]   ;;  %s1364_s4 = inlined_call_operand.hbm [shape: f32[1,8,128], index: 4, kind: output, shape index: {1}]   ;;  %s1365_s5 = inlined_call_operand.hbm [shape: f32[1,8,128], index: 5, kind: output, shape index: {2}]  }
   0x1   :  { %12 = vsyncpa [#allocation7], 0  ;;  %s1215_s18 = smov 0   ;;  %s1217_s19 = smov 0  }
   0x2   :  { %s1219_s20 = smov 0   ;;  %s1221_s21 = smov 0  }
   0x3   :  { %s1223_s22 = smov 0  }
   0x4 LB: > { %s821_s23 = sadd.s32 4294967295, %s1180_s22   ;;  %s27_s24 = sadd.s32 1, %s1176_s21  ;;  %s1180_s22 = sphi %s1223_s22, %s18_s22   ;;  %s1176_s21 = sphi %s1221_s21, %s1370_s21   ;;  %s1172_s20 = sphi %s1219_s20, %s1369_s20   ;;  %s1168_s19 = sphi %s1217_s19, %s1368_s19   ;;  %s1164_s18 = sphi %s1215_s18, %s1367_s18  }
   0x5   : > { %p28_p0 = scmp.ge.s32.totalorder %s27_s24, 16  ;;  %p46_p1 = scmp.ne.s32.totalorder %s1168_s19, %s1164_s18 }
   0x6   : > { %p47_p2 = scmp.eq.s32.totalorder %s1180_s22, 0  ;;  %s39_s26 = sadd.s32 1, %s1168_s19 }
   0x7   : > { %s1372_s24 = smov (%p28_p0, %s27_s24), 0  ;;  %p823_p5 = scmp.ge.s32.totalorder %s1180_s22, 16 }
   0x8   : > { %p48_p3 = por %p47_p2, %p46_p1  ;;  %s35_s25 = ssub.s32 %s1176_s21, %s1372_s24 }
   0x9   : > { %p37_p4 = scmp.eq.s32.totalorder %s35_s25, 0  ;;  %200 = sbr.rel (%p823_p5) target bundleno = 22 (0x16), region = 20 }
   0xb   : > { %s1251_s27 = scalar_select %p37_p4, %s1168_s19, %s39_s26  }
   0xe   : > { %203 = sbr.rel (!%p48_p3) target bundleno = 22 (0x16), region = 24  ;;  %s205_s28 = sand.u32 (%p48_p3), 1, %s1168_s19  }
   0xf   : > { %s985_s29 = sshll.u32 (%p48_p3), %s1176_s21, 4  ;;  %s824_s30 = sshll.u32 (%p48_p3), %s205_s28, 5 }
  0x10   : > { %s213_s8 = scalar_lea.vmem (%p48_p3), %s1360_s0, %s985_s29  ;;  %s207_s9 = scalar_lea.vmem (%p48_p3), [#allocation3], %s824_s30 }
  0x11   : > { %v226_v0 = vld [vmem:[%s213_s8] sm:$0xff] (%p48_p3)  ;;  %v228_v1 = vld [vmem:[%s213_s8 + $0x8] sm:$0xff] (%p48_p3) }
  0x12   : > { %v230_v2 = vld [vmem:[%s213_s8 + $0x100] sm:$0xff] (%p48_p3)  ;;  %227 = vst [vmem:[%s207_s9] sm:$0xff] (%p48_p3), %v226_v0  ;;  %v232_v3 = vld [vmem:[%s213_s8 + $0x108] sm:$0xff] (%p48_p3) }
  0x13   : > { %229 = vst [vmem:[%s207_s9 + $0x8] sm:$0xff] %v228_v1 }
  0x14   : > { %231 = vst [vmem:[%s207_s9 + $0x10] sm:$0xff] %v230_v2 }
  0x15   : > { %233 = vst [vmem:[%s207_s9 + $0x18] sm:$0xff] %v232_v3 }
  0x16 PF: > { %p827_p6 = scmp.ge.s32.totalorder %s1180_s22, 1  ;;  %p247_p7 = scmp.lt.s32.totalorder %s1180_s22, 17 }
  0x18   : > { %p248_p8 = pnand %p827_p6, %p247_p7 }
  0x19   : > { %s254_s10 = sand.u32 (!%p248_p8), 1, %s1164_s18   ;;  %s829_s11 = sshll.u32 (!%p248_p8), %s1172_s20, 6 }
  0x1a   : > { %251 = sbr.rel (%p248_p8) target bundleno = 256 (0x100), region = 51  ;;  %s828_s12 = sshll.u32 (!%p248_p8), %s254_s10, 5 }
  0x1b   : > { %p289_p9 = scmp.lt.s32.totalorder (!%p248_p8), %s829_s11, 1023  ;;  %s1268_s17 = scalar_lea.vmem (!%p248_p8), [#allocation3], %s828_s12 }
  0x1c   : > { %p831_p10 = scmp.ne.s32.totalorder (!%p248_p8), %s1172_s20, 0 }
  0x1f   : > { %s1374_s11 = smov (!%p289_p9, %s829_s11), 1023  ;;  %303 = sbr.rel (%p831_p10) target bundleno = 39 (0x27), region = 59 }
  0x20   : > { %s830_s13 = sshll.u32 %s1374_s11, 2 }
  0x21   : > { %s1266_s16 = scalar_lea.vmem %s1361_s1, %s830_s13 }
  0x24   : > { %v1182_v4 = vmov 0.0  }
  0x25   : > { %304 = vst [vmem:[#allocation2] sm:$0xff] %v1182_v4 }
  0x26   : > { %305 = vst [vmem:[#allocation2 + $0x8] sm:$0xff] %v1182_v4 }
  0x27 PF: > { %v997_v5 = vld [vmem:[%s1266_s16 + $0x38] sm:$0xff]  ;;  %v996_v9 = vld [vmem:[%s1266_s16 + $0x30] sm:$0xff]  ;;  %v995_v13 = vld [vmem:[%s1266_s16 + $0x28] sm:$0xff]  ;;  %p976_p11 = scmp.ne.s32.totalorder %s1172_s20, 15 }
  0x28   : > { %v1005_v6 = vld [vmem:[%s1266_s16 + $0x78] sm:$0xff]  ;;  %588 = vmatpush.bf16.msra.mxu0 %v997_v5  ;;  %v1004_v10 = vld [vmem:[%s1266_s16 + $0x70] sm:$0xff]  ;;  %v1003_v14 = vld [vmem:[%s1266_s16 + $0x68] sm:$0xff] }
  0x29   : > { %v1013_v7 = vld [vmem:[%s1266_s16 + $0xb8] sm:$0xff]  ;;  %602 = vmatpush.bf16.msra.mxu1 %v1005_v6  ;;  %v1012_v11 = vld [vmem:[%s1266_s16 + $0xb0] sm:$0xff]  ;;  %v1011_v15 = vld [vmem:[%s1266_s16 + $0xa8] sm:$0xff] }
  0x2a   : > { %v1021_v8 = vld [vmem:[%s1266_s16 + $0xf8] sm:$0xff]  ;;  %616 = vmatpush.bf16.msra.mxu2 %v1013_v7  ;;  %v1020_v12 = vld [vmem:[%s1266_s16 + $0xf0] sm:$0xff]  ;;  %v1019_v16 = vld [vmem:[%s1266_s16 + $0xe8] sm:$0xff] }
  0x2b   : > { %630 = vmatpush.bf16.msra.mxu3 %v1021_v8  ;;  %v994_v17 = vld [vmem:[%s1266_s16 + $0x20] sm:$0xff]  ;;  %v993_v21 = vld [vmem:[%s1266_s16 + $0x18] sm:$0xff]  ;;  %v992_v25 = vld [vmem:[%s1266_s16 + $0x10] sm:$0xff] }
  0x2c   : > { %589 = vmatpush.bf16.msra.mxu0 %v996_v9  ;;  %v1002_v18 = vld [vmem:[%s1266_s16 + $0x60] sm:$0xff]  ;;  %v1001_v22 = vld [vmem:[%s1266_s16 + $0x58] sm:$0xff]  ;;  %v1000_v26 = vld [vmem:[%s1266_s16 + $0x50] sm:$0xff] }
  0x2d   : > { %603 = vmatpush.bf16.msra.mxu1 %v1004_v10  ;;  %v1010_v19 = vld [vmem:[%s1266_s16 + $0xa0] sm:$0xff]  ;;  %v1009_v23 = vld [vmem:[%s1266_s16 + $0x98] sm:$0xff]  ;;  %v1008_v27 = vld [vmem:[%s1266_s16 + $0x90] sm:$0xff] }
  0x2e   : > { %617 = vmatpush.bf16.msra.mxu2 %v1012_v11  ;;  %v1018_v20 = vld [vmem:[%s1266_s16 + $0xe0] sm:$0xff]  ;;  %v1017_v24 = vld [vmem:[%s1266_s16 + $0xd8] sm:$0xff]  ;;  %v1016_v28 = vld [vmem:[%s1266_s16 + $0xd0] sm:$0xff] }
  0x2f   : > { %631 = vmatpush.bf16.msra.mxu3 %v1020_v12  ;;  %v991_v29 = vld [vmem:[%s1266_s16 + $0x8] sm:$0xff]  ;;  %v990_v33 = vld [vmem:[%s1266_s16] sm:$0xff]  ;;  %v834_v37 = vld [vmem:[%s1268_s17] sm:$0xf] }
  0x30   : > { %590 = vmatpush.bf16.msra.mxu0 %v995_v13  ;;  %v999_v30 = vld [vmem:[%s1266_s16 + $0x48] sm:$0xff]  ;;  %v998_v34 = vld [vmem:[%s1266_s16 + $0x40] sm:$0xff]  ;;  %v986_v39 = vld [vmem:[%s1268_s17 + $0x4] sm:$0xf] }
  0x31   : > { %604 = vmatpush.bf16.msra.mxu1 %v1003_v14  ;;  %v1007_v31 = vld [vmem:[%s1266_s16 + $0x88] sm:$0xff]  ;;  %v1006_v35 = vld [vmem:[%s1266_s16 + $0x80] sm:$0xff]  ;;  %v842_v41 = vld [vmem:[%s1268_s17 + $0x8] sm:$0xf] }
  0x32   : > { %618 = vmatpush.bf16.msra.mxu2 %v1011_v15  ;;  %v1015_v32 = vld [vmem:[%s1266_s16 + $0xc8] sm:$0xff]  ;;  %v1014_v36 = vld [vmem:[%s1266_s16 + $0xc0] sm:$0xff]  ;;  %v987_v43 = vld [vmem:[%s1268_s17 + $0xc] sm:$0xf] }
  0x33   : > { %632 = vmatpush.bf16.msra.mxu3 %v1019_v16  ;;  %v988_v38 = vld [vmem:[%s1268_s17 + $0xc] sm:$0xf0]  ;;  %v836_v40 = vld [vmem:[%s1268_s17 + $0x10] sm:$0xf0]  ;;  %v989_v42 = vld [vmem:[%s1268_s17 + $0x14] sm:$0xf0] }
  0x34   : > { %591 = vmatpush.bf16.msra.mxu0 %v994_v17  ;;  %v844_v44 = vld [vmem:[%s1268_s17 + $0x18] sm:$0xf0]  ;;  %v835_v45 = vor.u32 %v988_v38, %v834_v37  ;;  %v839_v46 = vor.u32 %v986_v39, %v836_v40  ;;  %v843_v47 = vor.u32 %v989_v42, %v842_v41  ;;  %v306_v55 = vld [vmem:[#allocation2] sm:$0xff] }
  0x35   : > { %605 = vmatpush.bf16.msra.mxu1 %v1002_v18  ;;  %v847_v48 = vor.u32 %v987_v43, %v844_v44  ;;  %v307_v63 = vld [vmem:[#allocation2 + $0x8] sm:$0xff] }
  0x36   : > { %619 = vmatpush.bf16.msra.mxu2 %v1010_v19 }
  0x37   : > { %633 = vmatpush.bf16.msra.mxu3 %v1018_v20 }
  0x38   : > { %592 = vmatpush.bf16.msra.mxu0 %v993_v21 }
  0x39   : > { %606 = vmatpush.bf16.msra.mxu1 %v1001_v22 }
  0x3a   : > { %620 = vmatpush.bf16.msra.mxu2 %v1009_v23 }
  0x3b   : > { %634 = vmatpush.bf16.msra.mxu3 %v1017_v24 }
  0x3c   : > { %593 = vmatpush.bf16.msra.mxu0 %v992_v25 }
  0x3d   : > { %607 = vmatpush.bf16.msra.mxu1 %v1000_v26 }
  0x3e   : > { %621 = vmatpush.bf16.msra.mxu2 %v1008_v27 }
  0x3f   : > { %635 = vmatpush.bf16.msra.mxu3 %v1016_v28 }
  0x40   : > { %594 = vmatpush.bf16.msra.mxu0 %v991_v29 }
  0x41   : > { %608 = vmatpush.bf16.msra.mxu1 %v999_v30 }
  0x42   : > { %622 = vmatpush.bf16.msra.mxu2 %v1007_v31 }
  0x43   : > { %636 = vmatpush.bf16.msra.mxu3 %v1015_v32 }
  0x44   : > { %595 = vmatpush.bf16.msra.mxu0 %v990_v33 }
  0x45   : > { %609 = vmatpush.bf16.msra.mxu1 %v998_v34 }
  0x46   : > { %623 = vmatpush.bf16.msra.mxu2 %v1006_v35 }
  0x47   : > { %637 = vmatpush.bf16.msra.mxu3 %v1014_v36  ;;  %596 = vmatmul.bf16.vlgmr.msra.gmra.mxu0 %v835_v45 }
  0x48   : > { %610 = vmatmul.bf16.vlgmr.msra.gmra.mxu1 %v839_v46 }
  0x49   : > { %624 = vmatmul.bf16.vlgmr.msra.gmra.mxu2 %v843_v47 }
  0x4a   : > { %638 = vmatmul.bf16.vlgmr.msra.gmra.mxu3 %v847_v48 }
  0xc4   : > { %v597_v49 = vpop.f32.mrf.mxu0 }
  0xc5   : > { %v611_v50 = vpop.f32.mrf.mxu1 }
  0xc6   : > { %v612_v51 = vadd.f32 %v611_v50, %v597_v49 }
  0xcc   : > { %v625_v52 = vpop.f32.mrf.mxu2  ;;  %v599_v57 = vpop.f32.mrf.mxu0 }
  0xcd   : > { %v639_v53 = vpop.f32.mrf.mxu3  ;;  %v626_v54 = vadd.f32 %v625_v52, %v612_v51  ;;  %v613_v58 = vpop.f32.mrf.mxu1 }
  0xce   : > { %v614_v60 = vadd.f32 %v613_v58, %v599_v57 }
  0xcf   : > { %v640_v56 = vadd.f32 %v639_v53, %v626_v54 }
  0xd1   : > { %v644_v59 = vadd.f32 %v640_v56, %v306_v55 }
  0xd3   : > { %646 = vst [vmem:[#allocation2] sm:$0xff] %v644_v59 }
  0xd4   : > { %v627_v61 = vpop.f32.mrf.mxu2 }
  0xd5   : > { %v628_v62 = vadd.f32 %v627_v61, %v614_v60  ;;  %v641_v0 = vpop.f32.mrf.mxu3 }
  0xd7   : > { %v642_v1 = vadd.f32 %v641_v0, %v628_v62  ;;  %651 = sbr.rel (%p976_p11) target bundleno = 246 (0xf6), region = 63 }
  0xd9   : > { %v645_v2 = vadd.f32 %v642_v1, %v307_v63 }
  0xdb   : > { %647 = vst [vmem:[#allocation2 + $0x8] sm:$0xff] %v645_v2 }
  0xdc   : > { %v652_v3 = vld [vmem:[#allocation2] sm:$0xff] }
  0xdd   : > { %v1077_v4 = vld [vmem:[%s1362_s2] ss:$0 sm:$0xff] }
  0xde   : > { %v658_v6 = vadd.f32 %v1077_v4, %v652_v3 }
  0xe0   : > { %660 = vst [vmem:[%s1363_s3] sm:$0xff] %v658_v6  ;;  %v669_v9 = vmul.f32 %v658_v6, %v658_v6 }
  0xe2   : > { %v653_v5 = vld [vmem:[#allocation2 + $0x8] sm:$0xff] }
  0xe3   : > { %v659_v7 = vadd.f32 %v1077_v4, %v653_v5 }
  0xe5   : > { %v662_v8 = vadd.f32 %v659_v7, %v658_v6  ;;  %v670_v10 = vmul.f32 %v659_v7, %v659_v7  ;;  %661 = vst [vmem:[%s1363_s3 + $0x8] sm:$0xff] %v659_v7 }
  0xe7   : > { %v663_v11 = vrot.slane %v662_v8, 4  ;;  %v671_v12 = vadd.f32 %v670_v10, %v669_v9 }
  0xe9   : > { %v664_v13 = vadd.f32 %v663_v11, %v662_v8  ;;  %v672_v14 = vrot.slane %v671_v12, 4 }
  0xeb   : > { %v665_v15 = vrot.slane %v664_v13, 2  ;;  %v673_v16 = vadd.f32 %v672_v14, %v671_v12 }
  0xed   : > { %v666_v17 = vadd.f32 %v665_v15, %v664_v13  ;;  %v674_v18 = vrot.slane %v673_v16, 2 }
  0xef   : > { %v667_v19 = vrot.slane %v666_v17, 1  ;;  %v675_v20 = vadd.f32 %v674_v18, %v673_v16 }
  0xf1   : > { %v668_v21 = vadd.f32 %v667_v19, %v666_v17  ;;  %v676_v22 = vrot.slane %v675_v20, 1 }
  0xf3   : > { %678 = vst [vmem:[#allocation4] sm:$0xff] %v668_v21  ;;  %v677_v23 = vadd.f32 %v676_v22, %v675_v20 }
  0xf5   : > { %679 = vst [vmem:[#allocation6] sm:$0xff] %v677_v23 }
  0xf6 PF: > { %p1323_p12 = scmp.eq.s32.totalorder %s821_s23, 15  ;;  %s699_s8 = sshll.u32 %s1364_s4, 4  ;;  %s700_s8 = int_to_ptr.hbm [resolvable:$true] %s699_s8 }
  0xf7   : > { %s1183_s9 = smov [#allocation4]   ;;  %s1184_s11 = smov [#allocation6]  }
  0xf8   : > { %s697_s10 = sshll.u32 %s1183_s9, 4  ;;  %s711_s12 = sshll.u32 %s1184_s11, 4  ;;  %s698_s10 = int_to_ptr.vmem [resolvable:$true] %s697_s10  ;;  %s712_s12 = int_to_ptr.vmem [resolvable:$true] %s711_s12 }
  0xf9   : > { %1023 = dma.vmem_to_hbm [thread:$0]  (%p1323_p12), %s698_s10, 128, %s700_s8, [#allocation5]  }
  0xfa   : > { %s713_s14 = sshll.u32 %s1365_s5, 4  ;;  %s714_s14 = int_to_ptr.hbm [resolvable:$true] %s713_s14 }
  0xfb   : > { %1025 = dma.vmem_to_hbm [thread:$0]  (%p1323_p12), %s712_s12, 128, %s714_s14, [#allocation7]  }
  0xfc   : > { %1155 = dma.done.wait (%p1323_p12), [#allocation5], 128  }
  0xfd   : > { %1157 = vsyncadd (%p1323_p12), [#allocation5], 4294967168 }
  0xfe   : > { %1159 = dma.done.wait (%p1323_p12), [#allocation7], 128  }
  0xff   : > { %1161 = vsyncadd (%p1323_p12), [#allocation7], 4294967168 }
 0x100 PF: > { %s18_s22 = sadd.s32 1, %s1180_s22   ;;  %s1367_s18 = smov %s1168_s19 }
 0x101   : > { %p15_p13 = scmp.ge.s32.totalorder %s18_s22, 18   ;;  %s1368_s19 = smov %s1251_s27 }
 0x102   : > { %s1369_s20 = smov %s1176_s21  ;;  %s1370_s21 = smov %s1372_s24 }
 0x103   :  { %17 = sbr.rel (!%p15_p13) target bundleno = 4 (0x4), region = 120 }
 0x108   :  { %740 = vsyncpa [#allocation5], 1 }
 0x109   :  { %742 = vsyncpa [#allocation5 + $0x1], 1 }
 0x10a   :  { %743 = vsyncpa [#allocation7], 1 }

</bundles_post_ra>
